<compile_context>
chip_gen: v7x
topology: tpu7x:2x2x1
jax: 0.10.0
libtpu: 0.0.40
codegen_flags: <defaults>
</compile_context>

<pallas_src>
import functools

import jax
import jax.numpy as jnp
from jax import lax
from jax.experimental import pallas as pl
from jax.experimental.pallas import tpu as pltpu

LANES = 128


def _multibox_loss_kernel(
    targets_ref,   # (O, 5)        f32  gt corner boxes + label (label<=0 = pad)
    pf_ref,        # (11, R, 128)  f32  precomputed prior features
    loc_ref,       # (4, R, 128)   predicted loc offsets (native dtype)
    conf_ref,      # (C, R, 128)   class logits (native dtype)
    out_ref,       # (1, 128)      f32  per-image [loss_l, loss_c, num_pos, 0..]
    *, threshold, neg_pos_ratio, inv_var1, num_real_priors,
    num_objects, num_classes,
):
    f32 = jnp.float32
    R = pf_ref.shape[1]
    L = LANES
    p_pad = R * L

    # per-prior flat index grid (prior p lives at (p // L, p % L))
    r_iota = lax.broadcasted_iota(jnp.int32, (R, L), 0)
    l_iota = lax.broadcasted_iota(jnp.int32, (R, L), 1)
    flat_idx = r_iota * L + l_iota
    pvalid = flat_idx < num_real_priors            # mask out lane-padding priors

    # batch-invariant prior features (precomputed in the wrapper)
    px1 = pf_ref[0]
    py1 = pf_ref[1]
    px2 = pf_ref[2]
    py2 = pf_ref[3]
    pcx = pf_ref[4]
    pcy = pf_ref[5]
    inv_v0pw = pf_ref[6]
    inv_v0ph = pf_ref[7]
    inv_pw = pf_ref[8]
    inv_ph = pf_ref[9]
    area_p = pf_ref[10]

    t = targets_ref[...]                           # (O, 5)

    # ---- streaming jaccard match over the ground-truth objects ----
    best_ovl = jnp.full((R, L), -1.0, f32)
    best_idx = jnp.zeros((R, L), jnp.int32)
    forced_idx = jnp.full((R, L), -1, jnp.int32)

    tbox = []
    for o in range(num_objects):
        tx1 = t[o:o + 1, 0:1]                      # (1, 1)
        ty1 = t[o:o + 1, 1:2]
        tx2 = t[o:o + 1, 2:3]
        ty2 = t[o:o + 1, 3:4]
        lab = t[o:o + 1, 4:5]
        tbox.append((tx1, ty1, tx2, ty2, lab))

        area_t = (tx2 - tx1) * (ty2 - ty1)                       # (1, 1)
        valid = jnp.logical_and(lab > 0.0, area_t > 0.0)         # padded-row mask

        ix1 = jnp.maximum(px1, tx1)
        iy1 = jnp.maximum(py1, ty1)
        ix2 = jnp.minimum(px2, tx2)
        iy2 = jnp.minimum(py2, ty2)
        inter = jnp.maximum(ix2 - ix1, 0.0) * jnp.maximum(iy2 - iy1, 0.0)
        iou = inter / (area_p + area_t - inter)                  # (R, L)
        ov = jnp.where(jnp.logical_and(valid, pvalid), iou, -1.0)

        # best ground truth per prior (running max; ties -> lowest object idx)
        upd = ov > best_ovl
        best_ovl = jnp.where(upd, ov, best_ovl)
        best_idx = jnp.where(upd, o, best_idx)

        # best prior per ground truth (argmax; ties -> lowest prior idx):
        # that prior is force-matched to this object (index_fill_(..., 2)).
        mx = jnp.max(ov, keepdims=True)                          # (1, 1)
        amax = jnp.min(jnp.where(ov == mx, flat_idx, p_pad), keepdims=True)
        force = jnp.logical_and(valid, flat_idx == amax)
        forced_idx = jnp.where(force, o, forced_idx)

    is_forced = forced_idx >= 0
    best_ovl = jnp.where(is_forced, 2.0, best_ovl)
    best_idx = jnp.where(is_forced, forced_idx, best_idx)

    # gather the matched gt box + label for every prior
    m_x1 = jnp.zeros((R, L), f32)
    m_y1 = jnp.zeros((R, L), f32)
    m_x2 = jnp.zeros((R, L), f32)
    m_y2 = jnp.zeros((R, L), f32)
    m_lab = jnp.zeros((R, L), f32)
    for o in range(num_objects):
        tx1, ty1, tx2, ty2, lab = tbox[o]
        sel = best_idx == o
        m_x1 = jnp.where(sel, tx1, m_x1)
        m_y1 = jnp.where(sel, ty1, m_y1)
        m_x2 = jnp.where(sel, tx2, m_x2)
        m_y2 = jnp.where(sel, ty2, m_y2)
        m_lab = jnp.where(sel, lab, m_lab)

    conf_lbl = jnp.where(best_ovl < threshold, 0.0, m_lab)
    lbl_i = conf_lbl.astype(jnp.int32)
    pos = lbl_i > 0                                              # (R, L)
    num_pos = jnp.sum(jnp.where(pos, 1.0, 0.0), keepdims=True)   # (1, 1)
    num_neg = jnp.minimum(neg_pos_ratio * num_pos,
                          float(num_real_priors - 1))            # (1, 1)

    # ---- localization loss: encode + smooth L1 over positive priors ----
    g_cx = ((m_x1 + m_x2) * 0.5 - pcx) * inv_v0pw
    g_cy = ((m_y1 + m_y2) * 0.5 - pcy) * inv_v0ph
    g_w = jnp.log(jnp.maximum(m_x2 - m_x1, 1e-12) * inv_pw) * inv_var1
    g_h = jnp.log(jnp.maximum(m_y2 - m_y1, 1e-12) * inv_ph) * inv_var1

    def sl1(d):
        ad = jnp.abs(d)
        return jnp.where(ad < 1.0, 0.5 * d * d, ad - 0.5)

    l_sum = (sl1(loc_ref[0].astype(f32) - g_cx)
             + sl1(loc_ref[1].astype(f32) - g_cy)
             + sl1(loc_ref[2].astype(f32) - g_w)
             + sl1(loc_ref[3].astype(f32) - g_h))
    loss_l_b = jnp.sum(jnp.where(pos, l_sum, 0.0), keepdims=True)    # (1, 1)

    # ---- confidence: per-prior cross entropy (log-sum-exp - gathered) ----
    cls = [conf_ref[c].astype(f32) for c in range(num_classes)]
    cmax = cls[0]
    for c in range(1, num_classes):
        cmax = jnp.maximum(cmax, cls[c])
    ssum = jnp.zeros((R, L), f32)
    gathered = jnp.zeros((R, L), f32)
    for c in range(num_classes):
        ssum = ssum + jnp.exp(cls[c] - cmax)
        gathered = jnp.where(lbl_i == c, cls[c], gathered)
    raw_ce = jnp.log(ssum) + cmax - gathered                         # (R, L)

    loss_c_pos = jnp.sum(jnp.where(pos, raw_ce, 0.0), keepdims=True)  # (1, 1)

    # ---- hard negative mining: 31-pass radix-select threshold (exact) ----
    # mined = mining loss (raw_ce for negatives, 0 for positives, -1 padding).
    # All relevant values are >= 0, so the raw f32 bit pattern (as int32) is
    # monotone in the value; a greedy bit-by-bit bisection finds the int key
    # tau of the num_neg-th largest mining loss in 31 passes.  Ties at tau all
    # carry the identical value tau, so
    #   loss_c_neg = sum(mined > tau) + (num_neg - count(mined > tau)) * tau
    # equals the rank-based (double-argsort) selection exactly.
    mined = jnp.where(pos, 0.0, raw_ce)
    mined = jnp.where(pvalid, mined, -1.0)     # padding priors: negative key
    key = pltpu.bitcast(mined, jnp.int32)      # (R, L) int32

    def bit_body(_, carry):
        tau, bitv = carry                      # both (1, 1) int32
        cand = tau | bitv
        cnt = jnp.sum(jnp.where(key >= cand, 1.0, 0.0), keepdims=True)
        tau = jnp.where(cnt >= num_neg, cand, tau)
        return (tau, jnp.right_shift(bitv, 1))

    tau_key, _ = lax.fori_loop(
        0, 31, bit_body,
        (jnp.zeros((1, 1), jnp.int32), jnp.full((1, 1), 1 << 30, jnp.int32)))

    gt_mask = key > tau_key                                          # (R, L)
    cnt_gt = jnp.sum(jnp.where(gt_mask, 1.0, 0.0), keepdims=True)    # (1, 1)
    sum_gt = jnp.sum(jnp.where(gt_mask, mined, 0.0), keepdims=True)  # (1, 1)
    # value of the boundary entry (exists whenever num_neg >= 1)
    tau_val = jnp.max(jnp.where(key == tau_key, mined, -1.0), keepdims=True)
    neg_contrib = sum_gt + (num_neg - cnt_gt) * tau_val
    loss_c_b = loss_c_pos + jnp.where(num_neg >= 1.0, neg_contrib, 0.0)

    # ---- per-image partials: lane-dense [loss_l, loss_c, num_pos, 0, ...] ----
    lane = lax.broadcasted_iota(jnp.int32, (1, L), 1)
    out_ref[...] = (jnp.where(lane == 0, loss_l_b, 0.0)
                    + jnp.where(lane == 1, loss_c_b, 0.0)
                    + jnp.where(lane == 2, num_pos, 0.0))


def multibox_loss(loc_data, conf_data, priors, targets, *,
                  overlap_thresh=0.35, neg_pos=3, variances=(0.1, 0.2)):
    """loc_data [B,P,4], conf_data [B,P,C], priors [P,4] (center form cx,cy,w,h),
    targets [B,O,5] corner boxes + label (rows with label<=0 are padding).
    Returns (loss_l, loss_c), matching MultiBoxLoss.forward."""
    B, P, _ = loc_data.shape
    C = conf_data.shape[-1]
    O = targets.shape[1]
    v0, v1 = float(variances[0]), float(variances[1])
    f32 = jnp.float32

    # keep loc/conf in their native dtype (bf16 stays bf16 all the way into the
    # kernel; the upcast happens on-chip) to halve wrapper+DMA bytes on v5e.
    loc = loc_data
    conf = conf_data
    pri = priors.astype(f32)
    tgt = targets.astype(f32)

    # pad the prior axis to a multiple of 128 lanes with benign dummy priors
    # (they are masked out inside the kernel via `pvalid`)
    p_pad = ((P + LANES - 1) // LANES) * LANES
    R = p_pad // LANES
    if p_pad != P:
        pad = p_pad - P
        loc = jnp.pad(loc, ((0, 0), (0, pad), (0, 0)))
        conf = jnp.pad(conf, ((0, 0), (0, pad), (0, 0)))
        dummy = jnp.tile(jnp.array([[0.5, 0.5, 1.0, 1.0]], f32), (pad, 1))
        pri = jnp.concatenate([pri, dummy], axis=0)

    # batch-invariant prior features, hoisted out of the kernel
    pcx, pcy, pw, ph = pri[:, 0], pri[:, 1], pri[:, 2], pri[:, 3]
    feats = jnp.stack([
        pcx - 0.5 * pw, pcy - 0.5 * ph,           # point-form corners
        pcx + 0.5 * pw, pcy + 0.5 * ph,
        pcx, pcy,
        1.0 / (v0 * pw), 1.0 / (v0 * ph),         # encode denominators
        1.0 / pw, 1.0 / ph,
        pw * ph,                                  # prior areas
    ], axis=0).reshape(11, R, LANES)

    loc_k = jnp.transpose(loc, (0, 2, 1)).reshape(B, 4, R, LANES)
    conf_k = jnp.transpose(conf, (0, 2, 1)).reshape(B, C, R, LANES)

    kernel = functools.partial(
        _multibox_loss_kernel,
        threshold=float(overlap_thresh),
        neg_pos_ratio=float(neg_pos),
        inv_var1=1.0 / v1,
        num_real_priors=int(P),
        num_objects=int(O),
        num_classes=int(C),
    )

    partials = pl.pallas_call(
        kernel,
        out_shape=jax.ShapeDtypeStruct((B, 1, LANES), f32),
        grid_spec=pltpu.PrefetchScalarGridSpec(
            num_scalar_prefetch=0,
            grid=(B,),
            in_specs=[
                pl.BlockSpec((None, O, 5), lambda b: (b, 0, 0)),            # targets
                pl.BlockSpec((11, R, LANES), lambda b: (0, 0, 0)),          # prior feats
                pl.BlockSpec((None, 4, R, LANES), lambda b: (b, 0, 0, 0)),  # loc preds
                pl.BlockSpec((None, C, R, LANES), lambda b: (b, 0, 0, 0)),  # conf preds
            ],
            out_specs=pl.BlockSpec((None, 1, LANES), lambda b: (b, 0, 0)),
        ),
        compiler_params=pltpu.CompilerParams(
            # per-image partials -> no cross-iteration state, so the batch axis
            # can be sharded across TensorCores (2x on v7x, harmless elsewhere).
            # vmem_limit_bytes dropped: footprint is a few MiB with the mining
            # scratch gone, well under the default scoped limit (v7x-safe).
            dimension_semantics=("parallel",),
        ),
    )(tgt, feats, loc_k, conf_k)

    # TODO(synk): for B == 1 on v7x the second TensorCore idles; splitting the
    # prior axis into a second "parallel" grid dim would need a cross-range
    # argmax combine for the force-matching step and is left out.

    loss_l = jnp.sum(partials[:, 0, 0])
    loss_c = jnp.sum(partials[:, 0, 1])
    n = jnp.maximum(jnp.sum(partials[:, 0, 2]), 1.0)
    return loss_l / n, loss_c / n


if __name__ == "__main__":
    key = jax.random.PRNGKey(0)
    B, P, C, O = 2, 128, 2, 8          # batch, num_priors, num_classes, num_objs
    k1, k2, k3, k4, k5, k6 = jax.random.split(key, 6)

    # priors in center form (cx, cy, w, h), normalized coords
    pcxy = jax.random.uniform(k1, (P, 2), minval=0.05, maxval=0.95)
    pwh = jax.random.uniform(k2, (P, 2), minval=0.05, maxval=0.30)
    priors = jnp.concatenate([pcxy, pwh], axis=1).astype(jnp.float32)

    # ground-truth targets [B, O, 5]: corner-form boxes + label (1 = face)
    t_xy1 = jax.random.uniform(k3, (B, O, 2), minval=0.0, maxval=0.6)
    t_wh = jax.random.uniform(k4, (B, O, 2), minval=0.10, maxval=0.35)
    t_xy2 = jnp.clip(t_xy1 + t_wh, 0.0, 1.0)
    labels = jnp.ones((B, O, 1), jnp.float32)
    targets = jnp.concatenate([t_xy1, t_xy2, labels], axis=-1)

    # network predictions (synthetic, deterministic)
    loc_data = 0.1 * jax.random.normal(k5, (B, P, 4), jnp.float32)
    conf_data = jax.random.normal(k6, (B, P, C), jnp.float32)

    loss_l, loss_c = multibox_loss(loc_data, conf_data, priors, targets,
                                   overlap_thresh=0.35, neg_pos=3)
    jax.block_until_ready((loss_l, loss_c))
    assert bool(jnp.isfinite(loss_l)) and bool(jnp.isfinite(loss_c))
    print("KERNEL_OK")
</pallas_src>

<mosaic_0001>
module attributes {stable_mosaic.version = 11 : i64} {
  func.func @_multibox_loss_kernel(%arg0: i32, %arg1: memref<1x8x5xf32, #tpu.memory_space<vmem>>, %arg2: memref<11x1x128xf32, #tpu.memory_space<vmem>>, %arg3: memref<1x4x1x128xf32, #tpu.memory_space<vmem>>, %arg4: memref<1x2x1x128xf32, #tpu.memory_space<vmem>>, %arg5: memref<1x1x128xf32, #tpu.memory_space<vmem>>) attributes {dimension_semantics = [#tpu.dimension_semantics<parallel>], iteration_bounds = array<i64: 2>, scalar_prefetch = 0 : i64, scratch_operands = 0 : i64, tpu.core_type = #tpu.core_type<tc>, window_params = [{transform_indices = @transform_0, window_bounds = array<i64: 1, 8, 5>}, {pipeline_mode = #tpu.pipeline_mode<synchronous>, transform_indices = @transform_1, window_bounds = array<i64: 11, 1, 128>}, {transform_indices = @transform_2, window_bounds = array<i64: 1, 4, 1, 128>}, {transform_indices = @transform_3, window_bounds = array<i64: 1, 2, 1, 128>}, {transform_indices = @transform_4, window_bounds = array<i64: 1, 1, 128>}]} {
    %0 = tpu.iota {dimensions = array<i32: 0>} : vector<1x128xi32>
    %1 = tpu.iota {dimensions = array<i32: 1>} : vector<1x128xi32>
    %c128_i32 = arith.constant 128 : i32
    %2 = vector.broadcast %c128_i32 : i32 to vector<1x128xi32>
    %3 = arith.muli %0, %2 : vector<1x128xi32>
    %4 = arith.addi %3, %1 : vector<1x128xi32>
    %c128_i32_0 = arith.constant 128 : i32
    %5 = vector.broadcast %c128_i32_0 : i32 to vector<1x128xi32>
    %6 = arith.cmpi slt, %4, %5 : vector<1x128xi32>
    %c0 = arith.constant 0 : index
    %c0_1 = arith.constant 0 : index
    %c0_2 = arith.constant 0 : index
    %7 = vector.load %arg2[%c0, %c0_1, %c0_2] : memref<11x1x128xf32, #tpu.memory_space<vmem>>, vector<1x1x128xf32>
    %8 = vector.shape_cast %7 : vector<1x1x128xf32> to vector<1x128xf32>
    %c1 = arith.constant 1 : index
    %c0_3 = arith.constant 0 : index
    %c0_4 = arith.constant 0 : index
    %9 = vector.load %arg2[%c1, %c0_3, %c0_4] : memref<11x1x128xf32, #tpu.memory_space<vmem>>, vector<1x1x128xf32>
    %10 = vector.shape_cast %9 : vector<1x1x128xf32> to vector<1x128xf32>
    %c2 = arith.constant 2 : index
    %c0_5 = arith.constant 0 : index
    %c0_6 = arith.constant 0 : index
    %11 = vector.load %arg2[%c2, %c0_5, %c0_6] : memref<11x1x128xf32, #tpu.memory_space<vmem>>, vector<1x1x128xf32>
    %12 = vector.shape_cast %11 : vector<1x1x128xf32> to vector<1x128xf32>
    %c3 = arith.constant 3 : index
    %c0_7 = arith.constant 0 : index
    %c0_8 = arith.constant 0 : index
    %13 = vector.load %arg2[%c3, %c0_7, %c0_8] : memref<11x1x128xf32, #tpu.memory_space<vmem>>, vector<1x1x128xf32>
    %14 = vector.shape_cast %13 : vector<1x1x128xf32> to vector<1x128xf32>
    %c4 = arith.constant 4 : index
    %c0_9 = arith.constant 0 : index
    %c0_10 = arith.constant 0 : index
    %15 = vector.load %arg2[%c4, %c0_9, %c0_10] : memref<11x1x128xf32, #tpu.memory_space<vmem>>, vector<1x1x128xf32>
    %16 = vector.shape_cast %15 : vector<1x1x128xf32> to vector<1x128xf32>
    %c5 = arith.constant 5 : index
    %c0_11 = arith.constant 0 : index
    %c0_12 = arith.constant 0 : index
    %17 = vector.load %arg2[%c5, %c0_11, %c0_12] : memref<11x1x128xf32, #tpu.memory_space<vmem>>, vector<1x1x128xf32>
    %18 = vector.shape_cast %17 : vector<1x1x128xf32> to vector<1x128xf32>
    %c6 = arith.constant 6 : index
    %c0_13 = arith.constant 0 : index
    %c0_14 = arith.constant 0 : index
    %19 = vector.load %arg2[%c6, %c0_13, %c0_14] : memref<11x1x128xf32, #tpu.memory_space<vmem>>, vector<1x1x128xf32>
    %20 = vector.shape_cast %19 : vector<1x1x128xf32> to vector<1x128xf32>
    %c7 = arith.constant 7 : index
    %c0_15 = arith.constant 0 : index
    %c0_16 = arith.constant 0 : index
    %21 = vector.load %arg2[%c7, %c0_15, %c0_16] : memref<11x1x128xf32, #tpu.memory_space<vmem>>, vector<1x1x128xf32>
    %22 = vector.shape_cast %21 : vector<1x1x128xf32> to vector<1x128xf32>
    %c8 = arith.constant 8 : index
    %c0_17 = arith.constant 0 : index
    %c0_18 = arith.constant 0 : index
    %23 = vector.load %arg2[%c8, %c0_17, %c0_18] : memref<11x1x128xf32, #tpu.memory_space<vmem>>, vector<1x1x128xf32>
    %24 = vector.shape_cast %23 : vector<1x1x128xf32> to vector<1x128xf32>
    %c9 = arith.constant 9 : index
    %c0_19 = arith.constant 0 : index
    %c0_20 = arith.constant 0 : index
    %25 = vector.load %arg2[%c9, %c0_19, %c0_20] : memref<11x1x128xf32, #tpu.memory_space<vmem>>, vector<1x1x128xf32>
    %26 = vector.shape_cast %25 : vector<1x1x128xf32> to vector<1x128xf32>
    %c10 = arith.constant 10 : index
    %c0_21 = arith.constant 0 : index
    %c0_22 = arith.constant 0 : index
    %27 = vector.load %arg2[%c10, %c0_21, %c0_22] : memref<11x1x128xf32, #tpu.memory_space<vmem>>, vector<1x1x128xf32>
    %28 = vector.shape_cast %27 : vector<1x1x128xf32> to vector<1x128xf32>
    %c0_23 = arith.constant 0 : index
    %c0_24 = arith.constant 0 : index
    %c0_25 = arith.constant 0 : index
    %29 = vector.load %arg1[%c0_23, %c0_24, %c0_25] : memref<1x8x5xf32, #tpu.memory_space<vmem>>, vector<1x8x5xf32>
    %30 = vector.shape_cast %29 : vector<1x8x5xf32> to vector<8x5xf32>
    %cst = arith.constant -1.000000e+00 : f32
    %31 = vector.broadcast %cst : f32 to vector<1x128xf32>
    %c0_i32 = arith.constant 0 : i32
    %32 = vector.broadcast %c0_i32 : i32 to vector<1x128xi32>
    %c-1_i32 = arith.constant -1 : i32
    %33 = vector.broadcast %c-1_i32 : i32 to vector<1x128xi32>
    %34 = vector.extract_strided_slice %30 {offsets = [0, 0], sizes = [1, 1], strides = [1, 1]} : vector<8x5xf32> to vector<1x1xf32>
    %35 = vector.extract_strided_slice %30 {offsets = [0, 1], sizes = [1, 1], strides = [1, 1]} : vector<8x5xf32> to vector<1x1xf32>
    %36 = vector.extract_strided_slice %30 {offsets = [0, 2], sizes = [1, 1], strides = [1, 1]} : vector<8x5xf32> to vector<1x1xf32>
    %37 = vector.extract_strided_slice %30 {offsets = [0, 3], sizes = [1, 1], strides = [1, 1]} : vector<8x5xf32> to vector<1x1xf32>
    %38 = vector.extract_strided_slice %30 {offsets = [0, 4], sizes = [1, 1], strides = [1, 1]} : vector<8x5xf32> to vector<1x1xf32>
    %39 = arith.subf %36, %34 : vector<1x1xf32>
    %40 = arith.subf %37, %35 : vector<1x1xf32>
    %41 = arith.mulf %39, %40 : vector<1x1xf32>
    %cst_26 = arith.constant 0.000000e+00 : f32
    %42 = vector.broadcast %cst_26 : f32 to vector<1x1xf32>
    %43 = arith.cmpf ogt, %38, %42 : vector<1x1xf32>
    %cst_27 = arith.constant 0.000000e+00 : f32
    %44 = vector.broadcast %cst_27 : f32 to vector<1x1xf32>
    %45 = arith.cmpf ogt, %41, %44 : vector<1x1xf32>
    %46 = arith.andi %43, %45 : vector<1x1xi1>
    %47 = vector.broadcast %34 : vector<1x1xf32> to vector<1x128xf32>
    %48 = arith.maximumf %8, %47 : vector<1x128xf32>
    %49 = vector.broadcast %35 : vector<1x1xf32> to vector<1x128xf32>
    %50 = arith.maximumf %10, %49 : vector<1x128xf32>
    %51 = vector.broadcast %36 : vector<1x1xf32> to vector<1x128xf32>
    %52 = arith.minimumf %12, %51 : vector<1x128xf32>
    %53 = vector.broadcast %37 : vector<1x1xf32> to vector<1x128xf32>
    %54 = arith.minimumf %14, %53 : vector<1x128xf32>
    %55 = arith.subf %52, %48 : vector<1x128xf32>
    %cst_28 = arith.constant 0.000000e+00 : f32
    %56 = vector.broadcast %cst_28 : f32 to vector<1x128xf32>
    %57 = arith.maximumf %55, %56 : vector<1x128xf32>
    %58 = arith.subf %54, %50 : vector<1x128xf32>
    %cst_29 = arith.constant 0.000000e+00 : f32
    %59 = vector.broadcast %cst_29 : f32 to vector<1x128xf32>
    %60 = arith.maximumf %58, %59 : vector<1x128xf32>
    %61 = arith.mulf %57, %60 : vector<1x128xf32>
    %62 = vector.broadcast %41 : vector<1x1xf32> to vector<1x128xf32>
    %63 = arith.addf %28, %62 : vector<1x128xf32>
    %64 = arith.subf %63, %61 : vector<1x128xf32>
    %65 = arith.divf %61, %64 : vector<1x128xf32>
    %66 = vector.broadcast %46 : vector<1x1xi1> to vector<1x128xi1>
    %67 = arith.andi %66, %6 : vector<1x128xi1>
    %cst_30 = arith.constant -1.000000e+00 : f32
    %68 = vector.broadcast %cst_30 : f32 to vector<1x128xf32>
    %69 = arith.select %67, %65, %68 : vector<1x128xi1>, vector<1x128xf32>
    %70 = arith.cmpf ogt, %69, %31 : vector<1x128xf32>
    %71 = arith.select %70, %69, %31 : vector<1x128xi1>, vector<1x128xf32>
    %c0_i32_31 = arith.constant 0 : i32
    %72 = vector.broadcast %c0_i32_31 : i32 to vector<1x128xi32>
    %73 = arith.select %70, %72, %32 : vector<1x128xi1>, vector<1x128xi32>
    %74 = vector.shape_cast %69 : vector<1x128xf32> to vector<1x1x128xf32>
    %cst_32 = arith.constant dense<0xFF800000> : vector<1xf32>
    %75 = vector.multi_reduction <maximumf>, %74, %cst_32 [1, 2] : vector<1x1x128xf32> to vector<1xf32>
    %76 = vector.shape_cast %75 : vector<1xf32> to vector<1x1x1xf32>
    %77 = vector.extract %76[0, 0, 0] : f32 from vector<1x1x1xf32>
    %78 = vector.broadcast %77 : f32 to vector<1x1xf32>
    %79 = vector.broadcast %78 : vector<1x1xf32> to vector<1x128xf32>
    %80 = arith.cmpf oeq, %69, %79 : vector<1x128xf32>
    %c128_i32_33 = arith.constant 128 : i32
    %81 = vector.broadcast %c128_i32_33 : i32 to vector<1x128xi32>
    %82 = arith.select %80, %4, %81 : vector<1x128xi1>, vector<1x128xi32>
    %83 = vector.shape_cast %82 : vector<1x128xi32> to vector<1x1x128xi32>
    %cst_34 = arith.constant dense<2147483647> : vector<1xi32>
    %84 = vector.multi_reduction <minsi>, %83, %cst_34 [1, 2] : vector<1x1x128xi32> to vector<1xi32>
    %85 = vector.shape_cast %84 : vector<1xi32> to vector<1x1x1xi32>
    %86 = vector.extract %85[0, 0, 0] : i32 from vector<1x1x1xi32>
    %87 = vector.broadcast %86 : i32 to vector<1x1xi32>
    %88 = vector.broadcast %87 : vector<1x1xi32> to vector<1x128xi32>
    %89 = arith.cmpi eq, %4, %88 : vector<1x128xi32>
    %90 = vector.broadcast %46 : vector<1x1xi1> to vector<1x128xi1>
    %91 = arith.andi %90, %89 : vector<1x128xi1>
    %c0_i32_35 = arith.constant 0 : i32
    %92 = vector.broadcast %c0_i32_35 : i32 to vector<1x128xi32>
    %93 = arith.select %91, %92, %33 : vector<1x128xi1>, vector<1x128xi32>
    %94 = vector.extract_strided_slice %30 {offsets = [1, 0], sizes = [1, 1], strides = [1, 1]} : vector<8x5xf32> to vector<1x1xf32>
    %95 = vector.extract_strided_slice %30 {offsets = [1, 1], sizes = [1, 1], strides = [1, 1]} : vector<8x5xf32> to vector<1x1xf32>
    %96 = vector.extract_strided_slice %30 {offsets = [1, 2], sizes = [1, 1], strides = [1, 1]} : vector<8x5xf32> to vector<1x1xf32>
    %97 = vector.extract_strided_slice %30 {offsets = [1, 3], sizes = [1, 1], strides = [1, 1]} : vector<8x5xf32> to vector<1x1xf32>
    %98 = vector.extract_strided_slice %30 {offsets = [1, 4], sizes = [1, 1], strides = [1, 1]} : vector<8x5xf32> to vector<1x1xf32>
    %99 = arith.subf %96, %94 : vector<1x1xf32>
    %100 = arith.subf %97, %95 : vector<1x1xf32>
    %101 = arith.mulf %99, %100 : vector<1x1xf32>
    %cst_36 = arith.constant 0.000000e+00 : f32
    %102 = vector.broadcast %cst_36 : f32 to vector<1x1xf32>
    %103 = arith.cmpf ogt, %98, %102 : vector<1x1xf32>
    %cst_37 = arith.constant 0.000000e+00 : f32
    %104 = vector.broadcast %cst_37 : f32 to vector<1x1xf32>
    %105 = arith.cmpf ogt, %101, %104 : vector<1x1xf32>
    %106 = arith.andi %103, %105 : vector<1x1xi1>
    %107 = vector.broadcast %94 : vector<1x1xf32> to vector<1x128xf32>
    %108 = arith.maximumf %8, %107 : vector<1x128xf32>
    %109 = vector.broadcast %95 : vector<1x1xf32> to vector<1x128xf32>
    %110 = arith.maximumf %10, %109 : vector<1x128xf32>
    %111 = vector.broadcast %96 : vector<1x1xf32> to vector<1x128xf32>
    %112 = arith.minimumf %12, %111 : vector<1x128xf32>
    %113 = vector.broadcast %97 : vector<1x1xf32> to vector<1x128xf32>
    %114 = arith.minimumf %14, %113 : vector<1x128xf32>
    %115 = arith.subf %112, %108 : vector<1x128xf32>
    %cst_38 = arith.constant 0.000000e+00 : f32
    %116 = vector.broadcast %cst_38 : f32 to vector<1x128xf32>
    %117 = arith.maximumf %115, %116 : vector<1x128xf32>
    %118 = arith.subf %114, %110 : vector<1x128xf32>
    %cst_39 = arith.constant 0.000000e+00 : f32
    %119 = vector.broadcast %cst_39 : f32 to vector<1x128xf32>
    %120 = arith.maximumf %118, %119 : vector<1x128xf32>
    %121 = arith.mulf %117, %120 : vector<1x128xf32>
    %122 = vector.broadcast %101 : vector<1x1xf32> to vector<1x128xf32>
    %123 = arith.addf %28, %122 : vector<1x128xf32>
    %124 = arith.subf %123, %121 : vector<1x128xf32>
    %125 = arith.divf %121, %124 : vector<1x128xf32>
    %126 = vector.broadcast %106 : vector<1x1xi1> to vector<1x128xi1>
    %127 = arith.andi %126, %6 : vector<1x128xi1>
    %cst_40 = arith.constant -1.000000e+00 : f32
    %128 = vector.broadcast %cst_40 : f32 to vector<1x128xf32>
    %129 = arith.select %127, %125, %128 : vector<1x128xi1>, vector<1x128xf32>
    %130 = arith.cmpf ogt, %129, %71 : vector<1x128xf32>
    %131 = arith.select %130, %129, %71 : vector<1x128xi1>, vector<1x128xf32>
    %c1_i32 = arith.constant 1 : i32
    %132 = vector.broadcast %c1_i32 : i32 to vector<1x128xi32>
    %133 = arith.select %130, %132, %73 : vector<1x128xi1>, vector<1x128xi32>
    %134 = vector.shape_cast %129 : vector<1x128xf32> to vector<1x1x128xf32>
    %cst_41 = arith.constant dense<0xFF800000> : vector<1xf32>
    %135 = vector.multi_reduction <maximumf>, %134, %cst_41 [1, 2] : vector<1x1x128xf32> to vector<1xf32>
    %136 = vector.shape_cast %135 : vector<1xf32> to vector<1x1x1xf32>
    %137 = vector.extract %136[0, 0, 0] : f32 from vector<1x1x1xf32>
    %138 = vector.broadcast %137 : f32 to vector<1x1xf32>
    %139 = vector.broadcast %138 : vector<1x1xf32> to vector<1x128xf32>
    %140 = arith.cmpf oeq, %129, %139 : vector<1x128xf32>
    %c128_i32_42 = arith.constant 128 : i32
    %141 = vector.broadcast %c128_i32_42 : i32 to vector<1x128xi32>
    %142 = arith.select %140, %4, %141 : vector<1x128xi1>, vector<1x128xi32>
    %143 = vector.shape_cast %142 : vector<1x128xi32> to vector<1x1x128xi32>
    %cst_43 = arith.constant dense<2147483647> : vector<1xi32>
    %144 = vector.multi_reduction <minsi>, %143, %cst_43 [1, 2] : vector<1x1x128xi32> to vector<1xi32>
    %145 = vector.shape_cast %144 : vector<1xi32> to vector<1x1x1xi32>
    %146 = vector.extract %145[0, 0, 0] : i32 from vector<1x1x1xi32>
    %147 = vector.broadcast %146 : i32 to vector<1x1xi32>
    %148 = vector.broadcast %147 : vector<1x1xi32> to vector<1x128xi32>
    %149 = arith.cmpi eq, %4, %148 : vector<1x128xi32>
    %150 = vector.broadcast %106 : vector<1x1xi1> to vector<1x128xi1>
    %151 = arith.andi %150, %149 : vector<1x128xi1>
    %c1_i32_44 = arith.constant 1 : i32
    %152 = vector.broadcast %c1_i32_44 : i32 to vector<1x128xi32>
    %153 = arith.select %151, %152, %93 : vector<1x128xi1>, vector<1x128xi32>
    %154 = vector.extract_strided_slice %30 {offsets = [2, 0], sizes = [1, 1], strides = [1, 1]} : vector<8x5xf32> to vector<1x1xf32>
    %155 = vector.extract_strided_slice %30 {offsets = [2, 1], sizes = [1, 1], strides = [1, 1]} : vector<8x5xf32> to vector<1x1xf32>
    %156 = vector.extract_strided_slice %30 {offsets = [2, 2], sizes = [1, 1], strides = [1, 1]} : vector<8x5xf32> to vector<1x1xf32>
    %157 = vector.extract_strided_slice %30 {offsets = [2, 3], sizes = [1, 1], strides = [1, 1]} : vector<8x5xf32> to vector<1x1xf32>
    %158 = vector.extract_strided_slice %30 {offsets = [2, 4], sizes = [1, 1], strides = [1, 1]} : vector<8x5xf32> to vector<1x1xf32>
    %159 = arith.subf %156, %154 : vector<1x1xf32>
    %160 = arith.subf %157, %155 : vector<1x1xf32>
    %161 = arith.mulf %159, %160 : vector<1x1xf32>
    %cst_45 = arith.constant 0.000000e+00 : f32
    %162 = vector.broadcast %cst_45 : f32 to vector<1x1xf32>
    %163 = arith.cmpf ogt, %158, %162 : vector<1x1xf32>
    %cst_46 = arith.constant 0.000000e+00 : f32
    %164 = vector.broadcast %cst_46 : f32 to vector<1x1xf32>
    %165 = arith.cmpf ogt, %161, %164 : vector<1x1xf32>
    %166 = arith.andi %163, %165 : vector<1x1xi1>
    %167 = vector.broadcast %154 : vector<1x1xf32> to vector<1x128xf32>
    %168 = arith.maximumf %8, %167 : vector<1x128xf32>
    %169 = vector.broadcast %155 : vector<1x1xf32> to vector<1x128xf32>
    %170 = arith.maximumf %10, %169 : vector<1x128xf32>
    %171 = vector.broadcast %156 : vector<1x1xf32> to vector<1x128xf32>
    %172 = arith.minimumf %12, %171 : vector<1x128xf32>
    %173 = vector.broadcast %157 : vector<1x1xf32> to vector<1x128xf32>
    %174 = arith.minimumf %14, %173 : vector<1x128xf32>
    %175 = arith.subf %172, %168 : vector<1x128xf32>
    %cst_47 = arith.constant 0.000000e+00 : f32
    %176 = vector.broadcast %cst_47 : f32 to vector<1x128xf32>
    %177 = arith.maximumf %175, %176 : vector<1x128xf32>
    %178 = arith.subf %174, %170 : vector<1x128xf32>
    %cst_48 = arith.constant 0.000000e+00 : f32
    %179 = vector.broadcast %cst_48 : f32 to vector<1x128xf32>
    %180 = arith.maximumf %178, %179 : vector<1x128xf32>
    %181 = arith.mulf %177, %180 : vector<1x128xf32>
    %182 = vector.broadcast %161 : vector<1x1xf32> to vector<1x128xf32>
    %183 = arith.addf %28, %182 : vector<1x128xf32>
    %184 = arith.subf %183, %181 : vector<1x128xf32>
    %185 = arith.divf %181, %184 : vector<1x128xf32>
    %186 = vector.broadcast %166 : vector<1x1xi1> to vector<1x128xi1>
    %187 = arith.andi %186, %6 : vector<1x128xi1>
    %cst_49 = arith.constant -1.000000e+00 : f32
    %188 = vector.broadcast %cst_49 : f32 to vector<1x128xf32>
    %189 = arith.select %187, %185, %188 : vector<1x128xi1>, vector<1x128xf32>
    %190 = arith.cmpf ogt, %189, %131 : vector<1x128xf32>
    %191 = arith.select %190, %189, %131 : vector<1x128xi1>, vector<1x128xf32>
    %c2_i32 = arith.constant 2 : i32
    %192 = vector.broadcast %c2_i32 : i32 to vector<1x128xi32>
    %193 = arith.select %190, %192, %133 : vector<1x128xi1>, vector<1x128xi32>
    %194 = vector.shape_cast %189 : vector<1x128xf32> to vector<1x1x128xf32>
    %cst_50 = arith.constant dense<0xFF800000> : vector<1xf32>
    %195 = vector.multi_reduction <maximumf>, %194, %cst_50 [1, 2] : vector<1x1x128xf32> to vector<1xf32>
    %196 = vector.shape_cast %195 : vector<1xf32> to vector<1x1x1xf32>
    %197 = vector.extract %196[0, 0, 0] : f32 from vector<1x1x1xf32>
    %198 = vector.broadcast %197 : f32 to vector<1x1xf32>
    %199 = vector.broadcast %198 : vector<1x1xf32> to vector<1x128xf32>
    %200 = arith.cmpf oeq, %189, %199 : vector<1x128xf32>
    %c128_i32_51 = arith.constant 128 : i32
    %201 = vector.broadcast %c128_i32_51 : i32 to vector<1x128xi32>
    %202 = arith.select %200, %4, %201 : vector<1x128xi1>, vector<1x128xi32>
    %203 = vector.shape_cast %202 : vector<1x128xi32> to vector<1x1x128xi32>
    %cst_52 = arith.constant dense<2147483647> : vector<1xi32>
    %204 = vector.multi_reduction <minsi>, %203, %cst_52 [1, 2] : vector<1x1x128xi32> to vector<1xi32>
    %205 = vector.shape_cast %204 : vector<1xi32> to vector<1x1x1xi32>
    %206 = vector.extract %205[0, 0, 0] : i32 from vector<1x1x1xi32>
    %207 = vector.broadcast %206 : i32 to vector<1x1xi32>
    %208 = vector.broadcast %207 : vector<1x1xi32> to vector<1x128xi32>
    %209 = arith.cmpi eq, %4, %208 : vector<1x128xi32>
    %210 = vector.broadcast %166 : vector<1x1xi1> to vector<1x128xi1>
    %211 = arith.andi %210, %209 : vector<1x128xi1>
    %c2_i32_53 = arith.constant 2 : i32
    %212 = vector.broadcast %c2_i32_53 : i32 to vector<1x128xi32>
    %213 = arith.select %211, %212, %153 : vector<1x128xi1>, vector<1x128xi32>
    %214 = vector.extract_strided_slice %30 {offsets = [3, 0], sizes = [1, 1], strides = [1, 1]} : vector<8x5xf32> to vector<1x1xf32>
    %215 = vector.extract_strided_slice %30 {offsets = [3, 1], sizes = [1, 1], strides = [1, 1]} : vector<8x5xf32> to vector<1x1xf32>
    %216 = vector.extract_strided_slice %30 {offsets = [3, 2], sizes = [1, 1], strides = [1, 1]} : vector<8x5xf32> to vector<1x1xf32>
    %217 = vector.extract_strided_slice %30 {offsets = [3, 3], sizes = [1, 1], strides = [1, 1]} : vector<8x5xf32> to vector<1x1xf32>
    %218 = vector.extract_strided_slice %30 {offsets = [3, 4], sizes = [1, 1], strides = [1, 1]} : vector<8x5xf32> to vector<1x1xf32>
    %219 = arith.subf %216, %214 : vector<1x1xf32>
    %220 = arith.subf %217, %215 : vector<1x1xf32>
    %221 = arith.mulf %219, %220 : vector<1x1xf32>
    %cst_54 = arith.constant 0.000000e+00 : f32
    %222 = vector.broadcast %cst_54 : f32 to vector<1x1xf32>
    %223 = arith.cmpf ogt, %218, %222 : vector<1x1xf32>
    %cst_55 = arith.constant 0.000000e+00 : f32
    %224 = vector.broadcast %cst_55 : f32 to vector<1x1xf32>
    %225 = arith.cmpf ogt, %221, %224 : vector<1x1xf32>
    %226 = arith.andi %223, %225 : vector<1x1xi1>
    %227 = vector.broadcast %214 : vector<1x1xf32> to vector<1x128xf32>
    %228 = arith.maximumf %8, %227 : vector<1x128xf32>
    %229 = vector.broadcast %215 : vector<1x1xf32> to vector<1x128xf32>
    %230 = arith.maximumf %10, %229 : vector<1x128xf32>
    %231 = vector.broadcast %216 : vector<1x1xf32> to vector<1x128xf32>
    %232 = arith.minimumf %12, %231 : vector<1x128xf32>
    %233 = vector.broadcast %217 : vector<1x1xf32> to vector<1x128xf32>
    %234 = arith.minimumf %14, %233 : vector<1x128xf32>
    %235 = arith.subf %232, %228 : vector<1x128xf32>
    %cst_56 = arith.constant 0.000000e+00 : f32
    %236 = vector.broadcast %cst_56 : f32 to vector<1x128xf32>
    %237 = arith.maximumf %235, %236 : vector<1x128xf32>
    %238 = arith.subf %234, %230 : vector<1x128xf32>
    %cst_57 = arith.constant 0.000000e+00 : f32
    %239 = vector.broadcast %cst_57 : f32 to vector<1x128xf32>
    %240 = arith.maximumf %238, %239 : vector<1x128xf32>
    %241 = arith.mulf %237, %240 : vector<1x128xf32>
    %242 = vector.broadcast %221 : vector<1x1xf32> to vector<1x128xf32>
    %243 = arith.addf %28, %242 : vector<1x128xf32>
    %244 = arith.subf %243, %241 : vector<1x128xf32>
    %245 = arith.divf %241, %244 : vector<1x128xf32>
    %246 = vector.broadcast %226 : vector<1x1xi1> to vector<1x128xi1>
    %247 = arith.andi %246, %6 : vector<1x128xi1>
    %cst_58 = arith.constant -1.000000e+00 : f32
    %248 = vector.broadcast %cst_58 : f32 to vector<1x128xf32>
    %249 = arith.select %247, %245, %248 : vector<1x128xi1>, vector<1x128xf32>
    %250 = arith.cmpf ogt, %249, %191 : vector<1x128xf32>
    %251 = arith.select %250, %249, %191 : vector<1x128xi1>, vector<1x128xf32>
    %c3_i32 = arith.constant 3 : i32
    %252 = vector.broadcast %c3_i32 : i32 to vector<1x128xi32>
    %253 = arith.select %250, %252, %193 : vector<1x128xi1>, vector<1x128xi32>
    %254 = vector.shape_cast %249 : vector<1x128xf32> to vector<1x1x128xf32>
    %cst_59 = arith.constant dense<0xFF800000> : vector<1xf32>
    %255 = vector.multi_reduction <maximumf>, %254, %cst_59 [1, 2] : vector<1x1x128xf32> to vector<1xf32>
    %256 = vector.shape_cast %255 : vector<1xf32> to vector<1x1x1xf32>
    %257 = vector.extract %256[0, 0, 0] : f32 from vector<1x1x1xf32>
    %258 = vector.broadcast %257 : f32 to vector<1x1xf32>
    %259 = vector.broadcast %258 : vector<1x1xf32> to vector<1x128xf32>
    %260 = arith.cmpf oeq, %249, %259 : vector<1x128xf32>
    %c128_i32_60 = arith.constant 128 : i32
    %261 = vector.broadcast %c128_i32_60 : i32 to vector<1x128xi32>
    %262 = arith.select %260, %4, %261 : vector<1x128xi1>, vector<1x128xi32>
    %263 = vector.shape_cast %262 : vector<1x128xi32> to vector<1x1x128xi32>
    %cst_61 = arith.constant dense<2147483647> : vector<1xi32>
    %264 = vector.multi_reduction <minsi>, %263, %cst_61 [1, 2] : vector<1x1x128xi32> to vector<1xi32>
    %265 = vector.shape_cast %264 : vector<1xi32> to vector<1x1x1xi32>
    %266 = vector.extract %265[0, 0, 0] : i32 from vector<1x1x1xi32>
    %267 = vector.broadcast %266 : i32 to vector<1x1xi32>
    %268 = vector.broadcast %267 : vector<1x1xi32> to vector<1x128xi32>
    %269 = arith.cmpi eq, %4, %268 : vector<1x128xi32>
    %270 = vector.broadcast %226 : vector<1x1xi1> to vector<1x128xi1>
    %271 = arith.andi %270, %269 : vector<1x128xi1>
    %c3_i32_62 = arith.constant 3 : i32
    %272 = vector.broadcast %c3_i32_62 : i32 to vector<1x128xi32>
    %273 = arith.select %271, %272, %213 : vector<1x128xi1>, vector<1x128xi32>
    %274 = vector.extract_strided_slice %30 {offsets = [4, 0], sizes = [1, 1], strides = [1, 1]} : vector<8x5xf32> to vector<1x1xf32>
    %275 = vector.extract_strided_slice %30 {offsets = [4, 1], sizes = [1, 1], strides = [1, 1]} : vector<8x5xf32> to vector<1x1xf32>
    %276 = vector.extract_strided_slice %30 {offsets = [4, 2], sizes = [1, 1], strides = [1, 1]} : vector<8x5xf32> to vector<1x1xf32>
    %277 = vector.extract_strided_slice %30 {offsets = [4, 3], sizes = [1, 1], strides = [1, 1]} : vector<8x5xf32> to vector<1x1xf32>
    %278 = vector.extract_strided_slice %30 {offsets = [4, 4], sizes = [1, 1], strides = [1, 1]} : vector<8x5xf32> to vector<1x1xf32>
    %279 = arith.subf %276, %274 : vector<1x1xf32>
    %280 = arith.subf %277, %275 : vector<1x1xf32>
    %281 = arith.mulf %279, %280 : vector<1x1xf32>
    %cst_63 = arith.constant 0.000000e+00 : f32
    %282 = vector.broadcast %cst_63 : f32 to vector<1x1xf32>
    %283 = arith.cmpf ogt, %278, %282 : vector<1x1xf32>
    %cst_64 = arith.constant 0.000000e+00 : f32
    %284 = vector.broadcast %cst_64 : f32 to vector<1x1xf32>
    %285 = arith.cmpf ogt, %281, %284 : vector<1x1xf32>
    %286 = arith.andi %283, %285 : vector<1x1xi1>
    %287 = vector.broadcast %274 : vector<1x1xf32> to vector<1x128xf32>
    %288 = arith.maximumf %8, %287 : vector<1x128xf32>
    %289 = vector.broadcast %275 : vector<1x1xf32> to vector<1x128xf32>
    %290 = arith.maximumf %10, %289 : vector<1x128xf32>
    %291 = vector.broadcast %276 : vector<1x1xf32> to vector<1x128xf32>
    %292 = arith.minimumf %12, %291 : vector<1x128xf32>
    %293 = vector.broadcast %277 : vector<1x1xf32> to vector<1x128xf32>
    %294 = arith.minimumf %14, %293 : vector<1x128xf32>
    %295 = arith.subf %292, %288 : vector<1x128xf32>
    %cst_65 = arith.constant 0.000000e+00 : f32
    %296 = vector.broadcast %cst_65 : f32 to vector<1x128xf32>
    %297 = arith.maximumf %295, %296 : vector<1x128xf32>
    %298 = arith.subf %294, %290 : vector<1x128xf32>
    %cst_66 = arith.constant 0.000000e+00 : f32
    %299 = vector.broadcast %cst_66 : f32 to vector<1x128xf32>
    %300 = arith.maximumf %298, %299 : vector<1x128xf32>
    %301 = arith.mulf %297, %300 : vector<1x128xf32>
    %302 = vector.broadcast %281 : vector<1x1xf32> to vector<1x128xf32>
    %303 = arith.addf %28, %302 : vector<1x128xf32>
    %304 = arith.subf %303, %301 : vector<1x128xf32>
    %305 = arith.divf %301, %304 : vector<1x128xf32>
    %306 = vector.broadcast %286 : vector<1x1xi1> to vector<1x128xi1>
    %307 = arith.andi %306, %6 : vector<1x128xi1>
    %cst_67 = arith.constant -1.000000e+00 : f32
    %308 = vector.broadcast %cst_67 : f32 to vector<1x128xf32>
    %309 = arith.select %307, %305, %308 : vector<1x128xi1>, vector<1x128xf32>
    %310 = arith.cmpf ogt, %309, %251 : vector<1x128xf32>
    %311 = arith.select %310, %309, %251 : vector<1x128xi1>, vector<1x128xf32>
    %c4_i32 = arith.constant 4 : i32
    %312 = vector.broadcast %c4_i32 : i32 to vector<1x128xi32>
    %313 = arith.select %310, %312, %253 : vector<1x128xi1>, vector<1x128xi32>
    %314 = vector.shape_cast %309 : vector<1x128xf32> to vector<1x1x128xf32>
    %cst_68 = arith.constant dense<0xFF800000> : vector<1xf32>
    %315 = vector.multi_reduction <maximumf>, %314, %cst_68 [1, 2] : vector<1x1x128xf32> to vector<1xf32>
    %316 = vector.shape_cast %315 : vector<1xf32> to vector<1x1x1xf32>
    %317 = vector.extract %316[0, 0, 0] : f32 from vector<1x1x1xf32>
    %318 = vector.broadcast %317 : f32 to vector<1x1xf32>
    %319 = vector.broadcast %318 : vector<1x1xf32> to vector<1x128xf32>
    %320 = arith.cmpf oeq, %309, %319 : vector<1x128xf32>
    %c128_i32_69 = arith.constant 128 : i32
    %321 = vector.broadcast %c128_i32_69 : i32 to vector<1x128xi32>
    %322 = arith.select %320, %4, %321 : vector<1x128xi1>, vector<1x128xi32>
    %323 = vector.shape_cast %322 : vector<1x128xi32> to vector<1x1x128xi32>
    %cst_70 = arith.constant dense<2147483647> : vector<1xi32>
    %324 = vector.multi_reduction <minsi>, %323, %cst_70 [1, 2] : vector<1x1x128xi32> to vector<1xi32>
    %325 = vector.shape_cast %324 : vector<1xi32> to vector<1x1x1xi32>
    %326 = vector.extract %325[0, 0, 0] : i32 from vector<1x1x1xi32>
    %327 = vector.broadcast %326 : i32 to vector<1x1xi32>
    %328 = vector.broadcast %327 : vector<1x1xi32> to vector<1x128xi32>
    %329 = arith.cmpi eq, %4, %328 : vector<1x128xi32>
    %330 = vector.broadcast %286 : vector<1x1xi1> to vector<1x128xi1>
    %331 = arith.andi %330, %329 : vector<1x128xi1>
    %c4_i32_71 = arith.constant 4 : i32
    %332 = vector.broadcast %c4_i32_71 : i32 to vector<1x128xi32>
    %333 = arith.select %331, %332, %273 : vector<1x128xi1>, vector<1x128xi32>
    %334 = vector.extract_strided_slice %30 {offsets = [5, 0], sizes = [1, 1], strides = [1, 1]} : vector<8x5xf32> to vector<1x1xf32>
    %335 = vector.extract_strided_slice %30 {offsets = [5, 1], sizes = [1, 1], strides = [1, 1]} : vector<8x5xf32> to vector<1x1xf32>
    %336 = vector.extract_strided_slice %30 {offsets = [5, 2], sizes = [1, 1], strides = [1, 1]} : vector<8x5xf32> to vector<1x1xf32>
    %337 = vector.extract_strided_slice %30 {offsets = [5, 3], sizes = [1, 1], strides = [1, 1]} : vector<8x5xf32> to vector<1x1xf32>
    %338 = vector.extract_strided_slice %30 {offsets = [5, 4], sizes = [1, 1], strides = [1, 1]} : vector<8x5xf32> to vector<1x1xf32>
    %339 = arith.subf %336, %334 : vector<1x1xf32>
    %340 = arith.subf %337, %335 : vector<1x1xf32>
    %341 = arith.mulf %339, %340 : vector<1x1xf32>
    %cst_72 = arith.constant 0.000000e+00 : f32
    %342 = vector.broadcast %cst_72 : f32 to vector<1x1xf32>
    %343 = arith.cmpf ogt, %338, %342 : vector<1x1xf32>
    %cst_73 = arith.constant 0.000000e+00 : f32
    %344 = vector.broadcast %cst_73 : f32 to vector<1x1xf32>
    %345 = arith.cmpf ogt, %341, %344 : vector<1x1xf32>
    %346 = arith.andi %343, %345 : vector<1x1xi1>
    %347 = vector.broadcast %334 : vector<1x1xf32> to vector<1x128xf32>
    %348 = arith.maximumf %8, %347 : vector<1x128xf32>
    %349 = vector.broadcast %335 : vector<1x1xf32> to vector<1x128xf32>
    %350 = arith.maximumf %10, %349 : vector<1x128xf32>
    %351 = vector.broadcast %336 : vector<1x1xf32> to vector<1x128xf32>
    %352 = arith.minimumf %12, %351 : vector<1x128xf32>
    %353 = vector.broadcast %337 : vector<1x1xf32> to vector<1x128xf32>
    %354 = arith.minimumf %14, %353 : vector<1x128xf32>
    %355 = arith.subf %352, %348 : vector<1x128xf32>
    %cst_74 = arith.constant 0.000000e+00 : f32
    %356 = vector.broadcast %cst_74 : f32 to vector<1x128xf32>
    %357 = arith.maximumf %355, %356 : vector<1x128xf32>
    %358 = arith.subf %354, %350 : vector<1x128xf32>
    %cst_75 = arith.constant 0.000000e+00 : f32
    %359 = vector.broadcast %cst_75 : f32 to vector<1x128xf32>
    %360 = arith.maximumf %358, %359 : vector<1x128xf32>
    %361 = arith.mulf %357, %360 : vector<1x128xf32>
    %362 = vector.broadcast %341 : vector<1x1xf32> to vector<1x128xf32>
    %363 = arith.addf %28, %362 : vector<1x128xf32>
    %364 = arith.subf %363, %361 : vector<1x128xf32>
    %365 = arith.divf %361, %364 : vector<1x128xf32>
    %366 = vector.broadcast %346 : vector<1x1xi1> to vector<1x128xi1>
    %367 = arith.andi %366, %6 : vector<1x128xi1>
    %cst_76 = arith.constant -1.000000e+00 : f32
    %368 = vector.broadcast %cst_76 : f32 to vector<1x128xf32>
    %369 = arith.select %367, %365, %368 : vector<1x128xi1>, vector<1x128xf32>
    %370 = arith.cmpf ogt, %369, %311 : vector<1x128xf32>
    %371 = arith.select %370, %369, %311 : vector<1x128xi1>, vector<1x128xf32>
    %c5_i32 = arith.constant 5 : i32
    %372 = vector.broadcast %c5_i32 : i32 to vector<1x128xi32>
    %373 = arith.select %370, %372, %313 : vector<1x128xi1>, vector<1x128xi32>
    %374 = vector.shape_cast %369 : vector<1x128xf32> to vector<1x1x128xf32>
    %cst_77 = arith.constant dense<0xFF800000> : vector<1xf32>
    %375 = vector.multi_reduction <maximumf>, %374, %cst_77 [1, 2] : vector<1x1x128xf32> to vector<1xf32>
    %376 = vector.shape_cast %375 : vector<1xf32> to vector<1x1x1xf32>
    %377 = vector.extract %376[0, 0, 0] : f32 from vector<1x1x1xf32>
    %378 = vector.broadcast %377 : f32 to vector<1x1xf32>
    %379 = vector.broadcast %378 : vector<1x1xf32> to vector<1x128xf32>
    %380 = arith.cmpf oeq, %369, %379 : vector<1x128xf32>
    %c128_i32_78 = arith.constant 128 : i32
    %381 = vector.broadcast %c128_i32_78 : i32 to vector<1x128xi32>
    %382 = arith.select %380, %4, %381 : vector<1x128xi1>, vector<1x128xi32>
    %383 = vector.shape_cast %382 : vector<1x128xi32> to vector<1x1x128xi32>
    %cst_79 = arith.constant dense<2147483647> : vector<1xi32>
    %384 = vector.multi_reduction <minsi>, %383, %cst_79 [1, 2] : vector<1x1x128xi32> to vector<1xi32>
    %385 = vector.shape_cast %384 : vector<1xi32> to vector<1x1x1xi32>
    %386 = vector.extract %385[0, 0, 0] : i32 from vector<1x1x1xi32>
    %387 = vector.broadcast %386 : i32 to vector<1x1xi32>
    %388 = vector.broadcast %387 : vector<1x1xi32> to vector<1x128xi32>
    %389 = arith.cmpi eq, %4, %388 : vector<1x128xi32>
    %390 = vector.broadcast %346 : vector<1x1xi1> to vector<1x128xi1>
    %391 = arith.andi %390, %389 : vector<1x128xi1>
    %c5_i32_80 = arith.constant 5 : i32
    %392 = vector.broadcast %c5_i32_80 : i32 to vector<1x128xi32>
    %393 = arith.select %391, %392, %333 : vector<1x128xi1>, vector<1x128xi32>
    %394 = vector.extract_strided_slice %30 {offsets = [6, 0], sizes = [1, 1], strides = [1, 1]} : vector<8x5xf32> to vector<1x1xf32>
    %395 = vector.extract_strided_slice %30 {offsets = [6, 1], sizes = [1, 1], strides = [1, 1]} : vector<8x5xf32> to vector<1x1xf32>
    %396 = vector.extract_strided_slice %30 {offsets = [6, 2], sizes = [1, 1], strides = [1, 1]} : vector<8x5xf32> to vector<1x1xf32>
    %397 = vector.extract_strided_slice %30 {offsets = [6, 3], sizes = [1, 1], strides = [1, 1]} : vector<8x5xf32> to vector<1x1xf32>
    %398 = vector.extract_strided_slice %30 {offsets = [6, 4], sizes = [1, 1], strides = [1, 1]} : vector<8x5xf32> to vector<1x1xf32>
    %399 = arith.subf %396, %394 : vector<1x1xf32>
    %400 = arith.subf %397, %395 : vector<1x1xf32>
    %401 = arith.mulf %399, %400 : vector<1x1xf32>
    %cst_81 = arith.constant 0.000000e+00 : f32
    %402 = vector.broadcast %cst_81 : f32 to vector<1x1xf32>
    %403 = arith.cmpf ogt, %398, %402 : vector<1x1xf32>
    %cst_82 = arith.constant 0.000000e+00 : f32
    %404 = vector.broadcast %cst_82 : f32 to vector<1x1xf32>
    %405 = arith.cmpf ogt, %401, %404 : vector<1x1xf32>
    %406 = arith.andi %403, %405 : vector<1x1xi1>
    %407 = vector.broadcast %394 : vector<1x1xf32> to vector<1x128xf32>
    %408 = arith.maximumf %8, %407 : vector<1x128xf32>
    %409 = vector.broadcast %395 : vector<1x1xf32> to vector<1x128xf32>
    %410 = arith.maximumf %10, %409 : vector<1x128xf32>
    %411 = vector.broadcast %396 : vector<1x1xf32> to vector<1x128xf32>
    %412 = arith.minimumf %12, %411 : vector<1x128xf32>
    %413 = vector.broadcast %397 : vector<1x1xf32> to vector<1x128xf32>
    %414 = arith.minimumf %14, %413 : vector<1x128xf32>
    %415 = arith.subf %412, %408 : vector<1x128xf32>
    %cst_83 = arith.constant 0.000000e+00 : f32
    %416 = vector.broadcast %cst_83 : f32 to vector<1x128xf32>
    %417 = arith.maximumf %415, %416 : vector<1x128xf32>
    %418 = arith.subf %414, %410 : vector<1x128xf32>
    %cst_84 = arith.constant 0.000000e+00 : f32
    %419 = vector.broadcast %cst_84 : f32 to vector<1x128xf32>
    %420 = arith.maximumf %418, %419 : vector<1x128xf32>
    %421 = arith.mulf %417, %420 : vector<1x128xf32>
    %422 = vector.broadcast %401 : vector<1x1xf32> to vector<1x128xf32>
    %423 = arith.addf %28, %422 : vector<1x128xf32>
    %424 = arith.subf %423, %421 : vector<1x128xf32>
    %425 = arith.divf %421, %424 : vector<1x128xf32>
    %426 = vector.broadcast %406 : vector<1x1xi1> to vector<1x128xi1>
    %427 = arith.andi %426, %6 : vector<1x128xi1>
    %cst_85 = arith.constant -1.000000e+00 : f32
    %428 = vector.broadcast %cst_85 : f32 to vector<1x128xf32>
    %429 = arith.select %427, %425, %428 : vector<1x128xi1>, vector<1x128xf32>
    %430 = arith.cmpf ogt, %429, %371 : vector<1x128xf32>
    %431 = arith.select %430, %429, %371 : vector<1x128xi1>, vector<1x128xf32>
    %c6_i32 = arith.constant 6 : i32
    %432 = vector.broadcast %c6_i32 : i32 to vector<1x128xi32>
    %433 = arith.select %430, %432, %373 : vector<1x128xi1>, vector<1x128xi32>
    %434 = vector.shape_cast %429 : vector<1x128xf32> to vector<1x1x128xf32>
    %cst_86 = arith.constant dense<0xFF800000> : vector<1xf32>
    %435 = vector.multi_reduction <maximumf>, %434, %cst_86 [1, 2] : vector<1x1x128xf32> to vector<1xf32>
    %436 = vector.shape_cast %435 : vector<1xf32> to vector<1x1x1xf32>
    %437 = vector.extract %436[0, 0, 0] : f32 from vector<1x1x1xf32>
    %438 = vector.broadcast %437 : f32 to vector<1x1xf32>
    %439 = vector.broadcast %438 : vector<1x1xf32> to vector<1x128xf32>
    %440 = arith.cmpf oeq, %429, %439 : vector<1x128xf32>
    %c128_i32_87 = arith.constant 128 : i32
    %441 = vector.broadcast %c128_i32_87 : i32 to vector<1x128xi32>
    %442 = arith.select %440, %4, %441 : vector<1x128xi1>, vector<1x128xi32>
    %443 = vector.shape_cast %442 : vector<1x128xi32> to vector<1x1x128xi32>
    %cst_88 = arith.constant dense<2147483647> : vector<1xi32>
    %444 = vector.multi_reduction <minsi>, %443, %cst_88 [1, 2] : vector<1x1x128xi32> to vector<1xi32>
    %445 = vector.shape_cast %444 : vector<1xi32> to vector<1x1x1xi32>
    %446 = vector.extract %445[0, 0, 0] : i32 from vector<1x1x1xi32>
    %447 = vector.broadcast %446 : i32 to vector<1x1xi32>
    %448 = vector.broadcast %447 : vector<1x1xi32> to vector<1x128xi32>
    %449 = arith.cmpi eq, %4, %448 : vector<1x128xi32>
    %450 = vector.broadcast %406 : vector<1x1xi1> to vector<1x128xi1>
    %451 = arith.andi %450, %449 : vector<1x128xi1>
    %c6_i32_89 = arith.constant 6 : i32
    %452 = vector.broadcast %c6_i32_89 : i32 to vector<1x128xi32>
    %453 = arith.select %451, %452, %393 : vector<1x128xi1>, vector<1x128xi32>
    %454 = vector.extract_strided_slice %30 {offsets = [7, 0], sizes = [1, 1], strides = [1, 1]} : vector<8x5xf32> to vector<1x1xf32>
    %455 = vector.extract_strided_slice %30 {offsets = [7, 1], sizes = [1, 1], strides = [1, 1]} : vector<8x5xf32> to vector<1x1xf32>
    %456 = vector.extract_strided_slice %30 {offsets = [7, 2], sizes = [1, 1], strides = [1, 1]} : vector<8x5xf32> to vector<1x1xf32>
    %457 = vector.extract_strided_slice %30 {offsets = [7, 3], sizes = [1, 1], strides = [1, 1]} : vector<8x5xf32> to vector<1x1xf32>
    %458 = vector.extract_strided_slice %30 {offsets = [7, 4], sizes = [1, 1], strides = [1, 1]} : vector<8x5xf32> to vector<1x1xf32>
    %459 = arith.subf %456, %454 : vector<1x1xf32>
    %460 = arith.subf %457, %455 : vector<1x1xf32>
    %461 = arith.mulf %459, %460 : vector<1x1xf32>
    %cst_90 = arith.constant 0.000000e+00 : f32
    %462 = vector.broadcast %cst_90 : f32 to vector<1x1xf32>
    %463 = arith.cmpf ogt, %458, %462 : vector<1x1xf32>
    %cst_91 = arith.constant 0.000000e+00 : f32
    %464 = vector.broadcast %cst_91 : f32 to vector<1x1xf32>
    %465 = arith.cmpf ogt, %461, %464 : vector<1x1xf32>
    %466 = arith.andi %463, %465 : vector<1x1xi1>
    %467 = vector.broadcast %454 : vector<1x1xf32> to vector<1x128xf32>
    %468 = arith.maximumf %8, %467 : vector<1x128xf32>
    %469 = vector.broadcast %455 : vector<1x1xf32> to vector<1x128xf32>
    %470 = arith.maximumf %10, %469 : vector<1x128xf32>
    %471 = vector.broadcast %456 : vector<1x1xf32> to vector<1x128xf32>
    %472 = arith.minimumf %12, %471 : vector<1x128xf32>
    %473 = vector.broadcast %457 : vector<1x1xf32> to vector<1x128xf32>
    %474 = arith.minimumf %14, %473 : vector<1x128xf32>
    %475 = arith.subf %472, %468 : vector<1x128xf32>
    %cst_92 = arith.constant 0.000000e+00 : f32
    %476 = vector.broadcast %cst_92 : f32 to vector<1x128xf32>
    %477 = arith.maximumf %475, %476 : vector<1x128xf32>
    %478 = arith.subf %474, %470 : vector<1x128xf32>
    %cst_93 = arith.constant 0.000000e+00 : f32
    %479 = vector.broadcast %cst_93 : f32 to vector<1x128xf32>
    %480 = arith.maximumf %478, %479 : vector<1x128xf32>
    %481 = arith.mulf %477, %480 : vector<1x128xf32>
    %482 = vector.broadcast %461 : vector<1x1xf32> to vector<1x128xf32>
    %483 = arith.addf %28, %482 : vector<1x128xf32>
    %484 = arith.subf %483, %481 : vector<1x128xf32>
    %485 = arith.divf %481, %484 : vector<1x128xf32>
    %486 = vector.broadcast %466 : vector<1x1xi1> to vector<1x128xi1>
    %487 = arith.andi %486, %6 : vector<1x128xi1>
    %cst_94 = arith.constant -1.000000e+00 : f32
    %488 = vector.broadcast %cst_94 : f32 to vector<1x128xf32>
    %489 = arith.select %487, %485, %488 : vector<1x128xi1>, vector<1x128xf32>
    %490 = arith.cmpf ogt, %489, %431 : vector<1x128xf32>
    %491 = arith.select %490, %489, %431 : vector<1x128xi1>, vector<1x128xf32>
    %c7_i32 = arith.constant 7 : i32
    %492 = vector.broadcast %c7_i32 : i32 to vector<1x128xi32>
    %493 = arith.select %490, %492, %433 : vector<1x128xi1>, vector<1x128xi32>
    %494 = vector.shape_cast %489 : vector<1x128xf32> to vector<1x1x128xf32>
    %cst_95 = arith.constant dense<0xFF800000> : vector<1xf32>
    %495 = vector.multi_reduction <maximumf>, %494, %cst_95 [1, 2] : vector<1x1x128xf32> to vector<1xf32>
    %496 = vector.shape_cast %495 : vector<1xf32> to vector<1x1x1xf32>
    %497 = vector.extract %496[0, 0, 0] : f32 from vector<1x1x1xf32>
    %498 = vector.broadcast %497 : f32 to vector<1x1xf32>
    %499 = vector.broadcast %498 : vector<1x1xf32> to vector<1x128xf32>
    %500 = arith.cmpf oeq, %489, %499 : vector<1x128xf32>
    %c128_i32_96 = arith.constant 128 : i32
    %501 = vector.broadcast %c128_i32_96 : i32 to vector<1x128xi32>
    %502 = arith.select %500, %4, %501 : vector<1x128xi1>, vector<1x128xi32>
    %503 = vector.shape_cast %502 : vector<1x128xi32> to vector<1x1x128xi32>
    %cst_97 = arith.constant dense<2147483647> : vector<1xi32>
    %504 = vector.multi_reduction <minsi>, %503, %cst_97 [1, 2] : vector<1x1x128xi32> to vector<1xi32>
    %505 = vector.shape_cast %504 : vector<1xi32> to vector<1x1x1xi32>
    %506 = vector.extract %505[0, 0, 0] : i32 from vector<1x1x1xi32>
    %507 = vector.broadcast %506 : i32 to vector<1x1xi32>
    %508 = vector.broadcast %507 : vector<1x1xi32> to vector<1x128xi32>
    %509 = arith.cmpi eq, %4, %508 : vector<1x128xi32>
    %510 = vector.broadcast %466 : vector<1x1xi1> to vector<1x128xi1>
    %511 = arith.andi %510, %509 : vector<1x128xi1>
    %c7_i32_98 = arith.constant 7 : i32
    %512 = vector.broadcast %c7_i32_98 : i32 to vector<1x128xi32>
    %513 = arith.select %511, %512, %453 : vector<1x128xi1>, vector<1x128xi32>
    %c0_i32_99 = arith.constant 0 : i32
    %514 = vector.broadcast %c0_i32_99 : i32 to vector<1x128xi32>
    %515 = arith.cmpi sge, %513, %514 : vector<1x128xi32>
    %cst_100 = arith.constant 2.000000e+00 : f32
    %516 = vector.broadcast %cst_100 : f32 to vector<1x128xf32>
    %517 = arith.select %515, %516, %491 : vector<1x128xi1>, vector<1x128xf32>
    %518 = arith.select %515, %513, %493 : vector<1x128xi1>, vector<1x128xi32>
    %cst_101 = arith.constant 0.000000e+00 : f32
    %519 = vector.broadcast %cst_101 : f32 to vector<1x128xf32>
    %cst_102 = arith.constant 0.000000e+00 : f32
    %520 = vector.broadcast %cst_102 : f32 to vector<1x128xf32>
    %cst_103 = arith.constant 0.000000e+00 : f32
    %521 = vector.broadcast %cst_103 : f32 to vector<1x128xf32>
    %cst_104 = arith.constant 0.000000e+00 : f32
    %522 = vector.broadcast %cst_104 : f32 to vector<1x128xf32>
    %cst_105 = arith.constant 0.000000e+00 : f32
    %523 = vector.broadcast %cst_105 : f32 to vector<1x128xf32>
    %c0_i32_106 = arith.constant 0 : i32
    %524 = vector.broadcast %c0_i32_106 : i32 to vector<1x128xi32>
    %525 = arith.cmpi eq, %518, %524 : vector<1x128xi32>
    %526 = vector.shape_cast %34 : vector<1x1xf32> to vector<1x1xf32>
    %527 = vector.broadcast %526 : vector<1x1xf32> to vector<1x128xf32>
    %528 = arith.select %525, %527, %519 : vector<1x128xi1>, vector<1x128xf32>
    %529 = vector.shape_cast %35 : vector<1x1xf32> to vector<1x1xf32>
    %530 = vector.broadcast %529 : vector<1x1xf32> to vector<1x128xf32>
    %531 = arith.select %525, %530, %520 : vector<1x128xi1>, vector<1x128xf32>
    %532 = vector.shape_cast %36 : vector<1x1xf32> to vector<1x1xf32>
    %533 = vector.broadcast %532 : vector<1x1xf32> to vector<1x128xf32>
    %534 = arith.select %525, %533, %521 : vector<1x128xi1>, vector<1x128xf32>
    %535 = vector.shape_cast %37 : vector<1x1xf32> to vector<1x1xf32>
    %536 = vector.broadcast %535 : vector<1x1xf32> to vector<1x128xf32>
    %537 = arith.select %525, %536, %522 : vector<1x128xi1>, vector<1x128xf32>
    %538 = vector.shape_cast %38 : vector<1x1xf32> to vector<1x1xf32>
    %539 = vector.broadcast %538 : vector<1x1xf32> to vector<1x128xf32>
    %540 = arith.select %525, %539, %523 : vector<1x128xi1>, vector<1x128xf32>
    %c1_i32_107 = arith.constant 1 : i32
    %541 = vector.broadcast %c1_i32_107 : i32 to vector<1x128xi32>
    %542 = arith.cmpi eq, %518, %541 : vector<1x128xi32>
    %543 = vector.shape_cast %94 : vector<1x1xf32> to vector<1x1xf32>
    %544 = vector.broadcast %543 : vector<1x1xf32> to vector<1x128xf32>
    %545 = arith.select %542, %544, %528 : vector<1x128xi1>, vector<1x128xf32>
    %546 = vector.shape_cast %95 : vector<1x1xf32> to vector<1x1xf32>
    %547 = vector.broadcast %546 : vector<1x1xf32> to vector<1x128xf32>
    %548 = arith.select %542, %547, %531 : vector<1x128xi1>, vector<1x128xf32>
    %549 = vector.shape_cast %96 : vector<1x1xf32> to vector<1x1xf32>
    %550 = vector.broadcast %549 : vector<1x1xf32> to vector<1x128xf32>
    %551 = arith.select %542, %550, %534 : vector<1x128xi1>, vector<1x128xf32>
    %552 = vector.shape_cast %97 : vector<1x1xf32> to vector<1x1xf32>
    %553 = vector.broadcast %552 : vector<1x1xf32> to vector<1x128xf32>
    %554 = arith.select %542, %553, %537 : vector<1x128xi1>, vector<1x128xf32>
    %555 = vector.shape_cast %98 : vector<1x1xf32> to vector<1x1xf32>
    %556 = vector.broadcast %555 : vector<1x1xf32> to vector<1x128xf32>
    %557 = arith.select %542, %556, %540 : vector<1x128xi1>, vector<1x128xf32>
    %c2_i32_108 = arith.constant 2 : i32
    %558 = vector.broadcast %c2_i32_108 : i32 to vector<1x128xi32>
    %559 = arith.cmpi eq, %518, %558 : vector<1x128xi32>
    %560 = vector.shape_cast %154 : vector<1x1xf32> to vector<1x1xf32>
    %561 = vector.broadcast %560 : vector<1x1xf32> to vector<1x128xf32>
    %562 = arith.select %559, %561, %545 : vector<1x128xi1>, vector<1x128xf32>
    %563 = vector.shape_cast %155 : vector<1x1xf32> to vector<1x1xf32>
    %564 = vector.broadcast %563 : vector<1x1xf32> to vector<1x128xf32>
    %565 = arith.select %559, %564, %548 : vector<1x128xi1>, vector<1x128xf32>
    %566 = vector.shape_cast %156 : vector<1x1xf32> to vector<1x1xf32>
    %567 = vector.broadcast %566 : vector<1x1xf32> to vector<1x128xf32>
    %568 = arith.select %559, %567, %551 : vector<1x128xi1>, vector<1x128xf32>
    %569 = vector.shape_cast %157 : vector<1x1xf32> to vector<1x1xf32>
    %570 = vector.broadcast %569 : vector<1x1xf32> to vector<1x128xf32>
    %571 = arith.select %559, %570, %554 : vector<1x128xi1>, vector<1x128xf32>
    %572 = vector.shape_cast %158 : vector<1x1xf32> to vector<1x1xf32>
    %573 = vector.broadcast %572 : vector<1x1xf32> to vector<1x128xf32>
    %574 = arith.select %559, %573, %557 : vector<1x128xi1>, vector<1x128xf32>
    %c3_i32_109 = arith.constant 3 : i32
    %575 = vector.broadcast %c3_i32_109 : i32 to vector<1x128xi32>
    %576 = arith.cmpi eq, %518, %575 : vector<1x128xi32>
    %577 = vector.shape_cast %214 : vector<1x1xf32> to vector<1x1xf32>
    %578 = vector.broadcast %577 : vector<1x1xf32> to vector<1x128xf32>
    %579 = arith.select %576, %578, %562 : vector<1x128xi1>, vector<1x128xf32>
    %580 = vector.shape_cast %215 : vector<1x1xf32> to vector<1x1xf32>
    %581 = vector.broadcast %580 : vector<1x1xf32> to vector<1x128xf32>
    %582 = arith.select %576, %581, %565 : vector<1x128xi1>, vector<1x128xf32>
    %583 = vector.shape_cast %216 : vector<1x1xf32> to vector<1x1xf32>
    %584 = vector.broadcast %583 : vector<1x1xf32> to vector<1x128xf32>
    %585 = arith.select %576, %584, %568 : vector<1x128xi1>, vector<1x128xf32>
    %586 = vector.shape_cast %217 : vector<1x1xf32> to vector<1x1xf32>
    %587 = vector.broadcast %586 : vector<1x1xf32> to vector<1x128xf32>
    %588 = arith.select %576, %587, %571 : vector<1x128xi1>, vector<1x128xf32>
    %589 = vector.shape_cast %218 : vector<1x1xf32> to vector<1x1xf32>
    %590 = vector.broadcast %589 : vector<1x1xf32> to vector<1x128xf32>
    %591 = arith.select %576, %590, %574 : vector<1x128xi1>, vector<1x128xf32>
    %c4_i32_110 = arith.constant 4 : i32
    %592 = vector.broadcast %c4_i32_110 : i32 to vector<1x128xi32>
    %593 = arith.cmpi eq, %518, %592 : vector<1x128xi32>
    %594 = vector.shape_cast %274 : vector<1x1xf32> to vector<1x1xf32>
    %595 = vector.broadcast %594 : vector<1x1xf32> to vector<1x128xf32>
    %596 = arith.select %593, %595, %579 : vector<1x128xi1>, vector<1x128xf32>
    %597 = vector.shape_cast %275 : vector<1x1xf32> to vector<1x1xf32>
    %598 = vector.broadcast %597 : vector<1x1xf32> to vector<1x128xf32>
    %599 = arith.select %593, %598, %582 : vector<1x128xi1>, vector<1x128xf32>
    %600 = vector.shape_cast %276 : vector<1x1xf32> to vector<1x1xf32>
    %601 = vector.broadcast %600 : vector<1x1xf32> to vector<1x128xf32>
    %602 = arith.select %593, %601, %585 : vector<1x128xi1>, vector<1x128xf32>
    %603 = vector.shape_cast %277 : vector<1x1xf32> to vector<1x1xf32>
    %604 = vector.broadcast %603 : vector<1x1xf32> to vector<1x128xf32>
    %605 = arith.select %593, %604, %588 : vector<1x128xi1>, vector<1x128xf32>
    %606 = vector.shape_cast %278 : vector<1x1xf32> to vector<1x1xf32>
    %607 = vector.broadcast %606 : vector<1x1xf32> to vector<1x128xf32>
    %608 = arith.select %593, %607, %591 : vector<1x128xi1>, vector<1x128xf32>
    %c5_i32_111 = arith.constant 5 : i32
    %609 = vector.broadcast %c5_i32_111 : i32 to vector<1x128xi32>
    %610 = arith.cmpi eq, %518, %609 : vector<1x128xi32>
    %611 = vector.shape_cast %334 : vector<1x1xf32> to vector<1x1xf32>
    %612 = vector.broadcast %611 : vector<1x1xf32> to vector<1x128xf32>
    %613 = arith.select %610, %612, %596 : vector<1x128xi1>, vector<1x128xf32>
    %614 = vector.shape_cast %335 : vector<1x1xf32> to vector<1x1xf32>
    %615 = vector.broadcast %614 : vector<1x1xf32> to vector<1x128xf32>
    %616 = arith.select %610, %615, %599 : vector<1x128xi1>, vector<1x128xf32>
    %617 = vector.shape_cast %336 : vector<1x1xf32> to vector<1x1xf32>
    %618 = vector.broadcast %617 : vector<1x1xf32> to vector<1x128xf32>
    %619 = arith.select %610, %618, %602 : vector<1x128xi1>, vector<1x128xf32>
    %620 = vector.shape_cast %337 : vector<1x1xf32> to vector<1x1xf32>
    %621 = vector.broadcast %620 : vector<1x1xf32> to vector<1x128xf32>
    %622 = arith.select %610, %621, %605 : vector<1x128xi1>, vector<1x128xf32>
    %623 = vector.shape_cast %338 : vector<1x1xf32> to vector<1x1xf32>
    %624 = vector.broadcast %623 : vector<1x1xf32> to vector<1x128xf32>
    %625 = arith.select %610, %624, %608 : vector<1x128xi1>, vector<1x128xf32>
    %c6_i32_112 = arith.constant 6 : i32
    %626 = vector.broadcast %c6_i32_112 : i32 to vector<1x128xi32>
    %627 = arith.cmpi eq, %518, %626 : vector<1x128xi32>
    %628 = vector.shape_cast %394 : vector<1x1xf32> to vector<1x1xf32>
    %629 = vector.broadcast %628 : vector<1x1xf32> to vector<1x128xf32>
    %630 = arith.select %627, %629, %613 : vector<1x128xi1>, vector<1x128xf32>
    %631 = vector.shape_cast %395 : vector<1x1xf32> to vector<1x1xf32>
    %632 = vector.broadcast %631 : vector<1x1xf32> to vector<1x128xf32>
    %633 = arith.select %627, %632, %616 : vector<1x128xi1>, vector<1x128xf32>
    %634 = vector.shape_cast %396 : vector<1x1xf32> to vector<1x1xf32>
    %635 = vector.broadcast %634 : vector<1x1xf32> to vector<1x128xf32>
    %636 = arith.select %627, %635, %619 : vector<1x128xi1>, vector<1x128xf32>
    %637 = vector.shape_cast %397 : vector<1x1xf32> to vector<1x1xf32>
    %638 = vector.broadcast %637 : vector<1x1xf32> to vector<1x128xf32>
    %639 = arith.select %627, %638, %622 : vector<1x128xi1>, vector<1x128xf32>
    %640 = vector.shape_cast %398 : vector<1x1xf32> to vector<1x1xf32>
    %641 = vector.broadcast %640 : vector<1x1xf32> to vector<1x128xf32>
    %642 = arith.select %627, %641, %625 : vector<1x128xi1>, vector<1x128xf32>
    %c7_i32_113 = arith.constant 7 : i32
    %643 = vector.broadcast %c7_i32_113 : i32 to vector<1x128xi32>
    %644 = arith.cmpi eq, %518, %643 : vector<1x128xi32>
    %645 = vector.shape_cast %454 : vector<1x1xf32> to vector<1x1xf32>
    %646 = vector.broadcast %645 : vector<1x1xf32> to vector<1x128xf32>
    %647 = arith.select %644, %646, %630 : vector<1x128xi1>, vector<1x128xf32>
    %648 = vector.shape_cast %455 : vector<1x1xf32> to vector<1x1xf32>
    %649 = vector.broadcast %648 : vector<1x1xf32> to vector<1x128xf32>
    %650 = arith.select %644, %649, %633 : vector<1x128xi1>, vector<1x128xf32>
    %651 = vector.shape_cast %456 : vector<1x1xf32> to vector<1x1xf32>
    %652 = vector.broadcast %651 : vector<1x1xf32> to vector<1x128xf32>
    %653 = arith.select %644, %652, %636 : vector<1x128xi1>, vector<1x128xf32>
    %654 = vector.shape_cast %457 : vector<1x1xf32> to vector<1x1xf32>
    %655 = vector.broadcast %654 : vector<1x1xf32> to vector<1x128xf32>
    %656 = arith.select %644, %655, %639 : vector<1x128xi1>, vector<1x128xf32>
    %657 = vector.shape_cast %458 : vector<1x1xf32> to vector<1x1xf32>
    %658 = vector.broadcast %657 : vector<1x1xf32> to vector<1x128xf32>
    %659 = arith.select %644, %658, %642 : vector<1x128xi1>, vector<1x128xf32>
    %cst_114 = arith.constant 3.500000e-01 : f32
    %660 = vector.broadcast %cst_114 : f32 to vector<1x128xf32>
    %661 = arith.cmpf olt, %517, %660 : vector<1x128xf32>
    %cst_115 = arith.constant 0.000000e+00 : f32
    %662 = vector.broadcast %cst_115 : f32 to vector<1x128xf32>
    %663 = arith.select %661, %662, %659 : vector<1x128xi1>, vector<1x128xf32>
    %664 = arith.fptosi %663 : vector<1x128xf32> to vector<1x128xi32>
    %c0_i32_116 = arith.constant 0 : i32
    %665 = vector.broadcast %c0_i32_116 : i32 to vector<1x128xi32>
    %666 = arith.cmpi sgt, %664, %665 : vector<1x128xi32>
    %cst_117 = arith.constant 1.000000e+00 : f32
    %cst_118 = arith.constant 0.000000e+00 : f32
    %667 = vector.broadcast %cst_117 : f32 to vector<1x128xf32>
    %668 = vector.broadcast %cst_118 : f32 to vector<1x128xf32>
    %669 = arith.select %666, %667, %668 : vector<1x128xi1>, vector<1x128xf32>
    %670 = vector.shape_cast %669 : vector<1x128xf32> to vector<1x1x128xf32>
    %cst_119 = arith.constant dense<0.000000e+00> : vector<1xf32>
    %671 = vector.multi_reduction <add>, %670, %cst_119 [1, 2] : vector<1x1x128xf32> to vector<1xf32>
    %672 = vector.shape_cast %671 : vector<1xf32> to vector<1x1x1xf32>
    %673 = vector.extract %672[0, 0, 0] : f32 from vector<1x1x1xf32>
    %674 = vector.broadcast %673 : f32 to vector<1x1xf32>
    %cst_120 = arith.constant 3.000000e+00 : f32
    %675 = vector.broadcast %cst_120 : f32 to vector<1x1xf32>
    %676 = arith.mulf %675, %674 : vector<1x1xf32>
    %cst_121 = arith.constant 1.270000e+02 : f32
    %677 = vector.broadcast %cst_121 : f32 to vector<1x1xf32>
    %678 = arith.minimumf %676, %677 : vector<1x1xf32>
    %679 = arith.addf %647, %653 : vector<1x128xf32>
    %cst_122 = arith.constant 5.000000e-01 : f32
    %680 = vector.broadcast %cst_122 : f32 to vector<1x128xf32>
    %681 = arith.mulf %679, %680 : vector<1x128xf32>
    %682 = arith.subf %681, %16 : vector<1x128xf32>
    %683 = arith.mulf %682, %20 : vector<1x128xf32>
    %684 = arith.addf %650, %656 : vector<1x128xf32>
    %cst_123 = arith.constant 5.000000e-01 : f32
    %685 = vector.broadcast %cst_123 : f32 to vector<1x128xf32>
    %686 = arith.mulf %684, %685 : vector<1x128xf32>
    %687 = arith.subf %686, %18 : vector<1x128xf32>
    %688 = arith.mulf %687, %22 : vector<1x128xf32>
    %689 = arith.subf %653, %647 : vector<1x128xf32>
    %cst_124 = arith.constant 9.99999996E-13 : f32
    %690 = vector.broadcast %cst_124 : f32 to vector<1x128xf32>
    %691 = arith.maximumf %689, %690 : vector<1x128xf32>
    %692 = arith.mulf %691, %24 : vector<1x128xf32>
    %693 = math.log %692 : vector<1x128xf32>
    %cst_125 = arith.constant 5.000000e+00 : f32
    %694 = vector.broadcast %cst_125 : f32 to vector<1x128xf32>
    %695 = arith.mulf %693, %694 : vector<1x128xf32>
    %696 = arith.subf %656, %650 : vector<1x128xf32>
    %cst_126 = arith.constant 9.99999996E-13 : f32
    %697 = vector.broadcast %cst_126 : f32 to vector<1x128xf32>
    %698 = arith.maximumf %696, %697 : vector<1x128xf32>
    %699 = arith.mulf %698, %26 : vector<1x128xf32>
    %700 = math.log %699 : vector<1x128xf32>
    %cst_127 = arith.constant 5.000000e+00 : f32
    %701 = vector.broadcast %cst_127 : f32 to vector<1x128xf32>
    %702 = arith.mulf %700, %701 : vector<1x128xf32>
    %c0_128 = arith.constant 0 : index
    %c0_129 = arith.constant 0 : index
    %c0_130 = arith.constant 0 : index
    %c0_131 = arith.constant 0 : index
    %703 = vector.load %arg3[%c0_128, %c0_129, %c0_130, %c0_131] : memref<1x4x1x128xf32, #tpu.memory_space<vmem>>, vector<1x1x1x128xf32>
    %704 = vector.shape_cast %703 : vector<1x1x1x128xf32> to vector<1x128xf32>
    %705 = arith.subf %704, %683 : vector<1x128xf32>
    %706 = math.absf %705 : vector<1x128xf32>
    %cst_132 = arith.constant 1.000000e+00 : f32
    %707 = vector.broadcast %cst_132 : f32 to vector<1x128xf32>
    %708 = arith.cmpf olt, %706, %707 : vector<1x128xf32>
    %cst_133 = arith.constant 5.000000e-01 : f32
    %709 = vector.broadcast %cst_133 : f32 to vector<1x128xf32>
    %710 = arith.mulf %709, %705 : vector<1x128xf32>
    %711 = arith.mulf %710, %705 : vector<1x128xf32>
    %cst_134 = arith.constant 5.000000e-01 : f32
    %712 = vector.broadcast %cst_134 : f32 to vector<1x128xf32>
    %713 = arith.subf %706, %712 : vector<1x128xf32>
    %714 = arith.select %708, %711, %713 : vector<1x128xi1>, vector<1x128xf32>
    %c0_135 = arith.constant 0 : index
    %c1_136 = arith.constant 1 : index
    %c0_137 = arith.constant 0 : index
    %c0_138 = arith.constant 0 : index
    %715 = vector.load %arg3[%c0_135, %c1_136, %c0_137, %c0_138] : memref<1x4x1x128xf32, #tpu.memory_space<vmem>>, vector<1x1x1x128xf32>
    %716 = vector.shape_cast %715 : vector<1x1x1x128xf32> to vector<1x128xf32>
    %717 = arith.subf %716, %688 : vector<1x128xf32>
    %718 = math.absf %717 : vector<1x128xf32>
    %cst_139 = arith.constant 1.000000e+00 : f32
    %719 = vector.broadcast %cst_139 : f32 to vector<1x128xf32>
    %720 = arith.cmpf olt, %718, %719 : vector<1x128xf32>
    %cst_140 = arith.constant 5.000000e-01 : f32
    %721 = vector.broadcast %cst_140 : f32 to vector<1x128xf32>
    %722 = arith.mulf %721, %717 : vector<1x128xf32>
    %723 = arith.mulf %722, %717 : vector<1x128xf32>
    %cst_141 = arith.constant 5.000000e-01 : f32
    %724 = vector.broadcast %cst_141 : f32 to vector<1x128xf32>
    %725 = arith.subf %718, %724 : vector<1x128xf32>
    %726 = arith.select %720, %723, %725 : vector<1x128xi1>, vector<1x128xf32>
    %727 = arith.addf %714, %726 : vector<1x128xf32>
    %c0_142 = arith.constant 0 : index
    %c2_143 = arith.constant 2 : index
    %c0_144 = arith.constant 0 : index
    %c0_145 = arith.constant 0 : index
    %728 = vector.load %arg3[%c0_142, %c2_143, %c0_144, %c0_145] : memref<1x4x1x128xf32, #tpu.memory_space<vmem>>, vector<1x1x1x128xf32>
    %729 = vector.shape_cast %728 : vector<1x1x1x128xf32> to vector<1x128xf32>
    %730 = arith.subf %729, %695 : vector<1x128xf32>
    %731 = math.absf %730 : vector<1x128xf32>
    %cst_146 = arith.constant 1.000000e+00 : f32
    %732 = vector.broadcast %cst_146 : f32 to vector<1x128xf32>
    %733 = arith.cmpf olt, %731, %732 : vector<1x128xf32>
    %cst_147 = arith.constant 5.000000e-01 : f32
    %734 = vector.broadcast %cst_147 : f32 to vector<1x128xf32>
    %735 = arith.mulf %734, %730 : vector<1x128xf32>
    %736 = arith.mulf %735, %730 : vector<1x128xf32>
    %cst_148 = arith.constant 5.000000e-01 : f32
    %737 = vector.broadcast %cst_148 : f32 to vector<1x128xf32>
    %738 = arith.subf %731, %737 : vector<1x128xf32>
    %739 = arith.select %733, %736, %738 : vector<1x128xi1>, vector<1x128xf32>
    %740 = arith.addf %727, %739 : vector<1x128xf32>
    %c0_149 = arith.constant 0 : index
    %c3_150 = arith.constant 3 : index
    %c0_151 = arith.constant 0 : index
    %c0_152 = arith.constant 0 : index
    %741 = vector.load %arg3[%c0_149, %c3_150, %c0_151, %c0_152] : memref<1x4x1x128xf32, #tpu.memory_space<vmem>>, vector<1x1x1x128xf32>
    %742 = vector.shape_cast %741 : vector<1x1x1x128xf32> to vector<1x128xf32>
    %743 = arith.subf %742, %702 : vector<1x128xf32>
    %744 = math.absf %743 : vector<1x128xf32>
    %cst_153 = arith.constant 1.000000e+00 : f32
    %745 = vector.broadcast %cst_153 : f32 to vector<1x128xf32>
    %746 = arith.cmpf olt, %744, %745 : vector<1x128xf32>
    %cst_154 = arith.constant 5.000000e-01 : f32
    %747 = vector.broadcast %cst_154 : f32 to vector<1x128xf32>
    %748 = arith.mulf %747, %743 : vector<1x128xf32>
    %749 = arith.mulf %748, %743 : vector<1x128xf32>
    %cst_155 = arith.constant 5.000000e-01 : f32
    %750 = vector.broadcast %cst_155 : f32 to vector<1x128xf32>
    %751 = arith.subf %744, %750 : vector<1x128xf32>
    %752 = arith.select %746, %749, %751 : vector<1x128xi1>, vector<1x128xf32>
    %753 = arith.addf %740, %752 : vector<1x128xf32>
    %cst_156 = arith.constant 0.000000e+00 : f32
    %754 = vector.broadcast %cst_156 : f32 to vector<1x128xf32>
    %755 = arith.select %666, %753, %754 : vector<1x128xi1>, vector<1x128xf32>
    %756 = vector.shape_cast %755 : vector<1x128xf32> to vector<1x1x128xf32>
    %cst_157 = arith.constant dense<0.000000e+00> : vector<1xf32>
    %757 = vector.multi_reduction <add>, %756, %cst_157 [1, 2] : vector<1x1x128xf32> to vector<1xf32>
    %758 = vector.shape_cast %757 : vector<1xf32> to vector<1x1x1xf32>
    %759 = vector.extract %758[0, 0, 0] : f32 from vector<1x1x1xf32>
    %760 = vector.broadcast %759 : f32 to vector<1x1xf32>
    %c0_158 = arith.constant 0 : index
    %c0_159 = arith.constant 0 : index
    %c0_160 = arith.constant 0 : index
    %c0_161 = arith.constant 0 : index
    %761 = vector.load %arg4[%c0_158, %c0_159, %c0_160, %c0_161] : memref<1x2x1x128xf32, #tpu.memory_space<vmem>>, vector<1x1x1x128xf32>
    %762 = vector.shape_cast %761 : vector<1x1x1x128xf32> to vector<1x128xf32>
    %c0_162 = arith.constant 0 : index
    %c1_163 = arith.constant 1 : index
    %c0_164 = arith.constant 0 : index
    %c0_165 = arith.constant 0 : index
    %763 = vector.load %arg4[%c0_162, %c1_163, %c0_164, %c0_165] : memref<1x2x1x128xf32, #tpu.memory_space<vmem>>, vector<1x1x1x128xf32>
    %764 = vector.shape_cast %763 : vector<1x1x1x128xf32> to vector<1x128xf32>
    %765 = arith.maximumf %762, %764 : vector<1x128xf32>
    %cst_166 = arith.constant 0.000000e+00 : f32
    %766 = vector.broadcast %cst_166 : f32 to vector<1x128xf32>
    %cst_167 = arith.constant 0.000000e+00 : f32
    %767 = vector.broadcast %cst_167 : f32 to vector<1x128xf32>
    %768 = arith.subf %762, %765 : vector<1x128xf32>
    %769 = math.exp %768 : vector<1x128xf32>
    %770 = arith.addf %766, %769 : vector<1x128xf32>
    %c0_i32_168 = arith.constant 0 : i32
    %771 = vector.broadcast %c0_i32_168 : i32 to vector<1x128xi32>
    %772 = arith.cmpi eq, %664, %771 : vector<1x128xi32>
    %773 = arith.select %772, %762, %767 : vector<1x128xi1>, vector<1x128xf32>
    %774 = arith.subf %764, %765 : vector<1x128xf32>
    %775 = math.exp %774 : vector<1x128xf32>
    %776 = arith.addf %770, %775 : vector<1x128xf32>
    %c1_i32_169 = arith.constant 1 : i32
    %777 = vector.broadcast %c1_i32_169 : i32 to vector<1x128xi32>
    %778 = arith.cmpi eq, %664, %777 : vector<1x128xi32>
    %779 = arith.select %778, %764, %773 : vector<1x128xi1>, vector<1x128xf32>
    %780 = math.log %776 : vector<1x128xf32>
    %781 = arith.addf %780, %765 : vector<1x128xf32>
    %782 = arith.subf %781, %779 : vector<1x128xf32>
    %cst_170 = arith.constant 0.000000e+00 : f32
    %783 = vector.broadcast %cst_170 : f32 to vector<1x128xf32>
    %784 = arith.select %666, %782, %783 : vector<1x128xi1>, vector<1x128xf32>
    %785 = vector.shape_cast %784 : vector<1x128xf32> to vector<1x1x128xf32>
    %cst_171 = arith.constant dense<0.000000e+00> : vector<1xf32>
    %786 = vector.multi_reduction <add>, %785, %cst_171 [1, 2] : vector<1x1x128xf32> to vector<1xf32>
    %787 = vector.shape_cast %786 : vector<1xf32> to vector<1x1x1xf32>
    %788 = vector.extract %787[0, 0, 0] : f32 from vector<1x1x1xf32>
    %789 = vector.broadcast %788 : f32 to vector<1x1xf32>
    %cst_172 = arith.constant 0.000000e+00 : f32
    %790 = vector.broadcast %cst_172 : f32 to vector<1x128xf32>
    %791 = arith.select %666, %790, %782 : vector<1x128xi1>, vector<1x128xf32>
    %cst_173 = arith.constant -1.000000e+00 : f32
    %792 = vector.broadcast %cst_173 : f32 to vector<1x128xf32>
    %793 = arith.select %6, %791, %792 : vector<1x128xi1>, vector<1x128xf32>
    %794 = tpu.bitcast %793 : vector<1x128xf32> -> vector<1x128xi32>
    %c0_i32_174 = arith.constant 0 : i32
    %795 = vector.broadcast %c0_i32_174 : i32 to vector<1x1xi32>
    %c1073741824_i32 = arith.constant 1073741824 : i32
    %796 = vector.broadcast %c1073741824_i32 : i32 to vector<1x1xi32>
    %c0_i32_175 = arith.constant 0 : i32
    %c31_i32 = arith.constant 31 : i32
    %797 = arith.addi %c0_i32_175, %c31_i32 : i32
    %c1_i32_176 = arith.constant 1 : i32
    %798:2 = scf.for %arg6 = %c0_i32_175 to %797 step %c1_i32_176 iter_args(%arg7 = %795, %arg8 = %796) -> (vector<1x1xi32>, vector<1x1xi32>)  : i32 {
      %857 = arith.ori %arg7, %arg8 : vector<1x1xi32>
      %858 = vector.broadcast %857 : vector<1x1xi32> to vector<1x128xi32>
      %859 = arith.cmpi sge, %794, %858 : vector<1x128xi32>
      %cst_195 = arith.constant 1.000000e+00 : f32
      %cst_196 = arith.constant 0.000000e+00 : f32
      %860 = vector.broadcast %cst_195 : f32 to vector<1x128xf32>
      %861 = vector.broadcast %cst_196 : f32 to vector<1x128xf32>
      %862 = arith.select %859, %860, %861 : vector<1x128xi1>, vector<1x128xf32>
      %863 = vector.shape_cast %862 : vector<1x128xf32> to vector<1x1x128xf32>
      %cst_197 = arith.constant dense<0.000000e+00> : vector<1xf32>
      %864 = vector.multi_reduction <add>, %863, %cst_197 [1, 2] : vector<1x1x128xf32> to vector<1xf32>
      %865 = vector.shape_cast %864 : vector<1xf32> to vector<1x1x1xf32>
      %866 = vector.extract %865[0, 0, 0] : f32 from vector<1x1x1xf32>
      %867 = vector.broadcast %866 : f32 to vector<1x1xf32>
      %868 = arith.cmpf oge, %867, %678 : vector<1x1xf32>
      %869 = arith.select %868, %857, %arg7 : vector<1x1xi1>, vector<1x1xi32>
      %c1_i32_198 = arith.constant 1 : i32
      %870 = vector.broadcast %c1_i32_198 : i32 to vector<1x1xi32>
      %871 = arith.shrsi %arg8, %870 : vector<1x1xi32>
      scf.yield %869, %871 : vector<1x1xi32>, vector<1x1xi32>
    }
    %799 = vector.broadcast %798#0 : vector<1x1xi32> to vector<1x128xi32>
    %800 = arith.cmpi sgt, %794, %799 : vector<1x128xi32>
    %cst_177 = arith.constant 1.000000e+00 : f32
    %cst_178 = arith.constant 0.000000e+00 : f32
    %801 = vector.broadcast %cst_177 : f32 to vector<1x128xf32>
    %802 = vector.broadcast %cst_178 : f32 to vector<1x128xf32>
    %803 = arith.select %800, %801, %802 : vector<1x128xi1>, vector<1x128xf32>
    %804 = vector.shape_cast %803 : vector<1x128xf32> to vector<1x1x128xf32>
    %cst_179 = arith.constant dense<0.000000e+00> : vector<1xf32>
    %805 = vector.multi_reduction <add>, %804, %cst_179 [1, 2] : vector<1x1x128xf32> to vector<1xf32>
    %806 = vector.shape_cast %805 : vector<1xf32> to vector<1x1x1xf32>
    %807 = vector.extract %806[0, 0, 0] : f32 from vector<1x1x1xf32>
    %808 = vector.broadcast %807 : f32 to vector<1x1xf32>
    %cst_180 = arith.constant 0.000000e+00 : f32
    %809 = vector.broadcast %cst_180 : f32 to vector<1x128xf32>
    %810 = arith.select %800, %793, %809 : vector<1x128xi1>, vector<1x128xf32>
    %811 = vector.shape_cast %810 : vector<1x128xf32> to vector<1x1x128xf32>
    %cst_181 = arith.constant dense<0.000000e+00> : vector<1xf32>
    %812 = vector.multi_reduction <add>, %811, %cst_181 [1, 2] : vector<1x1x128xf32> to vector<1xf32>
    %813 = vector.shape_cast %812 : vector<1xf32> to vector<1x1x1xf32>
    %814 = vector.extract %813[0, 0, 0] : f32 from vector<1x1x1xf32>
    %815 = vector.broadcast %814 : f32 to vector<1x1xf32>
    %816 = vector.broadcast %798#0 : vector<1x1xi32> to vector<1x128xi32>
    %817 = arith.cmpi eq, %794, %816 : vector<1x128xi32>
    %cst_182 = arith.constant -1.000000e+00 : f32
    %818 = vector.broadcast %cst_182 : f32 to vector<1x128xf32>
    %819 = arith.select %817, %793, %818 : vector<1x128xi1>, vector<1x128xf32>
    %820 = vector.shape_cast %819 : vector<1x128xf32> to vector<1x1x128xf32>
    %cst_183 = arith.constant dense<0xFF800000> : vector<1xf32>
    %821 = vector.multi_reduction <maximumf>, %820, %cst_183 [1, 2] : vector<1x1x128xf32> to vector<1xf32>
    %822 = vector.shape_cast %821 : vector<1xf32> to vector<1x1x1xf32>
    %823 = vector.extract %822[0, 0, 0] : f32 from vector<1x1x1xf32>
    %824 = vector.broadcast %823 : f32 to vector<1x1xf32>
    %825 = arith.subf %678, %808 : vector<1x1xf32>
    %826 = arith.mulf %825, %824 : vector<1x1xf32>
    %827 = arith.addf %815, %826 : vector<1x1xf32>
    %cst_184 = arith.constant 1.000000e+00 : f32
    %828 = vector.broadcast %cst_184 : f32 to vector<1x1xf32>
    %829 = arith.cmpf oge, %678, %828 : vector<1x1xf32>
    %cst_185 = arith.constant 0.000000e+00 : f32
    %830 = vector.broadcast %cst_185 : f32 to vector<1x1xf32>
    %831 = arith.select %829, %827, %830 : vector<1x1xi1>, vector<1x1xf32>
    %832 = arith.addf %789, %831 : vector<1x1xf32>
    %833 = tpu.iota {dimensions = array<i32: 1>} : vector<1x128xi32>
    %c0_i32_186 = arith.constant 0 : i32
    %834 = vector.broadcast %c0_i32_186 : i32 to vector<1x128xi32>
    %835 = arith.cmpi eq, %833, %834 : vector<1x128xi32>
    %cst_187 = arith.constant 0.000000e+00 : f32
    %836 = vector.shape_cast %760 : vector<1x1xf32> to vector<1x1xf32>
    %837 = vector.broadcast %836 : vector<1x1xf32> to vector<1x128xf32>
    %838 = vector.broadcast %cst_187 : f32 to vector<1x128xf32>
    %839 = arith.select %835, %837, %838 : vector<1x128xi1>, vector<1x128xf32>
    %c1_i32_188 = arith.constant 1 : i32
    %840 = vector.broadcast %c1_i32_188 : i32 to vector<1x128xi32>
    %841 = arith.cmpi eq, %833, %840 : vector<1x128xi32>
    %cst_189 = arith.constant 0.000000e+00 : f32
    %842 = vector.shape_cast %832 : vector<1x1xf32> to vector<1x1xf32>
    %843 = vector.broadcast %842 : vector<1x1xf32> to vector<1x128xf32>
    %844 = vector.broadcast %cst_189 : f32 to vector<1x128xf32>
    %845 = arith.select %841, %843, %844 : vector<1x128xi1>, vector<1x128xf32>
    %846 = arith.addf %839, %845 : vector<1x128xf32>
    %c2_i32_190 = arith.constant 2 : i32
    %847 = vector.broadcast %c2_i32_190 : i32 to vector<1x128xi32>
    %848 = arith.cmpi eq, %833, %847 : vector<1x128xi32>
    %cst_191 = arith.constant 0.000000e+00 : f32
    %849 = vector.shape_cast %674 : vector<1x1xf32> to vector<1x1xf32>
    %850 = vector.broadcast %849 : vector<1x1xf32> to vector<1x128xf32>
    %851 = vector.broadcast %cst_191 : f32 to vector<1x128xf32>
    %852 = arith.select %848, %850, %851 : vector<1x128xi1>, vector<1x128xf32>
    %853 = arith.addf %846, %852 : vector<1x128xf32>
    %c0_192 = arith.constant 0 : index
    %c0_193 = arith.constant 0 : index
    %c0_194 = arith.constant 0 : index
    %854 = vector.load %arg5[%c0_192, %c0_193, %c0_194] : memref<1x1x128xf32, #tpu.memory_space<vmem>>, vector<1x1x128xf32>
    %855 = vector.shape_cast %854 : vector<1x1x128xf32> to vector<1x128xf32>
    %856 = vector.shape_cast %853 : vector<1x128xf32> to vector<1x1x128xf32>
    tpu.vector_store %arg5[%c0_192, %c0_193, %c0_194], %856 {strides = array<i32>} : memref<1x1x128xf32, #tpu.memory_space<vmem>>, vector<1x1x128xf32>,
    return
  }
  func.func @transform_0(%arg0: i32) -> (i32, i32, i32) {
    %c0_i32 = arith.constant 0 : i32
    %c0_i32_0 = arith.constant 0 : i32
    %c0_i32_1 = arith.constant 0 : i32
    return %arg0, %c0_i32, %c0_i32_0 : i32, i32, i32
  }
  func.func @transform_1(%arg0: i32) -> (i32, i32, i32) {
    %c0_i32 = arith.constant 0 : i32
    %c0_i32_0 = arith.constant 0 : i32
    %c0_i32_1 = arith.constant 0 : i32
    %c0_i32_2 = arith.constant 0 : i32
    return %c0_i32, %c0_i32_0, %c0_i32_1 : i32, i32, i32
  }
  func.func @transform_2(%arg0: i32) -> (i32, i32, i32, i32) {
    %c0_i32 = arith.constant 0 : i32
    %c0_i32_0 = arith.constant 0 : i32
    %c0_i32_1 = arith.constant 0 : i32
    %c0_i32_2 = arith.constant 0 : i32
    return %arg0, %c0_i32, %c0_i32_0, %c0_i32_1 : i32, i32, i32, i32
  }
  func.func @transform_3(%arg0: i32) -> (i32, i32, i32, i32) {
    %c0_i32 = arith.constant 0 : i32
    %c0_i32_0 = arith.constant 0 : i32
    %c0_i32_1 = arith.constant 0 : i32
    %c0_i32_2 = arith.constant 0 : i32
    return %arg0, %c0_i32, %c0_i32_0, %c0_i32_1 : i32, i32, i32, i32
  }
  func.func @transform_4(%arg0: i32) -> (i32, i32, i32) {
    %c0_i32 = arith.constant 0 : i32
    %c0_i32_0 = arith.constant 0 : i32
    %c0_i32_1 = arith.constant 0 : i32
    return %arg0, %c0_i32, %c0_i32_0 : i32, i32, i32
  }
}

</mosaic_0001>

<bundles_post_ra>
// kernel: tpu_custom_call.1
= control target key start
LH: loop header
LB: loop body
LE: loop exit
PB: predicated region body
PF: predicated region fallthrough
CT: control target
= control target key end

     0   :  { %9 = vsyncpa [#allocation3], 0  ;;  %s2745_s0 = inlined_call_operand.vmem [shape: f32[2,8,5], index: 0, kind: input, shape index: {}]   ;;  %s2746_s1 = inlined_call_operand.vmem [shape: f32[11,1,128], index: 1, kind: input, shape index: {}]   ;;  %s2747_s2 = inlined_call_operand.vmem [shape: f32[2,4,1,128], index: 2, kind: input, shape index: {}]   ;;  %s2748_s3 = inlined_call_operand.vmem [shape: f32[2,2,1,128], index: 3, kind: input, shape index: {}]   ;;  %s2749_s4 = inlined_call_operand.hbm [shape: f32[2,1,128], index: 4, kind: output, shape index: {}]  }
   0x1   :  { %11 = vsyncpa [#allocation3 + $0x1], 0  ;;  %s1990_s15 = smov 0   ;;  %s1992_s16 = smov 0  }
   0x2   :  { %s1994_s17 = smov 0   ;;  %s1996_s18 = smov 0  }
   0x3 LB: > { %s2011_s19 = sadd.s32 4294967295, %s1939_s18   ;;  %s1675_s20 = sadd.s32 4294967294, %s1939_s18   ;;  %s1939_s18 = sphi %s1996_s18, %s2761_s18   ;;  %s1935_s17 = sphi %s1994_s17, %s2760_s17   ;;  %s1931_s16 = sphi %s1992_s16, %s2759_s16   ;;  %s1927_s15 = sphi %s1990_s15, %s2758_s15  }
   0x4   : > { %s2015_s21 = sadd.s32 1, %s1939_s18   ;;  %s123_s22 = sadd.s32 1, %s1935_s17 }
   0x5   : > { %s120_s23 = ssub.s32 %s1939_s18, %s2015_s21  ;;  %p133_p0 = scmp.ne.s32.totalorder %s1935_s17, %s1931_s16 }
   0x6   : > { %p121_p1 = scmp.eq.s32.totalorder %s120_s23, 0  ;;  %p134_p2 = scmp.eq.s32.totalorder %s2011_s19, 1 }
   0x7   : > { %p139_p3 = scmp.ne.s32.totalorder %s1931_s16, %s1927_s15  ;;  %p140_p4 = scmp.eq.s32.totalorder %s1675_s20, 1 }
   0x8   : > { %s2026_s24 = scalar_select %p121_p1, %s1935_s17, %s123_s22  }
   0x9   : > { %p2028_p5 = por %p134_p2, %p133_p0  ;;  %p2032_p6 = por %p140_p4, %p139_p3 }
   0xa   : > { %p1678_p7 = scmp.ge.s32.totalorder %s1939_s18, 1  ;;  %p182_p8 = scmp.lt.s32.totalorder %s1939_s18, 3 }
   0xc   : > { %p183_p9 = pnand %p1678_p7, %p182_p8 }
   0xd   : > { %p214_p10 = scmp.lt.s32.totalorder (!%p183_p9), %s2011_s19, 1  ;;  %v1953_v0 = vmov (!%p183_p9), 1   ;;  %s1954_s6 = smov (!%p183_p9), 2   ;;  %v1955_v2 = vmov (!%p183_p9), 0   ;;  %v1957_v5 = vmov (!%p183_p9), 2   ;;  %v1958_v9 = vmov (!%p183_p9), 4  }
   0xe   : > { %186 = sbr.rel (%p183_p9) target bundleno = 4333 (0x10ed), region = 36  ;;  %1832 = vset.pattern.permute.xlu0 (!%p183_p9), %v1953_v0  ;;  %1831 = vset.pattern.permute.xlu1 (!%p183_p9), %v1955_v2  ;;  %s1956_s7 = smov (!%p183_p9), 127   ;;  %v1959_v10 = vmov (!%p183_p9), 3   ;;  %v226_v13 = vlaneseq (!%p183_p9)  ;;  %v2092_v29 = vld [vmem:[%s2746_s1 + $0x1] sm:$0x1] (!%p183_p9)  ;;  %vm315_vm8 = vcmask (!%p183_p9), 1040384  }
   0xf   : > { %v2107_v36 = vld [vmem:[%s2746_s1] sm:$0x1] (!%p183_p9)  ;;  %v2126_v45 = vld [vmem:[%s2746_s1 + $0x2] sm:$0x1] (!%p183_p9)  ;;  %vm413_vm13 = vcmask (!%p183_p9), 1041409  }
  0x10   : > { %v2053_v14 = vshrl.u32 (!%p183_p9), %v226_v13, 7 }
  0x12   : > { %v2056_v15 = vsub.s32 (!%p183_p9), 2, %v2053_v14  ;;  %v2059_v16 = vsub.s32 (!%p183_p9), 3, %v2053_v14  ;;  %v2064_v18 = vsub.s32 (!%p183_p9), 4, %v2053_v14  ;;  %v2067_v19 = vsub.s32 (!%p183_p9), 5, %v2053_v14 }
  0x13   : > { %v2080_v25 = vsub.s32 (!%p183_p9), 6, %v2053_v14  ;;  %v2083_v26 = vsub.s32 (!%p183_p9), 7, %v2053_v14 }
  0x15   : > { %s2040_s27 = scalar_select %p214_p10, %s2011_s19, 1 }
  0x17   : > { %s1679_s28 = sshll.u32 %s2040_s27, 3 }
  0x18   : > { %s2046_s5 = scalar_lea.vmem %s2745_s0, %s1679_s28  ;;  %s212_s28 = sand.u32 1, %s1931_s16  }
  0x19   : > { %v254_v1 = vld [vmem:[%s2046_s5] sm:$0xff] }
  0x1a   : > { %256 = vrot.lane.b32.xlu0 %v254_v1, %s1954_s6  ;;  %vm265_vm1 = vcmp.gt.f32.partialorder %v254_v1, 0.0 }
  0x8c   : > { %v257_v3 = vpop.permute.xlu0 %256 }
  0x8d   : > { %v259_v4 = vsub.f32 %v254_v1, %v257_v3 }
  0x8f   : > { %261 = vrot.lane.b32.xlu0 %v259_v4, %s1956_s7 }
  0x93   : > { %278 = vperm.xlu0 %1832, %v254_v1  }
  0x97   : > { %1835 = vset.pattern.permute.xlu0 %v1957_v5 }
 0x101   : > { %v262_v6 = vpop.permute.xlu0 %261 }
 0x102   : > { %v264_v7 = vmul.f32 %v262_v6, %v259_v4  ;;  %v2165_v4 = vld [vmem:[%s2746_s1 + $0x3] sm:$0x1] }
 0x104   : > { %299 = vperm.xlu0 %1835, %v264_v7   ;;  %vm266_vm0 = vcmp.gt.f32.partialorder %v264_v7, 0.0 }
 0x105   : > { %v267_v8 = vsel %vm266_vm0, 1, %v1955_v2 }
 0x106   : > { %268 = vrot.lane.b32.xlu1 %v267_v8, %s1954_s6 }
 0x108   : > { %1837 = vset.pattern.permute.xlu0 %v1958_v9 }
 0x10a   : > { %273 = vperm.xlu1 %1831, %v254_v1  }
 0x10e   : > { %1833 = vset.pattern.permute.xlu1 %v1957_v5 }
 0x10f   : > { %283 = vperm.xlu1 %1833, %v254_v1  }
 0x112   : > { %v2061_v17 = vpop.permute.xlu0 %278 }
 0x113   : > { %1834 = vset.pattern.permute.xlu1 %v1959_v10  ;;  %v470_v21 = vrot.slane %v2061_v17, %v2056_v15  ;;  %v573_v22 = vrot.slane %v2061_v17, %v2059_v16  ;;  %v676_v23 = vrot.slane %v2061_v17, %v2064_v18  ;;  %v779_v24 = vrot.slane %v2061_v17, %v2067_v19 }
 0x114   : > { %288 = vperm.xlu1 %1834, %v254_v1   ;;  %v882_v30 = vrot.slane %v2061_v17, %v2080_v25  ;;  %v985_v31 = vrot.slane %v2061_v17, %v2083_v26 }
 0x115   : > { %v472_v32 = vmax.f32 %v2092_v29, %v470_v21  ;;  %v575_v33 = vmax.f32 %v2092_v29, %v573_v22  ;;  %v678_v38 = vmax.f32 %v2092_v29, %v676_v23  ;;  %v2115_v40 = vmax.f32 %v2092_v29, %v779_v24  ;;  %v2185_v22 = vld [vmem:[%s2746_s1 + $0xa] sm:$0x1] }
 0x116   : > { %v2133_v48 = vmax.f32 %v2092_v29, %v882_v30  ;;  %v2136_v49 = vmax.f32 %v2092_v29, %v985_v31 }
 0x118   : > { %1836 = vset.pattern.permute.xlu1 %v1958_v9 }
 0x178   : > { %v269_v11 = vpop.permute.xlu1 %268 }
 0x179   : > { %vm270_vm2 = vcmp.ne.s32.totalorder %v269_v11, 0 }
 0x17a   : > { %vm271_vm3 = vmand %vm265_vm1, %vm270_vm2 }
 0x17b   : > { %v306_v12 = vsel %vm271_vm3, 1, %v1955_v2 }
 0x17c   : > { %308 = vperm.xlu1 %1836, %v306_v12  }
 0x183   : > { %v2100_v34 = vpop.permute.xlu0 %299 }
 0x184   : > { %v493_v51 = vrot.slane %v2100_v34, %v2056_v15  ;;  %v596_v54 = vrot.slane %v2100_v34, %v2059_v16  ;;  %v699_v1 = vrot.slane %v2100_v34, %v2064_v18  ;;  %v802_v3 = vrot.slane %v2100_v34, %v2067_v19 }
 0x185   : > { %v905_v7 = vrot.slane %v2100_v34, %v2080_v25 }
 0x186   : > { %v495_v30 = vadd.f32 %v2185_v22, %v493_v51 }
 0x189   : > { %v2069_v20 = vpop.permute.xlu1 %273 }
 0x18a   : > { %v464_v27 = vrot.slane %v2069_v20, %v2056_v15  ;;  %v567_v28 = vrot.slane %v2069_v20, %v2059_v16  ;;  %v670_v37 = vrot.slane %v2069_v20, %v2064_v18  ;;  %v773_v39 = vrot.slane %v2069_v20, %v2067_v19 }
 0x18b   : > { %v876_v53 = vrot.slane %v2069_v20, %v2080_v25  ;;  %v979_v8 = vrot.slane %v2069_v20, %v2083_v26 }
 0x18c   : > { %v466_v41 = vmax.f32 %v2107_v36, %v464_v27  ;;  %v569_v43 = vmax.f32 %v2107_v36, %v567_v28  ;;  %v672_v55 = vmax.f32 %v2107_v36, %v670_v37  ;;  %v775_v56 = vmax.f32 %v2107_v36, %v773_v39 }
 0x18d   : > { %v878_v6 = vmax.f32 %v2107_v36, %v876_v53  ;;  %v981_v51 = vmax.f32 %v2107_v36, %v979_v8  ;;  %v701_v53 = vadd.f32 %v2185_v22, %v699_v1 }
 0x18e   : > { %v2102_v35 = vpop.permute.xlu1 %283 }
 0x18f   : > { %v476_v42 = vrot.slane %v2102_v35, %v2056_v15  ;;  %v579_v44 = vrot.slane %v2102_v35, %v2059_v16  ;;  %v682_v46 = vrot.slane %v2102_v35, %v2064_v18  ;;  %v785_v47 = vrot.slane %v2102_v35, %v2067_v19 }
 0x190   : > { %v888_v57 = vrot.slane %v2102_v35, %v2080_v25  ;;  %v991_v12 = vrot.slane %v2102_v35, %v2083_v26 }
 0x191   : > { %v478_v50 = vmin.f32 %v2126_v45, %v476_v42  ;;  %v581_v52 = vmin.f32 %v2126_v45, %v579_v44  ;;  %v684_v61 = vmin.f32 %v2126_v45, %v682_v46  ;;  %v787_v62 = vmin.f32 %v2126_v45, %v785_v47 }
 0x192   : > { %v890_v11 = vmin.f32 %v2126_v45, %v888_v57 }
 0x193   : > { %v2150_v58 = vpop.permute.xlu1 %288  ;;  %v485_v59 = vsub.f32 %v478_v50, %v466_v41  ;;  %v588_v60 = vsub.f32 %v581_v52, %v569_v43  ;;  %v794_v21 = vsub.f32 %v787_v62, %v775_v56 }
 0x194   : > { %v482_v63 = vrot.slane %v2150_v58, %v2056_v15  ;;  %v585_v0 = vrot.slane %v2150_v58, %v2059_v16  ;;  %v688_v5 = vrot.slane %v2150_v58, %v2064_v18  ;;  %v691_v16 = vsub.f32 %v684_v61, %v672_v55 }
 0x195   : > { %v791_v18 = vrot.slane %v2150_v58, %v2067_v19  ;;  %v486_v23 = vmax.f32 %v485_v59, 0.0  ;;  %v589_v27 = vmax.f32 %v588_v60, 0.0  ;;  %v598_v19 = vadd.f32 %v2185_v22, %v596_v54 }
 0x196   : > { %v484_v9 = vmin.f32 %v2165_v4, %v482_v63  ;;  %v587_v10 = vmin.f32 %v2165_v4, %v585_v0  ;;  %v690_v15 = vmin.f32 %v2165_v4, %v688_v5  ;;  %v692_v31 = vmax.f32 %v691_v16, 0.0 }
 0x197   : > { %v793_v39 = vmin.f32 %v2165_v4, %v791_v18  ;;  %v795_v43 = vmax.f32 %v794_v21, 0.0  ;;  %v894_v47 = vrot.slane %v2150_v58, %v2080_v25  ;;  %v997_v62 = vrot.slane %v2150_v58, %v2083_v26 }
 0x198   : > { %v487_v24 = vsub.f32 %v484_v9, %v472_v32  ;;  %v590_v28 = vsub.f32 %v587_v10, %v575_v33  ;;  %v693_v37 = vsub.f32 %v690_v15, %v678_v38  ;;  %v897_v32 = vsub.f32 %v890_v11, %v878_v6 }
 0x199   : > { %v796_v46 = vsub.f32 %v793_v39, %v2115_v40  ;;  %v993_v38 = vmin.f32 %v2126_v45, %v991_v12  ;;  %v896_v54 = vmin.f32 %v2165_v4, %v894_v47  ;;  %v804_v40 = vadd.f32 %v2185_v22, %v802_v3 }
 0x19a   : > { %v488_v41 = vmax.f32 %v487_v24, 0.0  ;;  %v591_v42 = vmax.f32 %v590_v28, 0.0  ;;  %v694_v44 = vmax.f32 %v693_v37, 0.0  ;;  %v898_v59 = vmax.f32 %v897_v32, 0.0 }
 0x19b   : > { %v797_v55 = vmax.f32 %v796_v46, 0.0  ;;  %v899_v61 = vsub.f32 %v896_v54, %v2133_v48  ;;  %v1000_v63 = vsub.f32 %v993_v38, %v981_v51  ;;  %v999_v1 = vmin.f32 %v2165_v4, %v997_v62 }
 0x19c   : > { %v489_v50 = vmul.f32 %v488_v41, %v486_v23  ;;  %v592_v33 = vmul.f32 %v591_v42, %v589_v27  ;;  %v695_v52 = vmul.f32 %v694_v44, %v692_v31  ;;  %v907_v6 = vadd.f32 %v2185_v22, %v905_v7 }
 0x19d   : > { %v798_v25 = vmul.f32 %v797_v55, %v795_v43  ;;  %v900_v5 = vmax.f32 %v899_v61, 0.0  ;;  %v1008_v3 = vrot.slane %v2100_v34, %v2083_v26  ;;  %v1001_v9 = vmax.f32 %v1000_v63, 0.0 }
 0x19e   : > { %v496_v56 = vsub.f32 %v495_v30, %v489_v50  ;;  %v599_v57 = vsub.f32 %v598_v19, %v592_v33  ;;  %v702_v60 = vsub.f32 %v701_v53, %v695_v52  ;;  %v1002_v48 = vsub.f32 %v999_v1, %v2136_v49 }
 0x19f   : > { %v805_v0 = vsub.f32 %v804_v40, %v798_v25  ;;  %v901_v8 = vmul.f32 %v900_v5, %v898_v59  ;;  %v1010_v15 = vadd.f32 %v2185_v22, %v1008_v3  ;;  %v360_v39 = vsub.s32 1, %v2053_v14 }
 0x1a0   : > { %1838 = vrcp.f32 %v496_v56  ;;  %v1003_v11 = vmax.f32 %v1002_v48, 0.0  ;;  %v286_v51 = vmin.f32 %v2126_v45, %v2102_v35  ;;  %v291_v38 = vmin.f32 %v2165_v4, %v2150_v58 }
 0x1a1   : > { %1840 = vrcp.f32 %v599_v57  ;;  %v908_v10 = vsub.f32 %v907_v6, %v901_v8  ;;  %v361_v41 = vrot.slane %v2069_v20, %v360_v39  ;;  %v367_v42 = vrot.slane %v2061_v17, %v360_v39 }
 0x1a2   : > { %1842 = vrcp.f32 %v702_v60  ;;  %v1004_v12 = vmul.f32 %v1003_v11, %v1001_v9  ;;  %v373_v19 = vrot.slane %v2102_v35, %v360_v39  ;;  %v379_v43 = vrot.slane %v2150_v58, %v360_v39 }
 0x1a3   : > { %1844 = vrcp.f32 %v805_v0  ;;  %v363_v44 = vmax.f32 %v2107_v36, %v361_v41  ;;  %v369_v46 = vmax.f32 %v2092_v29, %v367_v42  ;;  %v390_v60 = vrot.slane %v2100_v34, %v360_v39 }
 0x1a4   : > { %1846 = vrcp.f32 %v908_v10  ;;  %v1011_v16 = vsub.f32 %v1010_v15, %v1004_v12  ;;  %v375_v47 = vmin.f32 %v2126_v45, %v373_v19  ;;  %v381_v32 = vmin.f32 %v2165_v4, %v379_v43 }
 0x1a5   : > { %v2239_v61 = vand.u32 127, %v226_v13  ;;  %v230_v45 = vmul.u32 128, %v2053_v14  ;;  %v302_v4 = vadd.f32 %v2185_v22, %v2100_v34  ;;  %v2252_v34 = vsub.s32 0, %v2053_v14 }
 0x1a6   : > { %1848 = vrcp.f32 %v1011_v16  ;;  %v384_v53 = vsub.f32 %v381_v32, %v369_v46 }
 0x1a7   : > { %v2245_v0 = vadd.s32 %v230_v45, %v2239_v61 }
 0x1a8   : > { %v385_v57 = vmax.f32 %v384_v53, 0.0 }
 0x1a9   : > { %vm232_vm4 = vcmp.lt.s32.totalorder %v2245_v0, 128 }
 0x1aa   : > { %v1839_v18 = vpop.eup %1838  ;;  %v396_v5 = vsel %vm232_vm4, 1, %v1955_v2 }
 0x1ab   : > { %v1841_v21 = vpop.eup %1840  ;;  %v2207_v7 = vmul.f32 %v1839_v18, %v489_v50  ;;  %v276_v50 = vmax.f32 %v2107_v36, %v2069_v20  ;;  %v397_v1 = vrot.slane %v396_v5, 7  ;;  %v499_v6 = vrot.slane %v396_v5, 6 }
 0x1ac   : > { %v1843_v23 = vpop.eup %1842  ;;  %v2209_v26 = vmul.f32 %v1841_v21, %v592_v33  ;;  %v281_v33 = vmax.f32 %v2092_v29, %v2061_v17  ;;  %v392_v29 = vadd.f32 %v2185_v22, %v390_v60  ;;  %v705_v22 = vrot.slane %v396_v5, 4 }
 0x1ad   : > { %v1845_v24 = vpop.eup %1844  ;;  %v2211_v27 = vmul.f32 %v1843_v23, %v695_v52  ;;  %v382_v52 = vsub.f32 %v375_v47, %v363_v44  ;;  %v292_v55 = vsub.f32 %v286_v51, %v276_v50  ;;  %vm398_vm5 = vcmp.ne.s32.totalorder %v397_v1, 0 }
 0x1ae   : > { %v2213_v49 = vmul.f32 %v1845_v24, %v798_v25  ;;  %v1847_v28 = vpop.eup %1846  ;;  %v294_v54 = vsub.f32 %v291_v38, %v281_v33  ;;  %vm2256_vm6 = vcmp.ne.s32.totalorder %v499_v6, 0  ;;  %v808_v11 = vrot.slane %v396_v5, 3 }
 0x1af   : > { %v2215_v30 = vmul.f32 %v1847_v28, %v901_v8  ;;  %v383_v56 = vmax.f32 %v382_v52, 0.0  ;;  %v293_v40 = vmax.f32 %v292_v55, 0.0  ;;  %v602_v8 = vrot.slane %v396_v5, 5 }
 0x1b0   : > { %v1849_v31 = vpop.eup %1848  ;;  %v295_v59 = vmax.f32 %v294_v54, 0.0  ;;  %v911_v15 = vrot.slane %v396_v5, 2  ;;  %v1014_v18 = vrot.slane %v396_v5, 1  ;;  %v506_v24 = vrot.slane %v2207_v7, %v2252_v34 }
 0x1b1   : > { %v2217_v37 = vmul.f32 %v1849_v31, %v1004_v12  ;;  %v386_v36 = vmul.f32 %v385_v57, %v383_v56  ;;  %vm2265_vm10 = vcmp.ne.s32.totalorder %v602_v8, 0  ;;  %vm706_vm12 = vcmp.ne.s32.totalorder %v705_v22, 0 }
 0x1b2   : > { %v296_v25 = vmul.f32 %v295_v59, %v293_v40  ;;  %v609_v31 = vrot.slane %v2209_v26, %v2252_v34  ;;  %vm809_vm15 = vcmp.ne.s32.totalorder %v808_v11, 0  ;;  %v712_v7 = vrot.slane %v2211_v27, %v2252_v34 }
 0x1b3   : > { %v393_v62 = vsub.f32 %v392_v29, %v386_v36  ;;  %vm912_vm1 = vcmp.ne.s32.totalorder %v911_v15, 0  ;;  %v815_v26 = vrot.slane %v2213_v49, %v2252_v34  ;;  %vm1015_vm3 = vcmp.ne.s32.totalorder %v1014_v18, 0 }
 0x1b4   : > { %v303_v63 = vsub.f32 %v302_v4, %v296_v25  ;;  %v918_v43 = vrot.slane %v2215_v30, %v2252_v34  ;;  %v1021_v49 = vrot.slane %v2217_v37, %v2252_v34  ;;  %v426_v15 = vrot.slane %v2245_v0, 7 }
 0x1b5   : > { %1850 = vrcp.f32 %v393_v62 }
 0x1b6   : > { %1852 = vrcp.f32 %v303_v63 }
 0x1bf   : > { %v1851_v13 = vpop.eup %1850 }
 0x1c0   : > { %v1853_v3 = vpop.eup %1852  ;;  %v395_v9 = vmul.f32 %v1851_v13, %v386_v36 }
 0x1c1   : > { %v305_v12 = vmul.f32 %v1853_v3, %v296_v25 }
 0x1c2   : > { %v404_v23 = vrot.slane %v395_v9, %v2252_v34 }
 0x1fb   : > { %v2254_v48 = vpop.permute.xlu1 %308 }
 0x1fc   : > { %vm310_vm7 = vcmp.eq.s32.totalorder %v2254_v48, 1 }
 0x1fd   : > { %vm311_vm9 = vmand %vm310_vm7, %vm232_vm4 }
 0x1fe   : > { %v2269_v21 = vsel %vm311_vm9, %v305_v12, -1.0  ;;  %vm399_vm11 = vmand %vm310_vm7, %vm398_vm5 }
 0x1ff   : > { %v316_v28 = vsel %vm315_vm8, %v2269_v21, -inf  ;;  %vm501_vm14 = vmand %vm310_vm7, %vm2256_vm6  ;;  %v2284_v39 = vsel %vm399_vm11, %v404_v23, -1.0 }
 0x200   : > { %317 = vmax.xlane.f32.xlu1 %v316_v28  ;;  %v2286_v41 = vsel %vm501_vm14, %v506_v24, -1.0  ;;  %vm604_vm0 = vmand %vm310_vm7, %vm2265_vm10  ;;  %v414_v27 = vsel %vm413_vm13, %v2284_v39, -inf }
 0x201   : > { %v2294_v42 = vsel %vm604_vm0, %v609_v31, -1.0  ;;  %vm707_vm2 = vmand %vm310_vm7, %vm706_vm12 }
 0x202   : > { %v2300_v19 = vsel %vm707_vm2, %v712_v7, -1.0  ;;  %vm810_vm5 = vmand %vm310_vm7, %vm809_vm15 }
 0x203   : > { %v2308_v44 = vsel %vm810_vm5, %v815_v26, -1.0  ;;  %vm913_vm6 = vmand %vm310_vm7, %vm912_vm1  ;;  %vm516_vm1 = vcmask 1042434  }
 0x204   : > { %415 = vmax.xlane.f32.xlu1 %v414_v27  ;;  %v2314_v46 = vsel %vm913_vm6, %v918_v43, -1.0  ;;  %vm1016_vm9 = vmand %vm310_vm7, %vm1015_vm3  ;;  %v517_v31 = vsel %vm516_vm1, %v2286_v41, -inf }
 0x205   : > { %v2318_v47 = vsel %vm1016_vm9, %v1021_v49, -1.0 }
 0x28d   : > { %v318_v30 = vpop.xlane.xlu1 %317 }
 0x28e   : > { %v319_v32 = vrot.slane %v318_v30, 4 }
 0x290   : > { %v320_v50 = vmax.f32 %v318_v30, %v319_v32 }
 0x291   : > { %v416_v36 = vpop.xlane.xlu1 %415 }
 0x292   : > { %v321_v33 = vrot.slane %v320_v50, 2  ;;  %v417_v25 = vrot.slane %v416_v36, 4 }
 0x294   : > { %v322_v51 = vmax.f32 %v320_v50, %v321_v33  ;;  %v418_v45 = vmax.f32 %v416_v36, %v417_v25 }
 0x296   : > { %v323_v38 = vrot.slane %v322_v51, 1  ;;  %v419_v13 = vrot.slane %v418_v45, 2 }
 0x298   : > { %v324_v52 = vmax.f32 %v322_v51, %v323_v38  ;;  %v420_v3 = vmax.f32 %v418_v45, %v419_v13 }
 0x29a   : > { %1709 = vpush %v324_v52  ;;  %v421_v22 = vrot.slane %v420_v3, 1 }
 0x29c   : > { %v422_v12 = vmax.f32 %v420_v3, %v421_v22 }
 0x2cb   : > { %s1710_s29 = spop %1709 }
 0x2cc   : > { %v326_v53 = vstv %s1710_s29 }
 0x2cd   : > { %vm327_vm10 = vcmp.eq.f32.partialorder %v2269_v21, %v326_v53 }
 0x2ce   : > { %v328_v37 = vsel %vm327_vm10, %v2245_v0, 128 }
 0x2cf   : > { %v329_v55 = vsel %vm315_vm8, %v328_v37, 2147483647 }
 0x2d0   : > { %v331_v54 = vshra.s32 %v329_v55, 16  ;;  %v330_v57 = vand.u32 65535, %v329_v55 }
 0x2d2   : > { %v333_v56 = vcvt.s32.f32 %v331_v54  ;;  %v332_v59 = vcvt.s32.f32 %v330_v57 }
 0x2d4   : > { %334 = vmin.xlane.f32.xlu0 %v333_v56 }
 0x361   : > { %v335_v40 = vpop.xlane.xlu0 %334 }
 0x362   : > { %vm336_vm11 = vcmp.eq.f32.partialorder %v333_v56, %v335_v40  ;;  %v341_v29 = vcvt.f32.s32 %v335_v40 }
 0x363   : > { %v337_v60 = vsel %vm336_vm11, %v332_v59, inf }
 0x364   : > { %338 = vmin.xlane.f32.xlu0 %v337_v60  ;;  %v342_v62 = vshll.u32 %v341_v29, 16  ;;  %v529_v29 = vrot.slane %v2245_v0, 6 }
 0x3f1   : > { %v339_v4 = vpop.xlane.xlu0 %338 }
 0x3f2   : > { %v340_v63 = vcvt.f32.s32 %v339_v4 }
 0x3f4   : > { %v343_v5 = vadd.s32 %v342_v62, %v340_v63  ;;  %v1960_v62 = vmov 4294967295  }
 0x3f6   : > { %v344_v1 = vrot.slane %v343_v5, 4 }
 0x3f8   : > { %vm345_vm12 = vcmp.lt.s32.totalorder %v343_v5, %v344_v1 }
 0x3f9   : > { %v346_v6 = vsel %vm345_vm12, %v343_v5, %v344_v1 }
 0x3fa   : > { %v347_v8 = vrot.slane %v346_v6, 2 }
 0x3fc   : > { %vm348_vm14 = vcmp.lt.s32.totalorder %v346_v6, %v347_v8 }
 0x3fd   : > { %v349_v9 = vsel %vm348_vm14, %v346_v6, %v347_v8 }
 0x3fe   : > { %v350_v10 = vrot.slane %v349_v9, 1 }
 0x400   : > { %vm351_vm15 = vcmp.lt.s32.totalorder %v349_v9, %v350_v10 }
 0x401   : > { %v352_v11 = vsel %vm351_vm15, %v349_v9, %v350_v10  ;;  %vm619_vm15 = vcmask 1043459  }
 0x402   : > { %1711 = vpush %v352_v11  ;;  %v620_v10 = vsel %vm619_vm15, %v2294_v42, -inf }
 0x403   : > { %1713 = vpush %v422_v12 }
 0x433   : > { %s2324_s30 = spop %1711 }
 0x434   : > { %s1714_s6 = spop %1713  ;;  %v354_v25 = vstv %s2324_s30 }
 0x435   : > { %v424_v16 = vstv %s1714_s6  ;;  %vm355_vm6 = vcmp.eq.s32.totalorder %v2245_v0, %v354_v25  ;;  %s1680_s6 = sshll.u32 %s2040_s27, 2 }
 0x436   : > { %vm425_vm0 = vcmp.eq.f32.partialorder %v2284_v39, %v424_v16  ;;  %vm356_vm9 = vmand %vm310_vm7, %vm355_vm6 }
 0x437   : > { %v427_v18 = vsel %vm425_vm0, %v426_v15, 128  ;;  %v357_v63 = vsel %vm356_vm9, 0, %v1960_v62 }
 0x438   : > { %v428_v23 = vsel %vm413_vm13, %v427_v18, 2147483647  ;;  %v459_v3 = vrot.slane %v357_v63, 7 }
 0x439   : > { %v430_v24 = vshra.s32 %v428_v23, 16  ;;  %v429_v7 = vand.u32 65535, %v428_v23 }
 0x43b   : > { %v432_v28 = vcvt.s32.f32 %v430_v24  ;;  %v431_v43 = vcvt.s32.f32 %v429_v7 }
 0x43d   : > { %433 = vmin.xlane.f32.xlu0 %v432_v28 }
 0x441   : > { %518 = vmax.xlane.f32.xlu0 %v517_v31 }
 0x4ca   : > { %v434_v26 = vpop.xlane.xlu0 %433 }
 0x4cb   : > { %vm435_vm2 = vcmp.eq.f32.partialorder %v432_v28, %v434_v26  ;;  %v440_v32 = vcvt.f32.s32 %v434_v26 }
 0x4cc   : > { %v436_v27 = vsel %vm435_vm2, %v431_v43, inf }
 0x4cd   : > { %437 = vmin.xlane.f32.xlu1 %v436_v27  ;;  %v441_v51 = vshll.u32 %v440_v32, 16 }
 0x4ce   : > { %v519_v49 = vpop.xlane.xlu0 %518 }
 0x4cf   : > { %v520_v30 = vrot.slane %v519_v49, 4 }
 0x4d1   : > { %v521_v50 = vmax.f32 %v519_v49, %v520_v30 }
 0x4d3   : > { %v522_v53 = vrot.slane %v521_v50, 2 }
 0x4d5   : > { %v523_v54 = vmax.f32 %v521_v50, %v522_v53 }
 0x4d7   : > { %v524_v40 = vrot.slane %v523_v54, 1 }
 0x4d9   : > { %v525_v36 = vmax.f32 %v523_v54, %v524_v40 }
 0x55a   : > { %v438_v33 = vpop.xlane.xlu1 %437 }
 0x55b   : > { %v439_v38 = vcvt.f32.s32 %v438_v33 }
 0x55d   : > { %v442_v52 = vadd.s32 %v441_v51, %v439_v38 }
 0x55f   : > { %v443_v37 = vrot.slane %v442_v52, 4 }
 0x561   : > { %vm444_vm13 = vcmp.lt.s32.totalorder %v442_v52, %v443_v37 }
 0x562   : > { %v445_v55 = vsel %vm444_vm13, %v442_v52, %v443_v37  ;;  %v632_v37 = vrot.slane %v2245_v0, 5 }
 0x563   : > { %v446_v56 = vrot.slane %v445_v55, 2 }
 0x565   : > { %vm447_vm3 = vcmp.lt.s32.totalorder %v445_v55, %v446_v56 }
 0x566   : > { %v448_v57 = vsel %vm447_vm3, %v445_v55, %v446_v56 }
 0x567   : > { %v449_v59 = vrot.slane %v448_v57, 1 }
 0x569   : > { %vm450_vm5 = vcmp.lt.s32.totalorder %v448_v57, %v449_v59 }
 0x56a   : > { %v451_v60 = vsel %vm450_vm5, %v448_v57, %v449_v59 }
 0x56b   : > { %1715 = vpush %v451_v60 }
 0x56c   : > { %1717 = vpush %v525_v36 }
 0x59c   : > { %s1716_s7 = spop %1715 }
 0x59d   : > { %v453_v45 = vstv %s1716_s7  ;;  %s1718_s8 = spop %1717 }
 0x59e   : > { %vm454_vm10 = vcmp.eq.s32.totalorder %v2245_v0, %v453_v45  ;;  %v527_v4 = vstv %s1718_s8 }
 0x59f   : > { %v455_v5 = vsel %vm454_vm10, 1, %v1955_v2  ;;  %vm528_vm11 = vcmp.eq.f32.partialorder %v2286_v41, %v527_v4  ;;  %vm722_vm10 = vcmask 1044484  }
 0x5a0   : > { %v456_v13 = vrot.slane %v455_v5, 7  ;;  %v530_v1 = vsel %vm528_vm11, %v529_v29, 128  ;;  %v723_v45 = vsel %vm722_vm10, %v2300_v19, -inf }
 0x5a1   : > { %v531_v6 = vsel %vm516_vm1, %v530_v1, 2147483647 }
 0x5a2   : > { %vm457_vm12 = vcmp.ne.s32.totalorder %v456_v13, 0  ;;  %v533_v8 = vshra.s32 %v531_v6, 16  ;;  %v532_v11 = vand.u32 65535, %v531_v6 }
 0x5a3   : > { %vm458_vm14 = vmand %vm310_vm7, %vm457_vm12 }
 0x5a4   : > { %v460_v9 = vsel %vm458_vm14, 1, %v459_v3  ;;  %v535_v22 = vcvt.s32.f32 %v533_v8  ;;  %v534_v15 = vcvt.s32.f32 %v532_v11 }
 0x5a5   : > { %v562_v60 = vrot.slane %v460_v9, 7 }
 0x5a6   : > { %536 = vmin.xlane.f32.xlu1 %v535_v22 }
 0x5aa   : > { %621 = vmax.xlane.f32.xlu1 %v620_v10 }
 0x633   : > { %v537_v12 = vpop.xlane.xlu1 %536 }
 0x634   : > { %vm538_vm0 = vcmp.eq.f32.partialorder %v535_v22, %v537_v12  ;;  %v543_v24 = vcvt.f32.s32 %v537_v12 }
 0x635   : > { %v539_v16 = vsel %vm538_vm0, %v534_v15, inf }
 0x636   : > { %540 = vmin.xlane.f32.xlu0 %v539_v16  ;;  %v544_v7 = vshll.u32 %v543_v24, 16 }
 0x637   : > { %v622_v18 = vpop.xlane.xlu1 %621 }
 0x638   : > { %v623_v23 = vrot.slane %v622_v18, 4 }
 0x63a   : > { %v624_v28 = vmax.f32 %v622_v18, %v623_v23 }
 0x63c   : > { %v625_v27 = vrot.slane %v624_v28, 2 }
 0x63e   : > { %v626_v32 = vmax.f32 %v624_v28, %v625_v27 }
 0x640   : > { %v627_v51 = vrot.slane %v626_v32, 1 }
 0x642   : > { %v628_v53 = vmax.f32 %v626_v32, %v627_v51 }
 0x6c3   : > { %v541_v31 = vpop.xlane.xlu0 %540 }
 0x6c4   : > { %v542_v26 = vcvt.f32.s32 %v541_v31 }
 0x6c6   : > { %v545_v43 = vadd.s32 %v544_v7, %v542_v26  ;;  %v735_v26 = vrot.slane %v2245_v0, 4 }
 0x6c8   : > { %v546_v49 = vrot.slane %v545_v43, 4 }
 0x6ca   : > { %vm547_vm1 = vcmp.lt.s32.totalorder %v545_v43, %v546_v49 }
 0x6cb   : > { %v548_v30 = vsel %vm547_vm1, %v545_v43, %v546_v49 }
 0x6cc   : > { %v549_v50 = vrot.slane %v548_v30, 2 }
 0x6ce   : > { %vm550_vm2 = vcmp.lt.s32.totalorder %v548_v30, %v549_v50 }
 0x6cf   : > { %v551_v33 = vsel %vm550_vm2, %v548_v30, %v549_v50 }
 0x6d0   : > { %v552_v38 = vrot.slane %v551_v33, 1 }
 0x6d2   : > { %vm553_vm13 = vcmp.lt.s32.totalorder %v551_v33, %v552_v38 }
 0x6d3   : > { %v554_v52 = vsel %vm553_vm13, %v551_v33, %v552_v38 }
 0x6d4   : > { %1719 = vpush %v554_v52 }
 0x6d5   : > { %1721 = vpush %v628_v53 }
 0x705   : > { %s1720_s9 = spop %1719 }
 0x706   : > { %v556_v55 = vstv %s1720_s9  ;;  %s1722_s10 = spop %1721  ;;  %s2625_s9 = scalar_lea.vmem %s2747_s2, %s1680_s6 }
 0x707   : > { %vm557_vm3 = vcmp.eq.s32.totalorder %v2245_v0, %v556_v55  ;;  %v630_v54 = vstv %s1722_s10 }
 0x708   : > { %v558_v56 = vsel %vm557_vm3, 1, %v1955_v2  ;;  %vm631_vm5 = vcmp.eq.f32.partialorder %v2294_v42, %v630_v54  ;;  %vm825_vm3 = vcmask 1045509  }
 0x709   : > { %v559_v57 = vrot.slane %v558_v56, 6  ;;  %v633_v40 = vsel %vm631_vm5, %v632_v37, 128  ;;  %v826_v53 = vsel %vm825_vm3, %v2308_v44, -inf }
 0x70a   : > { %v634_v59 = vsel %vm619_vm15, %v633_v40, 2147483647 }
 0x70b   : > { %vm560_vm6 = vcmp.ne.s32.totalorder %v559_v57, 0  ;;  %v636_v36 = vshra.s32 %v634_v59, 16  ;;  %v635_v4 = vand.u32 65535, %v634_v59 }
 0x70c   : > { %vm561_vm9 = vmand %vm310_vm7, %vm560_vm6 }
 0x70d   : > { %v563_v25 = vsel %vm561_vm9, 2, %v562_v60  ;;  %v638_v29 = vcvt.s32.f32 %v636_v36  ;;  %v637_v63 = vcvt.s32.f32 %v635_v4 }
 0x70e   : > { %v665_v33 = vrot.slane %v563_v25, 7 }
 0x70f   : > { %639 = vmin.xlane.f32.xlu0 %v638_v29 }
 0x713   : > { %724 = vmax.xlane.f32.xlu0 %v723_v45 }
 0x79c   : > { %v640_v62 = vpop.xlane.xlu0 %639 }
 0x79d   : > { %vm641_vm11 = vcmp.eq.f32.partialorder %v638_v29, %v640_v62  ;;  %v646_v6 = vcvt.f32.s32 %v640_v62 }
 0x79e   : > { %v642_v5 = vsel %vm641_vm11, %v637_v63, inf }
 0x79f   : > { %643 = vmin.xlane.f32.xlu1 %v642_v5  ;;  %v647_v9 = vshll.u32 %v646_v6, 16 }
 0x7a0   : > { %v725_v13 = vpop.xlane.xlu0 %724 }
 0x7a1   : > { %v726_v1 = vrot.slane %v725_v13, 4 }
 0x7a3   : > { %v727_v3 = vmax.f32 %v725_v13, %v726_v1 }
 0x7a5   : > { %v728_v11 = vrot.slane %v727_v3, 2 }
 0x7a7   : > { %v729_v16 = vmax.f32 %v727_v3, %v728_v11 }
 0x7a9   : > { %v730_v24 = vrot.slane %v729_v16, 1 }
 0x7ab   : > { %v731_v7 = vmax.f32 %v729_v16, %v730_v24 }
 0x82c   : > { %v644_v8 = vpop.xlane.xlu1 %643 }
 0x82d   : > { %v645_v22 = vcvt.f32.s32 %v644_v8 }
 0x82f   : > { %v648_v10 = vadd.s32 %v647_v9, %v645_v22  ;;  %v838_v22 = vrot.slane %v2245_v0, 3 }
 0x831   : > { %v649_v12 = vrot.slane %v648_v10, 4 }
 0x833   : > { %vm650_vm12 = vcmp.lt.s32.totalorder %v648_v10, %v649_v12 }
 0x834   : > { %v651_v15 = vsel %vm650_vm12, %v648_v10, %v649_v12 }
 0x835   : > { %v652_v18 = vrot.slane %v651_v15, 2 }
 0x837   : > { %vm653_vm14 = vcmp.lt.s32.totalorder %v651_v15, %v652_v18 }
 0x838   : > { %v654_v23 = vsel %vm653_vm14, %v651_v15, %v652_v18 }
 0x839   : > { %v655_v28 = vrot.slane %v654_v23, 1 }
 0x83b   : > { %vm656_vm15 = vcmp.lt.s32.totalorder %v654_v23, %v655_v28 }
 0x83c   : > { %v657_v31 = vsel %vm656_vm15, %v654_v23, %v655_v28 }
 0x83d   : > { %1723 = vpush %v657_v31 }
 0x83e   : > { %1725 = vpush %v731_v7 }
 0x86e   : > { %s1724_s11 = spop %1723 }
 0x86f   : > { %v659_v43 = vstv %s1724_s11  ;;  %s1726_s12 = spop %1725 }
 0x870   : > { %vm660_vm0 = vcmp.eq.s32.totalorder %v2245_v0, %v659_v43  ;;  %v733_v27 = vstv %s1726_s12  ;;  %s2667_s12 = scalar_lea.vmem [#allocation2], %s212_s28 }
 0x871   : > { %v661_v49 = vsel %vm660_vm0, 1, %v1955_v2  ;;  %vm734_vm1 = vcmp.eq.f32.partialorder %v2300_v19, %v733_v27  ;;  %vm928_vm0 = vcmask 1046534  }
 0x872   : > { %v662_v30 = vrot.slane %v661_v49, 5  ;;  %v736_v32 = vsel %vm734_vm1, %v735_v26, 128  ;;  %v929_v7 = vsel %vm928_vm0, %v2314_v46, -inf }
 0x873   : > { %v737_v50 = vsel %vm722_vm10, %v736_v32, 2147483647 }
 0x874   : > { %vm663_vm2 = vcmp.ne.s32.totalorder %v662_v30, 0  ;;  %v739_v51 = vshra.s32 %v737_v50, 16  ;;  %v738_v37 = vand.u32 65535, %v737_v50 }
 0x875   : > { %vm664_vm13 = vmand %vm310_vm7, %vm663_vm2 }
 0x876   : > { %v666_v38 = vsel %vm664_vm13, 3, %v665_v33  ;;  %v741_v52 = vcvt.s32.f32 %v739_v51  ;;  %v740_v54 = vcvt.s32.f32 %v738_v37 }
 0x877   : > { %v768_v23 = vrot.slane %v666_v38, 7 }
 0x878   : > { %742 = vmin.xlane.f32.xlu1 %v741_v52 }
 0x87c   : > { %827 = vmax.xlane.f32.xlu1 %v826_v53 }
 0x905   : > { %v743_v55 = vpop.xlane.xlu1 %742 }
 0x906   : > { %vm744_vm5 = vcmp.eq.f32.partialorder %v741_v52, %v743_v55  ;;  %v749_v59 = vcvt.f32.s32 %v743_v55 }
 0x907   : > { %v745_v56 = vsel %vm744_vm5, %v740_v54, inf }
 0x908   : > { %746 = vmin.xlane.f32.xlu0 %v745_v56  ;;  %v750_v25 = vshll.u32 %v749_v59, 16 }
 0x909   : > { %v828_v57 = vpop.xlane.xlu1 %827 }
 0x90a   : > { %v829_v40 = vrot.slane %v828_v57, 4 }
 0x90c   : > { %v830_v60 = vmax.f32 %v828_v57, %v829_v40 }
 0x90e   : > { %v831_v4 = vrot.slane %v830_v60, 2 }
 0x910   : > { %v832_v5 = vmax.f32 %v830_v60, %v831_v4 }
 0x912   : > { %v833_v6 = vrot.slane %v832_v5, 1 }
 0x914   : > { %v834_v9 = vmax.f32 %v832_v5, %v833_v6 }
 0x995   : > { %v747_v36 = vpop.xlane.xlu0 %746 }
 0x996   : > { %v748_v29 = vcvt.f32.s32 %v747_v36 }
 0x998   : > { %v751_v45 = vadd.s32 %v750_v25, %v748_v29  ;;  %v941_v29 = vrot.slane %v2245_v0, 2 }
 0x99a   : > { %v752_v62 = vrot.slane %v751_v45, 4 }
 0x99c   : > { %vm753_vm6 = vcmp.lt.s32.totalorder %v751_v45, %v752_v62 }
 0x99d   : > { %v754_v63 = vsel %vm753_vm6, %v751_v45, %v752_v62 }
 0x99e   : > { %v755_v13 = vrot.slane %v754_v63, 2 }
 0x9a0   : > { %vm756_vm9 = vcmp.lt.s32.totalorder %v754_v63, %v755_v13 }
 0x9a1   : > { %v757_v1 = vsel %vm756_vm9, %v754_v63, %v755_v13 }
 0x9a2   : > { %v758_v3 = vrot.slane %v757_v1, 1 }
 0x9a4   : > { %vm759_vm10 = vcmp.lt.s32.totalorder %v757_v1, %v758_v3 }
 0x9a5   : > { %v760_v8 = vsel %vm759_vm10, %v757_v1, %v758_v3 }
 0x9a6   : > { %1727 = vpush %v760_v8 }
 0x9a7   : > { %1729 = vpush %v834_v9 }
 0x9d7   : > { %s1728_s13 = spop %1727 }
 0x9d8   : > { %v762_v10 = vstv %s1728_s13  ;;  %s1730_s14 = spop %1729  ;;  %s2669_s13 = smov 0  }
 0x9d9   : > { %vm763_vm11 = vcmp.eq.s32.totalorder %v2245_v0, %v762_v10  ;;  %v836_v11 = vstv %s1730_s14 }
 0x9da   : > { %v764_v12 = vsel %vm763_vm11, 1, %v1955_v2  ;;  %vm837_vm12 = vcmp.eq.f32.partialorder %v2308_v44, %v836_v11  ;;  %vm1031_vm11 = vcmask 1047559  }
 0x9db   : > { %v765_v15 = vrot.slane %v764_v12, 4  ;;  %v839_v16 = vsel %vm837_vm12, %v838_v22, 128  ;;  %v1032_v9 = vsel %vm1031_vm11, %v2318_v47, -inf }
 0x9dc   : > { %v840_v18 = vsel %vm825_vm3, %v839_v16, 2147483647 }
 0x9dd   : > { %vm766_vm14 = vcmp.ne.s32.totalorder %v765_v15, 0  ;;  %v842_v24 = vshra.s32 %v840_v18, 16  ;;  %v841_v26 = vand.u32 65535, %v840_v18 }
 0x9de   : > { %vm767_vm15 = vmand %vm310_vm7, %vm766_vm14 }
 0x9df   : > { %v769_v28 = vsel %vm767_vm15, 4, %v768_v23  ;;  %v844_v31 = vcvt.s32.f32 %v842_v24  ;;  %v843_v27 = vcvt.s32.f32 %v841_v26 }
 0x9e0   : > { %v871_v1 = vrot.slane %v769_v28, 7 }
 0x9e1   : > { %845 = vmin.xlane.f32.xlu0 %v844_v31 }
 0x9e5   : > { %930 = vmax.xlane.f32.xlu0 %v929_v7 }
 0xa6e   : > { %v846_v43 = vpop.xlane.xlu0 %845 }
 0xa6f   : > { %vm847_vm1 = vcmp.eq.f32.partialorder %v844_v31, %v846_v43  ;;  %v852_v50 = vcvt.f32.s32 %v846_v43 }
 0xa70   : > { %v848_v49 = vsel %vm847_vm1, %v843_v27, inf }
 0xa71   : > { %849 = vmin.xlane.f32.xlu1 %v848_v49  ;;  %v853_v38 = vshll.u32 %v852_v50, 16 }
 0xa72   : > { %v931_v30 = vpop.xlane.xlu0 %930 }
 0xa73   : > { %v932_v32 = vrot.slane %v931_v30, 4 }
 0xa75   : > { %v933_v33 = vmax.f32 %v931_v30, %v932_v32 }
 0xa77   : > { %v934_v37 = vrot.slane %v933_v33, 2 }
 0xa79   : > { %v935_v56 = vmax.f32 %v933_v33, %v934_v37 }
 0xa7b   : > { %v936_v59 = vrot.slane %v935_v56, 1 }
 0xa7d   : > { %v937_v25 = vmax.f32 %v935_v56, %v936_v59 }
 0xafe   : > { %v850_v51 = vpop.xlane.xlu1 %849 }
 0xaff   : > { %v851_v52 = vcvt.f32.s32 %v850_v51 }
 0xb01   : > { %v854_v53 = vadd.s32 %v853_v38, %v851_v52  ;;  %v1044_v52 = vrot.slane %v2245_v0, 1 }
 0xb03   : > { %v855_v55 = vrot.slane %v854_v53, 4 }
 0xb05   : > { %vm856_vm2 = vcmp.lt.s32.totalorder %v854_v53, %v855_v55 }
 0xb06   : > { %v857_v54 = vsel %vm856_vm2, %v854_v53, %v855_v55 }
 0xb07   : > { %v858_v57 = vrot.slane %v857_v54, 2 }
 0xb09   : > { %vm859_vm13 = vcmp.lt.s32.totalorder %v857_v54, %v858_v57 }
 0xb0a   : > { %v860_v40 = vsel %vm859_vm13, %v857_v54, %v858_v57 }
 0xb0b   : > { %v861_v60 = vrot.slane %v860_v40, 1 }
 0xb0d   : > { %vm862_vm3 = vcmp.lt.s32.totalorder %v860_v40, %v861_v60 }
 0xb0e   : > { %v863_v36 = vsel %vm862_vm3, %v860_v40, %v861_v60 }
 0xb0f   : > { %1731 = vpush %v863_v36 }
 0xb10   : > { %1733 = vpush %v937_v25  ;;  %v1864_v25 = vld [vmem:[%s2046_s5] sm:$0xff]  ;;  %s1681_s5 = sshll.u32 %s2040_s27, 1 }
 0xb11   : > { %s225_s7 = scalar_lea.vmem %s2748_s3, %s1681_s5 }
 0xb40   : > { %s1732_s20 = spop %1731 }
 0xb41   : > { %v865_v45 = vstv %s1732_s20  ;;  %s1734_s22 = spop %1733 }
 0xb42   : > { %vm866_vm5 = vcmp.eq.s32.totalorder %v2245_v0, %v865_v45  ;;  %v939_v4 = vstv %s1734_s22 }
 0xb43   : > { %v867_v62 = vsel %vm866_vm5, 1, %v1955_v2  ;;  %vm940_vm6 = vcmp.eq.f32.partialorder %v2314_v46, %v939_v4 }
 0xb44   : > { %v868_v63 = vrot.slane %v867_v62, 3  ;;  %v942_v5 = vsel %vm940_vm6, %v941_v29, 128  ;;  %vm313_vm6 = vcmp.gt.f32.partialorder %v2269_v21, -1.0 }
 0xb45   : > { %v943_v13 = vsel %vm928_vm0, %v942_v5, 2147483647 }
 0xb46   : > { %vm869_vm9 = vcmp.ne.s32.totalorder %v868_v63, 0  ;;  %v945_v6 = vshra.s32 %v943_v13, 16  ;;  %v944_v22 = vand.u32 65535, %v943_v13 }
 0xb47   : > { %vm870_vm10 = vmand %vm310_vm7, %vm869_vm9 }
 0xb48   : > { %v872_v3 = vsel %vm870_vm10, 5, %v871_v1  ;;  %v947_v8 = vcvt.s32.f32 %v945_v6  ;;  %v946_v11 = vcvt.s32.f32 %v944_v22  ;;  %v314_v6 = vsel %vm313_vm6, %v2269_v21, -1.0 }
 0xb49   : > { %v974_v40 = vrot.slane %v872_v3, 7 }
 0xb4a   : > { %948 = vmin.xlane.f32.xlu1 %v947_v8 }
 0xb4e   : > { %1033 = vmax.xlane.f32.xlu1 %v1032_v9  ;;  %v408_v9 = vrot.slane %v314_v6, 7  ;;  %v1150_v6 = vrot.slane %v2069_v20, 5 }
 0xb50   : > { %vm410_vm10 = vcmp.gt.f32.partialorder %v2284_v39, %v408_v9 }
 0xbd7   : > { %v949_v10 = vpop.xlane.xlu1 %948 }
 0xbd8   : > { %vm950_vm12 = vcmp.eq.f32.partialorder %v947_v8, %v949_v10  ;;  %v955_v18 = vcvt.f32.s32 %v949_v10 }
 0xbd9   : > { %v951_v12 = vsel %vm950_vm12, %v946_v11, inf }
 0xbda   : > { %952 = vmin.xlane.f32.xlu0 %v951_v12  ;;  %v956_v28 = vshll.u32 %v955_v18, 16  ;;  %v411_v12 = vsel %vm410_vm10, %v2284_v39, %v408_v9  ;;  %v1111_v9 = vrot.slane %v2150_v58, 2 }
 0xbdb   : > { %v1034_v15 = vpop.xlane.xlu1 %1033 }
 0xbdc   : > { %v1035_v16 = vrot.slane %v1034_v15, 4 }
 0xbde   : > { %v1036_v23 = vmax.f32 %v1034_v15, %v1035_v16  ;;  %v510_v16 = vrot.slane %v411_v12, 7  ;;  %v1127_v12 = vrot.slane %v2150_v58, 3 }
 0xbe0   : > { %v1037_v26 = vrot.slane %v1036_v23, 2 }
 0xbe2   : > { %v1038_v49 = vmax.f32 %v1036_v23, %v1037_v26 }
 0xbe4   : > { %v1039_v50 = vrot.slane %v1038_v49, 1 }
 0xbe6   : > { %v1040_v38 = vmax.f32 %v1038_v49, %v1039_v50  ;;  %v2405_v49 = vld [vmem:[%s225_s7] sm:$0x1] }
 0xc67   : > { %v953_v24 = vpop.xlane.xlu0 %952 }
 0xc68   : > { %v954_v31 = vcvt.f32.s32 %v953_v24  ;;  %v412_v24 = vsel %vm410_vm10, 1, %v1955_v2 }
 0xc6a   : > { %v957_v7 = vadd.s32 %v956_v28, %v954_v31  ;;  %v514_v31 = vrot.slane %v412_v24, 7  ;;  %v1159_v24 = vrot.slane %v2150_v58, 5 }
 0xc6c   : > { %v958_v43 = vrot.slane %v957_v7, 4 }
 0xc6e   : > { %vm959_vm14 = vcmp.lt.s32.totalorder %v957_v7, %v958_v43 }
 0xc6f   : > { %v960_v27 = vsel %vm959_vm14, %v957_v7, %v958_v43  ;;  %vm512_vm14 = vcmp.gt.f32.partialorder %v2286_v41, %v510_v16 }
 0xc70   : > { %v961_v30 = vrot.slane %v960_v27, 2  ;;  %v513_v21 = vsel %vm512_vm14, %v2286_v41, %v510_v16  ;;  %v515_v39 = vsel %vm512_vm14, 2, %v514_v31 }
 0xc71   : > { %v613_v23 = vrot.slane %v513_v21, 7  ;;  %v617_v26 = vrot.slane %v515_v39, 7  ;;  %v1143_v21 = vrot.slane %v2150_v58, 4 }
 0xc72   : > { %vm962_vm15 = vcmp.lt.s32.totalorder %v960_v27, %v961_v30 }
 0xc73   : > { %v963_v32 = vsel %vm962_vm15, %v960_v27, %v961_v30  ;;  %vm615_vm15 = vcmp.gt.f32.partialorder %v2294_v42, %v613_v23  ;;  %v2407_v30 = vld [vmem:[%s225_s7 + $0x1] sm:$0x1] }
 0xc74   : > { %v964_v33 = vrot.slane %v963_v32, 1  ;;  %v616_v28 = vsel %vm615_vm15, %v2294_v42, %v613_v23  ;;  %v618_v41 = vsel %vm615_vm15, 3, %v617_v26  ;;  %v1156_v23 = vrot.slane %v2102_v35, 5 }
 0xc75   : > { %v716_v7 = vrot.slane %v616_v28, 7  ;;  %v720_v42 = vrot.slane %v618_v41, 7  ;;  %v1172_v28 = vrot.slane %v2102_v35, 6  ;;  %v1175_v26 = vrot.slane %v2150_v58, 6 }
 0xc76   : > { %vm965_vm0 = vcmp.lt.s32.totalorder %v963_v32, %v964_v33 }
 0xc77   : > { %v966_v51 = vsel %vm965_vm0, %v963_v32, %v964_v33  ;;  %vm718_vm0 = vcmp.gt.f32.partialorder %v2300_v19, %v716_v7  ;;  %v2412_v32 = vmax.f32 %v2405_v49, %v2407_v30 }
 0xc78   : > { %1735 = vpush %v966_v51  ;;  %v719_v43 = vsel %vm718_vm0, %v2300_v19, %v716_v7  ;;  %v721_v50 = vsel %vm718_vm0, 4, %v720_v42 }
 0xc79   : > { %1737 = vpush %v1040_v38  ;;  %v819_v27 = vrot.slane %v719_v43, 7  ;;  %v1419_v33 = vsub.f32 %v2405_v49, %v2412_v32  ;;  %v823_v51 = vrot.slane %v721_v50, 7  ;;  %v1431_v38 = vsub.f32 %v2407_v30, %v2412_v32 }
 0xc7a   : > { %v1182_v43 = vrot.slane %v2069_v20, 7  ;;  %v1188_v50 = vrot.slane %v2102_v35, 7 }
 0xca9   : > { %s1736_s23 = spop %1735 }
 0xcaa   : > { %v968_v53 = vstv %s1736_s23  ;;  %s1738_s29 = spop %1737 }
 0xcab   : > { %vm969_vm1 = vcmp.eq.s32.totalorder %v2245_v0, %v968_v53  ;;  %v1042_v37 = vstv %s1738_s29  ;;  %v1420_v53 = vmul.f32 1.442695, %v1419_v33 }
 0xcac   : > { %v970_v55 = vsel %vm969_vm1, 1, %v1955_v2  ;;  %vm1043_vm2 = vcmp.eq.f32.partialorder %v2318_v47, %v1042_v37  ;;  %vm821_vm1 = vcmp.gt.f32.partialorder %v2308_v44, %v819_v27 }
 0xcad   : > { %v971_v54 = vrot.slane %v970_v55, 2  ;;  %v1045_v56 = vsel %vm1043_vm2, %v1044_v52, 128  ;;  %v822_v19 = vsel %vm821_vm1, %v2308_v44, %v819_v27  ;;  %v824_v37 = vsel %vm821_vm1, 5, %v823_v51 }
 0xcae   : > { %v1046_v57 = vsel %vm1031_vm11, %v1045_v56, 2147483647  ;;  %v922_v52 = vrot.slane %v822_v19, 7  ;;  %v1432_v55 = vmul.f32 1.442695, %v1431_v38  ;;  %1854 = vpow2.f32 %v1420_v53 }
 0xcaf   : > { %vm972_vm13 = vcmp.ne.s32.totalorder %v971_v54, 0  ;;  %v1048_v59 = vshra.s32 %v1046_v57, 16  ;;  %v1047_v29 = vand.u32 65535, %v1046_v57  ;;  %v926_v54 = vrot.slane %v824_v37, 7 }
 0xcb0   : > { %vm973_vm3 = vmand %vm310_vm7, %vm972_vm13  ;;  %vm924_vm2 = vcmp.gt.f32.partialorder %v2314_v46, %v922_v52  ;;  %1856 = vpow2.f32 %v1432_v55  ;;  %v1086_v44 = vrot.slane %v2061_v17, 1  ;;  %v1105_v57 = vrot.slane %v2061_v17, 2 }
 0xcb1   : > { %v2387_v60 = vsel %vm973_vm3, 6, %v974_v40  ;;  %v1050_v36 = vcvt.s32.f32 %v1048_v59  ;;  %v1049_v4 = vcvt.s32.f32 %v1047_v29  ;;  %v925_v56 = vsel %vm924_vm2, %v2314_v46, %v922_v52 }
 0xcb2   : > { %v1121_v40 = vrot.slane %v2061_v17, 3  ;;  %v1137_v59 = vrot.slane %v2061_v17, 4  ;;  %v1169_v29 = vrot.slane %v2061_v17, 6  ;;  %v1102_v46 = vrot.slane %v2069_v20, 2 }
 0xcb3   : > { %1051 = vmin.xlane.f32.xlu0 %v1050_v36  ;;  %v1077_v39 = vrot.slane %v2387_v60, 7  ;;  %v1191_v60 = vrot.slane %v2150_v58, 7 }
 0xcb8   : > { %v1855_v7 = vpop.eup %1854 }
 0xcba   : > { %v1857_v41 = vpop.eup %1856 }
 0xcbb   : > { %v1434_v55 = vadd.f32 %v1857_v41, %v1855_v7 }
 0xcbd   : > { %1858 = vlog2.f32 %v1434_v55 }
 0xcc9   : > { %1096 = vperm.xlu0 %1837, %v1864_v25   ;;  %v1153_v25 = vrot.slane %v2061_v17, 5 }
 0xd40   : > { %v1052_v45 = vpop.xlane.xlu0 %1051 }
 0xd41   : > { %vm1053_vm5 = vcmp.eq.f32.partialorder %v1050_v36, %v1052_v45  ;;  %v1058_v63 = vcvt.f32.s32 %v1052_v45  ;;  %v1083_v36 = vrot.slane %v2069_v20, 1  ;;  %v1185_v45 = vrot.slane %v2061_v17, 7 }
 0xd42   : > { %v1054_v62 = vsel %vm1053_vm5, %v1049_v4, inf  ;;  %v927_v4 = vsel %vm924_vm2, 6, %v926_v54 }
 0xd43   : > { %1055 = vmin.xlane.f32.xlu1 %v1054_v62  ;;  %v1059_v13 = vshll.u32 %v1058_v63, 16  ;;  %v1025_v62 = vrot.slane %v925_v56, 7  ;;  %v1118_v63 = vrot.slane %v2069_v20, 3 }
 0xd45   : > { %vm2442_vm3 = vcmp.gt.f32.partialorder %v2318_v47, %v1025_v62 }
 0xd46   : > { %v1028_v42 = vsel %vm2442_vm3, %v2318_v47, %v1025_v62 }
 0xd48   : > { %v2452_v31 = vpop.permute.xlu0 %1096 }
 0xd49   : > { %v1098_v33 = vrot.slane %v2452_v31, 1  ;;  %v1114_v51 = vrot.slane %v2452_v31, 2  ;;  %v1130_v38 = vrot.slane %v2452_v31, 3  ;;  %v1146_v52 = vrot.slane %v2452_v31, 4 }
 0xd4a   : > { %v1162_v53 = vrot.slane %v2452_v31, 5  ;;  %v1178_v47 = vrot.slane %v2452_v31, 6  ;;  %v1194_v37 = vrot.slane %v2452_v31, 7 }
 0xdd0   : > { %v1056_v5 = vpop.xlane.xlu1 %1055 }
 0xdd1   : > { %v1057_v1 = vcvt.f32.s32 %v1056_v5 }
 0xdd3   : > { %v1060_v3 = vadd.s32 %v1059_v13, %v1057_v1  ;;  %v1089_v13 = vrot.slane %v2102_v35, 1  ;;  %v1134_v1 = vrot.slane %v2069_v20, 4 }
 0xdd5   : > { %v1061_v8 = vrot.slane %v1060_v3, 4 }
 0xdd7   : > { %vm1062_vm9 = vcmp.lt.s32.totalorder %v1060_v3, %v1061_v8 }
 0xdd8   : > { %v1063_v22 = vsel %vm1062_vm9, %v1060_v3, %v1061_v8  ;;  %v1092_v3 = vrot.slane %v2150_v58, 1  ;;  %v1108_v8 = vrot.slane %v2102_v35, 2 }
 0xdd9   : > { %v1064_v10 = vrot.slane %v1063_v22, 2 }
 0xddb   : > { %vm1065_vm11 = vcmp.lt.s32.totalorder %v1063_v22, %v1064_v10 }
 0xddc   : > { %v1066_v11 = vsel %vm1065_vm11, %v1063_v22, %v1064_v10  ;;  %v1029_v22 = vrot.slane %v927_v4, 7 }
 0xddd   : > { %v1067_v15 = vrot.slane %v1066_v11, 1 }
 0xdde   : > { %v1030_v27 = vsel %vm2442_vm3, 7, %v1029_v22 }
 0xddf   : > { %vm1068_vm12 = vcmp.lt.s32.totalorder %v1066_v11, %v1067_v15 }
 0xde0   : > { %v1069_v18 = vsel %vm1068_vm12, %v1066_v11, %v1067_v15  ;;  %v1124_v11 = vrot.slane %v2102_v35, 3 }
 0xde1   : > { %1739 = vpush %v1069_v18  ;;  %v1140_v18 = vrot.slane %v2102_v35, 4 }
 0xe12   : > { %s1740_s8 = spop %1739 }
 0xe13   : > { %v1071_v5 = vstv %s1740_s8 }
 0xe14   : > { %vm1072_vm13 = vcmp.eq.s32.totalorder %v2245_v0, %v1071_v5 }
 0xe15   : > { %v1073_v10 = vsel %vm1072_vm13, 1, %v1955_v2  ;;  %v1166_v2 = vrot.slane %v2069_v20, 6 }
 0xe16   : > { %v1074_v16 = vrot.slane %v1073_v10, 1 }
 0xe18   : > { %vm1075_vm5 = vcmp.ne.s32.totalorder %v1074_v16, 0 }
 0xe19   : > { %vm1076_vm6 = vmand %vm310_vm7, %vm1075_vm5 }
 0xe1a   : > { %v1078_v19 = vsel %vm1076_vm6, 7, %v1077_v39 }
 0xe1b   : > { %vm1079_vm9 = vcmp.ge.s32.totalorder %v1078_v19, 0 }
 0xe1c   : > { %v2473_v48 = vsel %vm1079_vm9, %v1078_v19, %v1030_v27  ;;  %v1080_v7 = vsel %vm1079_vm9, 2.0, %v1028_v42 }
 0xe1d   : > { %vm1082_vm7 = vcmp.eq.s32.totalorder %v2473_v48, 0  ;;  %vm1101_vm10 = vcmp.eq.s32.totalorder %v2473_v48, 1  ;;  %vm1117_vm11 = vcmp.eq.s32.totalorder %v2473_v48, 2  ;;  %vm1133_vm12 = vcmp.eq.s32.totalorder %v2473_v48, 3 }
 0xe1e   : > { %v1085_v54 = vsel %vm1082_vm7, %v1083_v36, 0.0  ;;  %v1088_v56 = vsel %vm1082_vm7, %v1086_v44, 0.0  ;;  %v1091_v4 = vsel %vm1082_vm7, %v1089_v13, 0.0  ;;  %v1094_v62 = vsel %vm1082_vm7, %v1092_v3, 0.0 }
 0xe1f   : > { %v1104_v5 = vsel %vm1101_vm10, %v1102_v46, %v1085_v54  ;;  %v1107_v22 = vsel %vm1101_vm10, %v1105_v57, %v1088_v56  ;;  %v1110_v36 = vsel %vm1101_vm10, %v1108_v8, %v1091_v4  ;;  %v1113_v44 = vsel %vm1101_vm10, %v1111_v9, %v1094_v62  ;;  %v1693_v56 = vld [vmem:[%s2746_s1 + $0x6] ss:$0 sm:$0xff] }
 0xe20   : > { %v1120_v13 = vsel %vm1117_vm11, %v1118_v63, %v1104_v5  ;;  %v1123_v3 = vsel %vm1117_vm11, %v1121_v40, %v1107_v22  ;;  %v1126_v46 = vsel %vm1117_vm11, %v1124_v11, %v1110_v36  ;;  %v1129_v57 = vsel %vm1117_vm11, %v1127_v12, %v1113_v44 }
 0xe21   : > { %v1136_v8 = vsel %vm1133_vm12, %v1134_v1, %v1120_v13  ;;  %v1139_v9 = vsel %vm1133_vm12, %v1137_v59, %v1123_v3  ;;  %v1142_v63 = vsel %vm1133_vm12, %v1140_v18, %v1126_v46  ;;  %v1145_v40 = vsel %vm1133_vm12, %v1143_v21, %v1129_v57 }
 0xe22   : > { %vm1149_vm14 = vcmp.eq.s32.totalorder %v2473_v48, 4  ;;  %vm1165_vm15 = vcmp.eq.s32.totalorder %v2473_v48, 5  ;;  %v1100_v10 = vsel %vm1082_vm7, %v1098_v33, 0.0  ;;  %v1961_v11 = vmov 1966171168  }
 0xe23   : > { %v1285_v1 = vunpack.c.l.s4 %v1961_v11  ;;  %v1152_v59 = vsel %vm1149_vm14, %v1150_v6, %v1136_v8  ;;  %v1155_v12 = vsel %vm1149_vm14, %v1153_v25, %v1139_v9  ;;  %v1158_v15 = vsel %vm1149_vm14, %v1156_v23, %v1142_v63  ;;  %v1859_v9 = vpop.eup %1858 }
 0xe24   : > { %v1161_v16 = vsel %vm1149_vm14, %v1159_v24, %v1145_v40  ;;  %v1168_v18 = vsel %vm1165_vm15, %v1166_v2, %v1152_v59  ;;  %v1171_v21 = vsel %vm1165_vm15, %v1169_v29, %v1155_v12  ;;  %v1174_v6 = vsel %vm1165_vm15, %v1172_v28, %v1158_v15 }
 0xe25   : > { %v1177_v25 = vsel %vm1165_vm15, %v1175_v26, %v1161_v16  ;;  %v1116_v23 = vsel %vm1101_vm10, %v1114_v51, %v1100_v10  ;;  %vm1181_vm0 = vcmp.eq.s32.totalorder %v2473_v48, 6  ;;  %vm1197_vm1 = vcmp.eq.s32.totalorder %v2473_v48, 7 }
 0xe26   : > { %v1132_v24 = vsel %vm1117_vm11, %v1130_v38, %v1116_v23  ;;  %v1184_v29 = vsel %vm1181_vm0, %v1182_v43, %v1168_v18  ;;  %v1187_v2 = vsel %vm1181_vm0, %v1185_v45, %v1171_v21  ;;  %v1190_v28 = vsel %vm1181_vm0, %v1188_v50, %v1174_v6  ;;  %v1697_v38 = vld [vmem:[%s2746_s1 + $0x9] ss:$0 sm:$0xff] }
 0xe27   : > { %v1148_v39 = vsel %vm1133_vm12, %v1146_v52, %v1132_v24  ;;  %v1193_v26 = vsel %vm1181_vm0, %v1191_v60, %v1177_v25  ;;  %v1198_v41 = vsel %vm1197_vm1, %v2069_v20, %v1184_v29  ;;  %v1199_v43 = vsel %vm1197_vm1, %v2061_v17, %v1187_v2  ;;  %v1692_v20 = vld [vmem:[%s2746_s1 + $0x4] ss:$0 sm:$0xff]  ;;  %v1694_v17 = vld [vmem:[%s2746_s1 + $0x5] ss:$0 sm:$0xff] }
 0xe28   : > { %v1164_v45 = vsel %vm1149_vm14, %v1162_v53, %v1148_v39  ;;  %v1200_v27 = vsel %vm1197_vm1, %v2102_v35, %v1190_v28  ;;  %v1201_v42 = vsel %vm1197_vm1, %v2150_v58, %v1193_v26  ;;  %vm1204_vm2 = vcmp.lt.f32.partialorder %v1080_v7, 0.35  ;;  %v1696_v35 = vld [vmem:[%s2746_s1 + $0x8] ss:$0 sm:$0xff]  ;;  %v1281_v39 = vld [vmem:[%s2625_s9] sm:$0x1] }
 0xe29   : > { %v1180_v50 = vsel %vm1165_vm15, %v1178_v47, %v1164_v45  ;;  %v1225_v60 = vadd.f32 %v1200_v27, %v1198_v41  ;;  %v1241_v19 = vadd.f32 %v1201_v42, %v1199_v43  ;;  %v1257_v33 = vsub.f32 %v1200_v27, %v1198_v41  ;;  %v1699_v27 = vld [vmem:[%s2625_s9 + $0x1] sm:$0x1] }
 0xe2a   : > { %v1196_v58 = vsel %vm1181_vm0, %v1194_v37, %v1180_v50  ;;  %v1269_v51 = vsub.f32 %v1201_v42, %v1199_v43  ;;  %v1286_v52 = vunpack.c.0.s8 %v1285_v1  ;;  %v1695_v37 = vld [vmem:[%s2746_s1 + $0x7] ss:$0 sm:$0xff]  ;;  %v1428_v48 = vrot.slane %v2405_v49, %v2252_v34 }
 0xe2b   : > { %v1203_v53 = vsel %vm1197_vm1, %v2452_v31, %v1196_v58  ;;  %v1226_v47 = vmul.f32 0.5, %v1225_v60  ;;  %v1242_v55 = vmul.f32 0.5, %v1241_v19  ;;  %v1258_v54 = vmax.f32 %v1257_v33, 1e-12 }
 0xe2c   : > { %v1205_v4 = vsel %vm1204_vm2, 0.0, %v1203_v53  ;;  %v1270_v62 = vmax.f32 %v1269_v51, 1e-12  ;;  %v2603_v31 = vsub.s32 %v1286_v52, %v2053_v14  ;;  %v1440_v3 = vrot.slane %v2407_v30, %v2252_v34 }
 0xe2d   : > { %v1741_v5 = vtrunc.f32 %v1205_v4  ;;  %v1233_v22 = vsub.f32 %v1226_v47, %v1692_v20  ;;  %v1249_v36 = vsub.f32 %v1242_v55, %v1694_v17  ;;  %v1265_v44 = vmul.f32 %v1696_v35, %v1258_v54 }
 0xe2e   : > { %v1277_v13 = vmul.f32 %v1697_v38, %v1270_v62  ;;  %v1962_v63 = vmov 0.0   ;;  %v1444_v21 = vmul.f32 0.6931472, %v1859_v9 }
 0xe2f   : > { %v2609_v46 = vcvt.f32.s32 %v1741_v5  ;;  %v1240_v57 = vmul.f32 %v1693_v56, %v1233_v22  ;;  %v1256_v8 = vmul.f32 %v1695_v37, %v1249_v36  ;;  %1860 = vlog2.f32 %v1265_v44  ;;  %v1701_v22 = vld [vmem:[%s2625_s9 + $0x2] sm:$0x1] }
 0xe30   : > { %1862 = vlog2.f32 %v1277_v13  ;;  %v1445_v41 = vadd.f32 %v1444_v21, %v2412_v32 }
 0xe31   : > { %vm1207_vm13 = vcmp.gt.s32.totalorder %v2609_v46, 0  ;;  %vm1423_vm3 = vcmp.eq.s32.totalorder %v2609_v46, 0  ;;  %vm1435_vm5 = vcmp.eq.s32.totalorder %v2609_v46, 1  ;;  %v1283_v14 = vcombine.high %v1240_v57, %v1240_v57 }
 0xe32   : > { %v1208_v49 = vsel %vm1207_vm13, 1.0, %v1962_v63  ;;  %v1311_v30 = vcombine.high %v1256_v8, %v1256_v8  ;;  %v1430_v40 = vsel %vm1423_vm3, %v1428_v48, 0.0 }
 0xe33   : > { %v1210_v10 = vrot.slane %v1208_v49, 7  ;;  %v1290_v11 = vrot.slane %v1283_v14, %v2603_v31  ;;  %v1442_v1 = vsel %vm1435_vm5, %v1440_v3, %v1430_v40  ;;  %v1703_v3 = vld [vmem:[%s2625_s9 + $0x3] sm:$0x1] }
 0xe34   : > { %v1318_v59 = vrot.slane %v1311_v30, %v2603_v31  ;;  %v1447_v12 = vcombine.high %v1442_v1, %v1442_v1 }
 0xe35   : > { %v1212_v15 = vsel %vm315_vm8, %v1210_v10, 0.0  ;;  %v1291_v16 = vcombine.high %v1290_v11, %v1290_v11 }
 0xe36   : > { %1213 = vadd.xlane.f32.xlu1 %v1212_v15  ;;  %v1319_v18 = vcombine.high %v1318_v59, %v1318_v59  ;;  %v1454_v6 = vrot.slane %v1447_v12, %v2603_v31 }
 0xe37   : > { %v1298_v25 = vrot.slane %v1291_v16, %v2603_v31 }
 0xe38   : > { %v1326_v7 = vrot.slane %v1319_v18, %v2603_v31  ;;  %v1455_v23 = vcombine.high %v1454_v6, %v1454_v6 }
 0xe39   : > { %v1861_v24 = vpop.eup %1860  ;;  %v1299_v29 = vcombine.high %v1298_v25, %v1298_v25 }
 0xe3a   : > { %v1863_v2 = vpop.eup %1862  ;;  %v1267_v28 = vmul.f32 0.6931472, %v1861_v24  ;;  %v1327_v26 = vcombine.high %v1326_v7, %v1326_v7  ;;  %v1462_v43 = vrot.slane %v1455_v23, %v2603_v31 }
 0xe3b   : > { %v1279_v45 = vmul.f32 0.6931472, %v1863_v2  ;;  %v1301_v50 = vsub.f32 %v1281_v39, %v1299_v29 }
 0xe3c   : > { %v1268_v42 = vmul.f32 5.0, %v1267_v28  ;;  %v1463_v20 = vcombine.high %v1462_v43, %v1462_v43  ;;  %v1329_v60 = vsub.f32 %v1699_v27, %v1327_v26 }
 0xe3d   : > { %v1280_v17 = vmul.f32 5.0, %v1279_v45  ;;  %v1302_v51 = vand.u32 2147483647, %v1301_v50  ;;  %v1304_v38 = vmul.f32 0.5, %v1301_v50 }
 0xe3e   : > { %v1340_v19 = vcombine.high %v1268_v42, %v1268_v42  ;;  %v1465_v33 = vsub.f32 %v1445_v41, %v1463_v20  ;;  %v1330_v53 = vand.u32 2147483647, %v1329_v60  ;;  %v1332_v47 = vmul.f32 0.5, %v1329_v60 }
 0xe3f   : > { %v1369_v35 = vcombine.high %v1280_v17, %v1280_v17  ;;  %v1305_v37 = vmul.f32 %v1304_v38, %v1301_v50  ;;  %v1698_v5 = vadd.f32 -0.5, %v1302_v51  ;;  %vm1303_vm6 = vcmp.lt.f32.partialorder %v1302_v51, 1.0 }
 0xe40   : > { %v1347_v58 = vrot.slane %v1340_v19, %v2603_v31  ;;  %v1470_v32 = vrot.slane %v1465_v33, %v2252_v34  ;;  %v1333_v44 = vmul.f32 %v1332_v47, %v1329_v60  ;;  %v1700_v13 = vadd.f32 -0.5, %v1330_v53 }
 0xe41   : > { %v1376_v52 = vrot.slane %v1369_v35, %v2603_v31  ;;  %vm1331_vm9 = vcmp.lt.f32.partialorder %v1330_v53, 1.0  ;;  %v1307_v49 = vsel %vm1303_vm6, %v1305_v37, %v1698_v5 }
 0xe42   : > { %v1348_v55 = vcombine.high %v1347_v58, %v1347_v58  ;;  %v1487_v56 = vsel %vm1207_vm13, 0.0, %v1470_v32  ;;  %v1335_v30 = vsel %vm1331_vm9, %v1333_v44, %v1700_v13  ;;  %v1472_v23 = vsel %vm1207_vm13, %v1470_v32, 0.0 }
 0xe43   : > { %v1377_v54 = vcombine.high %v1376_v52, %v1376_v52  ;;  %v1489_v62 = vrot.slane %v1487_v56, 7  ;;  %v1336_v12 = vadd.f32 %v1335_v30, %v1307_v49  ;;  %v1474_v2 = vrot.slane %v1472_v23, 7 }
 0xe44   : > { %v1355_v4 = vrot.slane %v1348_v55, %v2603_v31  ;;  %v1941_v56 = vmov 1073741824  }
 0xe45   : > { %v1384_v36 = vrot.slane %v1377_v54, %v2603_v31  ;;  %v2644_v57 = vsel %vm232_vm4, %v1489_v62, -1.0  ;;  %v1476_v28 = vsel %vm315_vm8, %v1474_v2, 0.0 }
 0xe46   : > { %v1356_v48 = vcombine.high %v1355_v4, %v1355_v4  ;;  %v1945_v4 = vmov 0  }
 0xe47   : > { %v1385_v8 = vcombine.high %v1384_v36, %v1384_v36 }
 0xe48   : > { %v1358_v14 = vsub.f32 %v1701_v22, %v1356_v48 }
 0xe49   : > { %v1387_v9 = vsub.f32 %v1703_v3, %v1385_v8 }
 0xe4a   : > { %v1359_v40 = vand.u32 2147483647, %v1358_v14  ;;  %v1361_v10 = vmul.f32 0.5, %v1358_v14 }
 0xe4b   : > { %v1388_v11 = vand.u32 2147483647, %v1387_v9  ;;  %v1390_v1 = vmul.f32 0.5, %v1387_v9 }
 0xe4c   : > { %vm1360_vm7 = vcmp.lt.f32.partialorder %v1359_v40, 1.0  ;;  %v1362_v31 = vmul.f32 %v1361_v10, %v1358_v14  ;;  %v1702_v59 = vadd.f32 -0.5, %v1359_v40 }
 0xe4d   : > { %vm1389_vm10 = vcmp.lt.f32.partialorder %v1388_v11, 1.0  ;;  %v1391_v15 = vmul.f32 %v1390_v1, %v1387_v9  ;;  %v1704_v0 = vadd.f32 -0.5, %v1388_v11 }
 0xe4e   : > { %v1364_v16 = vsel %vm1360_vm7, %v1362_v31, %v1702_v59 }
 0xe4f   : > { %v1365_v18 = vadd.f32 %v1364_v16, %v1336_v12  ;;  %v1393_v21 = vsel %vm1389_vm10, %v1391_v15, %v1704_v0 }
 0xe51   : > { %v1394_v6 = vadd.f32 %v1393_v21, %v1365_v18 }
 0xe53   : > { %v1399_v25 = vrot.slane %v1394_v6, %v2252_v34 }
 0xe55   : > { %v1401_v7 = vsel %vm1207_vm13, %v1399_v25, 0.0 }
 0xe56   : > { %v1403_v24 = vrot.slane %v1401_v7, 7 }
 0xe58   : > { %v1405_v29 = vsel %vm315_vm8, %v1403_v24, 0.0 }
 0xe59   : > { %1406 = vadd.xlane.f32.xlu1 %v1405_v29 }
 0xe5d   : > { %1477 = vadd.xlane.f32.xlu1 %v1476_v28 }
 0xec3   : > { %v1214_v39 = vpop.xlane.xlu1 %1213 }
 0xec4   : > { %v1215_v26 = vrot.slane %v1214_v39, 4 }
 0xec6   : > { %v1216_v41 = vadd.f32 %v1215_v26, %v1214_v39 }
 0xec8   : > { %v1217_v43 = vrot.slane %v1216_v41, 2 }
 0xeca   : > { %v1218_v45 = vadd.f32 %v1217_v43, %v1216_v41 }
 0xecc   : > { %v1219_v34 = vrot.slane %v1218_v45, 1 }
 0xece   : > { %v1220_v27 = vadd.f32 %v1219_v34, %v1218_v45 }
 0xed0   : > { %1743 = vpush %v1220_v27 }
 0xee6   : > { %v1407_v42 = vpop.xlane.xlu1 %1406 }
 0xee7   : > { %v1408_v20 = vrot.slane %v1407_v42, 4 }
 0xee9   : > { %v1409_v46 = vadd.f32 %v1408_v20, %v1407_v42 }
 0xeea   : > { %v1478_v17 = vpop.xlane.xlu1 %1477 }
 0xeeb   : > { %v1410_v50 = vrot.slane %v1409_v46, 2  ;;  %v1479_v60 = vrot.slane %v1478_v17, 4 }
 0xeed   : > { %v1480_v19 = vadd.f32 %v1479_v60, %v1478_v17  ;;  %v1411_v33 = vadd.f32 %v1410_v50, %v1409_v46 }
 0xeef   : > { %v1481_v35 = vrot.slane %v1480_v19, 2  ;;  %v1412_v58 = vrot.slane %v1411_v33, 1 }
 0xef1   : > { %v1482_v51 = vadd.f32 %v1481_v35, %v1480_v19  ;;  %v1413_v38 = vadd.f32 %v1412_v58, %v1411_v33 }
 0xef3   : > { %1745 = vpush %v1413_v38  ;;  %v1483_v52 = vrot.slane %v1482_v51, 1 }
 0xef5   : > { %v1484_v32 = vadd.f32 %v1483_v52, %v1482_v51 }
 0xef7   : > { %1747 = vpush %v1484_v32 }
 0xf01   : > { %s2653_s27 = spop %1743 }
 0xf02   : > { %v1222_v53 = vstv %s2653_s27 }
 0xf03   : > { %v1223_v47 = vmul.f32 3.0, %v1222_v53 }
 0xf05   : > { %v2658_v55 = vmin.f32 %v1223_v47, 127.0 }
 0xf24   : > { %s2660_s10 = spop %1745 }
 0xf28   : > { %s2662_s11 = spop %1747 }
 0xf29   : > { %v1486_v54 = vstv %s2662_s11 }
 0xf2a LB: >> { %v1501_v62 = vor.u32 %v1943_v56, %v1947_v4  ;;  %v1517_v56 = vshra.s32 %v1943_v56, 1   ;;  %v1963_v37 = vmov 0.0   ;;  %s1498_s13 = sadd.s32 1, %s1951_s13   ;;  %s1951_s13 = sphi %s2669_s13, %s1498_s13   ;;  %v1947_v4 = vphi %v1945_v4, %v1946_v4   ;;  %v1943_v56 = vphi %v1941_v56, %v1517_v56  }
 0xf2b   : >> { %p1495_p11 = scmp.ge.s32.totalorder %s1498_s13, 31  }
 0xf2c   : >> { %vm1502_vm4 = vcmp.ge.s32.totalorder %v2644_v57, %v1501_v62  ;;  %vm1562_vm15 = vcmp.eq.s32.totalorder (%p1495_p11), %v2239_v61, 0  ;;  %v1563_v17 = vstv (%p1495_p11), %s2660_s10  ;;  %vm1565_vm0 = vcmp.eq.s32.totalorder (%p1495_p11), %v2239_v61, 1  ;;  %s1706_s29 = sshll.u32 (%p1495_p11), %s2011_s19, 4  ;;  %s1585_s5 = sshll.u32 (%p1495_p11), %s2667_s12, 4  ;;  %s2702_s5 = int_to_ptr.vmem [resolvable:$true] %s1585_s5 }
 0xf2d   : >> { %v1503_v5 = vsel %vm1502_vm4, 1.0, %v1963_v37  ;;  %vm1568_vm1 = vcmp.eq.s32.totalorder (%p1495_p11), %v2239_v61, 2  ;;  %v1564_v19 = vsel (%p1495_p11), %vm1562_vm15, %v1563_v17, 0.0  ;;  %s2700_s7 = scalar_lea.hbm (%p1495_p11), %s2749_s4, %s1706_s29  ;;  %s1573_s8 = scalar_lea.sflag (%p1495_p11), [#allocation3], %s212_s28 }
 0xf2e   : >> { %v1504_v22 = vsel %vm315_vm8, %v1503_v5, 0.0  ;;  %v1569_v35 = vsel (%p1495_p11), %vm1568_vm1, %v1222_v53, 0.0  ;;  %s1865_s9 = scalar_lea.vmem (%p1495_p11), %s2702_s5, 16  ;;  %s1964_s19 = smov (%p1495_p11), [#allocation2]  }
 0xf2f   : >> { %1505 = vadd.xlane.f32.xlu0 %v1504_v22  ;;  %p1866_p12 = scmp.ne.s32.totalorder (%p1495_p11), %s2702_s5, %s1865_s9  ;;  %s1869_s27 = sshll.u32 (%p1495_p11), %s1964_s19, 4  ;;  %s1870_s27 = int_to_ptr.vmem [resolvable:$false] %s1869_s27 }
 0xf30   : > { %s1871_s10 = scalar_lea.vmem (%p1495_p11), %s1870_s27, 32  ;;  %p1872_p1 = scmp.lt.s32.totalorder (%p1495_p11), %s2702_s5, %s1870_s27 }
 0xf31   : > { %p1867_p13 = pnand (%p1495_p11), %p1866_p12, %p2028_p5  ;;  %p1873_p2 = scmp.lt.s32.totalorder (%p1495_p11), %s1871_s10, %s1865_s9 }
 0xf33   : > { %p1868_p0 = pneg (%p1495_p11), %p1867_p13  ;;  %p1874_p3 = por (%p1495_p11), %p1873_p2, %p1872_p1 }
 0xf35   : > { %p1875_p4 = pnand (%p1495_p11), %p1874_p3, %p1868_p0 }
 0xfbc   : >> { %v1506_v36 = vpop.xlane.xlu0 %1505 }
 0xfbd   : >> { %v1507_v44 = vrot.slane %v1506_v36, 4 }
 0xfbf   : >> { %v1508_v13 = vadd.f32 %v1507_v44, %v1506_v36 }
 0xfc1   : >> { %v1509_v48 = vrot.slane %v1508_v13, 2 }
 0xfc3   : >> { %v1510_v3 = vadd.f32 %v1509_v48, %v1508_v13 }
 0xfc5   : >> { %v1511_v8 = vrot.slane %v1510_v3, 1 }
 0xfc7   : >> { %v1512_v14 = vadd.f32 %v1511_v8, %v1510_v3 }
 0xfc9   : >> { %1749 = vpush %v1512_v14 }
 0xff8   : > { %1497 = sbr.rel (!%p1495_p11) target bundleno = 3882 (0xf2a), region = 98 }
 0xffa   : >> { %s1750_s14 = spop %1749 }
 0xffb   : >> { %v1514_v9 = vstv %s1750_s14 }
 0xffc   : >> { %vm1515_vm11 = vcmp.ge.f32.partialorder %v1514_v9, %v2658_v55 }
 0xffd   : >> { %v1516_v49 = vsel %vm1515_vm11, %v1501_v62, %v1947_v4  }
 0xffe   : >> { %v1946_v4 = vmov %v1516_v49   ;;  %vm1543_vm12 = vcmp.eq.s32.totalorder (%p1495_p11), %v2644_v57, %v1516_v49  ;;  %vm1518_vm14 = vcmp.gt.s32.totalorder (%p1495_p11), %v2644_v57, %v1516_v49 }
 0xfff   : > { %v1544_v30 = vsel %vm1543_vm12, %v2644_v57, -1.0  ;;  %v1519_v40 = vsel %vm1518_vm14, 1.0, %v1962_v63  ;;  %v1531_v10 = vsel %vm1518_vm14, %v2644_v57, 0.0 }
0x1000   : > { %v1545_v11 = vsel %vm315_vm8, %v1544_v30, -inf  ;;  %v1520_v1 = vsel %vm315_vm8, %v1519_v40, 0.0  ;;  %v1532_v31 = vsel %vm315_vm8, %v1531_v10, 0.0  ;;  %vm1559_vm8 = vcmp.ge.f32.partialorder %v2658_v55, 1.0 }
0x1001   : > { %1546 = vmax.xlane.f32.xlu1 %v1545_v11  ;;  %1521 = vadd.xlane.f32.xlu0 %v1520_v1 }
0x1005   : > { %1533 = vadd.xlane.f32.xlu0 %v1532_v31 }
0x108e   : > { %v1547_v59 = vpop.xlane.xlu1 %1546  ;;  %v1522_v12 = vpop.xlane.xlu0 %1521 }
0x108f   : > { %v1548_v15 = vrot.slane %v1547_v59, 4  ;;  %v1523_v0 = vrot.slane %v1522_v12, 4 }
0x1091   : > { %v1549_v16 = vmax.f32 %v1547_v59, %v1548_v15  ;;  %v1524_v18 = vadd.f32 %v1523_v0, %v1522_v12 }
0x1092   : > { %v1534_v21 = vpop.xlane.xlu0 %1533 }
0x1093   : > { %v1550_v6 = vrot.slane %v1549_v16, 2  ;;  %v1525_v63 = vrot.slane %v1524_v18, 2  ;;  %v1535_v25 = vrot.slane %v1534_v21, 4 }
0x1095   : > { %v1536_v57 = vadd.f32 %v1535_v25, %v1534_v21  ;;  %v1526_v7 = vadd.f32 %v1525_v63, %v1524_v18  ;;  %v1551_v23 = vmax.f32 %v1549_v16, %v1550_v6 }
0x1097   : > { %v1537_v24 = vrot.slane %v1536_v57, 2  ;;  %v1527_v29 = vrot.slane %v1526_v7, 1  ;;  %v1552_v39 = vrot.slane %v1551_v23, 1 }
0x1099   : > { %v1538_v2 = vadd.f32 %v1537_v24, %v1536_v57  ;;  %v1528_v28 = vadd.f32 %v1527_v29, %v1526_v7  ;;  %v1553_v43 = vmax.f32 %v1551_v23, %v1552_v39 }
0x109b   : > { %1751 = vpush %v1528_v28  ;;  %v1539_v26 = vrot.slane %v1538_v2, 1 }
0x109d   : > { %v1540_v41 = vadd.f32 %v1539_v26, %v1538_v2 }
0x109f   : > { %1753 = vpush %v1540_v41 }
0x10a0   : > { %1755 = vpush %v1553_v43 }
0x10cc   : > { %s1752_s20 = spop %1751 }
0x10cd   : > { %v1530_v45 = vstv %s1752_s20 }
0x10ce   : > { %v1556_v34 = vsub.f32 %v2658_v55, %v1530_v45 }
0x10d0   : > { %s1754_s22 = spop %1753 }
0x10d1   : > { %s1756_s23 = spop %1755  ;;  %v1542_v20 = vstv %s1754_s22 }
0x10d2   : > { %v1555_v27 = vstv %s1756_s23 }
0x10d3   : > { %v1557_v42 = vmul.f32 %v1556_v34, %v1555_v27 }
0x10d5   : > { %v1558_v46 = vadd.f32 %v1557_v42, %v1542_v20 }
0x10d7   : > { %v1560_v50 = vsel %vm1559_vm8, %v1558_v46, 0.0 }
0x10d8   : > { %v1561_v60 = vadd.f32 %v1560_v50, %v1486_v54 }
0x10da   : > { %v1566_v33 = vsel %vm1565_vm0, %v1561_v60, 0.0 }
0x10db   : > { %v1567_v58 = vadd.f32 %v1566_v33, %v1564_v19 }
0x10dd   : > { %v1570_v51 = vadd.f32 %v1569_v35, %v1567_v58 }
0x10df   : > { %1571 = vst [vmem:[%s2667_s12] sm:$0x1] %v1570_v51 }
0x10e0   : > { %1878 = shalt.err (!%p1875_p4)
}
0x10e1   : > { %s1879_s28 = scalar_lea.hbm %s2700_s7, 16  ;;  %s1883_s13 = scalar_lea.hbm %s2749_s4, 32 }
0x10e2   : > { %p1880_p7 = scmp.ne.s32.totalorder %s2700_s7, %s1879_s28  ;;  %p1884_p10 = scmp.lt.u32.totalorder %s2700_s7, %s2749_s4 }
0x10e3   : > { %p1885_p11 = scmp.lt.u32.totalorder %s1883_s13, %s1879_s28  ;;  %p1887_p13 = scmp.lt.u32.totalorder %s1879_s28, %s2700_s7 }
0x10e4   : > { %p1881_p8 = pnand %p1880_p7, %p2028_p5 }
0x10e5   : > { %p1886_p12 = por %p1885_p11, %p1884_p10 }
0x10e6   : > { %p1882_p9 = pneg %p1881_p8 }
0x10e7   : > { %p1888_p0 = por %p1887_p13, %p1886_p12 }
0x10e9   : > { %p1889_p1 = pnand %p1888_p0, %p1882_p9 }
0x10eb   : > { %1892 = shalt.err (!%p1889_p1)
}
0x10ec   : > { %1757 = dma.vmem_to_hbm [thread:$0]  (%p2028_p5), %s2702_s5, 16, %s2700_s7, %s1573_s8  }
0x10ed PF: > { %p1763_p2 = scmp.ge.s32.totalorder %s1939_s18, 2  ;;  %s1597_s22 = sand.u32 1, %s1927_s15  }
0x10ee   : > { %s1598_s23 = scalar_lea.sflag [#allocation3], %s1597_s22 }
0x10ef   : > { %p1760_p3 = pnand %p1763_p2, %p2032_p6 }
0x10f1   : > { %1922 = dma.done.wait (!%p1760_p3), %s1598_s23, 16  }
0x10f2   : > { %1924 = vsyncadd (!%p1760_p3), %s1598_s23, 4294967280  ;;  %p14_p4 = scmp.ge.s32.totalorder %s2015_s21, 4   ;;  %s2758_s15 = smov %s1931_s16 }
0x10f3   : > { %s2759_s16 = smov %s1935_s17  ;;  %s2760_s17 = smov %s2026_s24 }
0x10f4   : > { %s2761_s18 = smov %s2015_s21  ;;  %16 = sbr.rel (!%p14_p4) target bundleno = 3 (0x3), region = 109 }
0x10fb   :  { %1602 = vsyncpa [#allocation3], 1 }
0x10fc   :  { %1604 = vsyncpa [#allocation3 + $0x1], 1 }

</bundles_post_ra>
